<compile_context>
chip_gen: v5e
topology: v5e:2x2
jax: 0.10.0
libtpu: 0.0.40
codegen_flags: <defaults>
</compile_context>

<pallas_src>
import jax
import jax.numpy as jnp
from jax import lax
from jax.experimental import pallas as pl
from jax.experimental.pallas import tpu as pltpu


LANE = 128  # one full lane group per gate / padded hidden width


def lstm_movement_kernel(x_ref, wih_ref, whh_ref, b_ref, wrow_ref, blin_ref,
                         out_ref):
    """Forward pass for one chunk of Bc independent sequences.

    x_ref    : (S*Bc, D)     time-major rows (row = t*Bc + b_local)        [VMEM]
    wih_ref  : (D, 4*128)    input->gates weights, gate-lane-padded        [VMEM]
    whh_ref  : (128, 4*128)  hidden->gates weights, gate-lane-padded,
                             rows >= H are zero                            [VMEM]
    b_ref    : (1, 4*128)    b_ih + b_hh, gate-lane-padded                 [VMEM]
    wrow_ref : (1, 128)      output-head weights, lanes >= H are zero      [VMEM]
    blin_ref : (1, 1)        output-head bias                              [SMEM]
    out_ref  : (S, Bc)       sigmoid(Linear(h_t)) per step & sequence      [VMEM]
    """
    S, Bc = out_ref.shape
    Hp = whh_ref.shape[0]                         # padded hidden width (128)

    # ---- Prologue: hoisted input projection, bias folded (one MXU matmul). ----
    xproj = (jnp.dot(x_ref[...], wih_ref[...],
                     preferred_element_type=jnp.float32)
             + b_ref[...])                        # (S*Bc, 4*128)

    whh = whh_ref[...]                            # recurrent weights resident

    # Register-resident carries; padded lanes stay exactly zero (weights/bias
    # padding is zero), so they never pollute the real lanes.
    h = jnp.zeros((Bc, Hp), jnp.float32)
    c = jnp.zeros((Bc, Hp), jnp.float32)

    hs = []
    # S is a small trace-time constant -> full unroll lets the LLO scheduler
    # overlap adjacent steps' MXU/EUP latency.
    for t in range(S):
        gates = xproj[t * Bc:(t + 1) * Bc, :] + jnp.dot(
            h, whh, preferred_element_type=jnp.float32)           # (Bc, 4*128)

        # Lane-aligned gate slices: each gate owns one full 128-lane group.
        i_g = jax.nn.sigmoid(gates[:, 0 * Hp:1 * Hp])
        f_g = jax.nn.sigmoid(gates[:, 1 * Hp:2 * Hp])
        g_g = jnp.tanh(gates[:, 2 * Hp:3 * Hp])
        o_g = jax.nn.sigmoid(gates[:, 3 * Hp:4 * Hp])

        c = f_g * c + i_g * g_g
        h = o_g * jnp.tanh(c)
        hs.append(h)

    # ---- Epilogue: output head as VPU multiply + lane reduction, single store. ----
    hs_all = jnp.stack(hs, axis=0)                                # (S, Bc, 128)
    y = jnp.sum(hs_all * wrow_ref[...], axis=-1)                  # (S, Bc)
    out_ref[...] = jax.nn.sigmoid(y + blin_ref[0, 0])


def lstm_movement_forward(x, w_ih, w_hh, b_ih, b_hh, w_lin, b_lin, *, block_b=8):
    """Batched forward over B independent sequences.

    x: (B, S, D) float32.  Returns (B, S) float32 — sigmoid(Linear(h_t)).
    """
    B, S, D = x.shape
    H4 = w_ih.shape[0]
    H = H4 // 4
    assert H <= LANE, "hidden_dim must fit in one 128-lane group"
    GW = 4 * LANE

    # Pad the batch up to a multiple of the per-chunk batch (fills sublanes).
    Bc = block_b
    Bp = ((B + Bc - 1) // Bc) * Bc
    if Bp != B:
        x = jnp.concatenate([x, jnp.zeros((Bp - B, S, D), x.dtype)], axis=0)
    G = Bp // Bc

    # Per-chunk time-major flat rows: row = t*Bc + b_local.
    x_k = (x.astype(jnp.float32)
             .reshape(G, Bc, S, D)
             .transpose(0, 2, 1, 3)
             .reshape(G, S * Bc, D))

    # Gate-lane-padded weights: gate k's H real columns at lane offset k*128.
    wih_p = (jnp.zeros((D, 4, LANE), jnp.float32)
             .at[:, :, :H].set(w_ih.T.reshape(D, 4, H))
             .reshape(D, GW))
    whh_p = (jnp.zeros((LANE, 4, LANE), jnp.float32)
             .at[:H, :, :H].set(w_hh.T.reshape(H, 4, H))
             .reshape(LANE, GW))
    b_p = (jnp.zeros((4, LANE), jnp.float32)
           .at[:, :H].set((b_ih + b_hh).reshape(4, H))
           .reshape(1, GW))
    wrow_p = jnp.zeros((1, LANE), jnp.float32).at[:, :H].set(w_lin.reshape(1, H))
    blin = b_lin.reshape(1, 1).astype(jnp.float32)

    out = pl.pallas_call(
        lstm_movement_kernel,
        out_shape=jax.ShapeDtypeStruct((G, S, Bc), jnp.float32),
        grid_spec=pltpu.PrefetchScalarGridSpec(
            num_scalar_prefetch=0,
            grid=(G,),
            in_specs=[
                pl.BlockSpec((None, S * Bc, D), lambda g: (g, 0, 0)),  # x chunk
                pl.BlockSpec((D, GW), lambda g: (0, 0)),               # W_ih^T pad
                pl.BlockSpec((LANE, GW), lambda g: (0, 0)),            # W_hh^T pad
                pl.BlockSpec((1, GW), lambda g: (0, 0)),               # b_ih + b_hh
                pl.BlockSpec((1, LANE), lambda g: (0, 0)),             # head weights
                pl.BlockSpec(memory_space=pltpu.SMEM),                 # head bias
            ],
            out_specs=pl.BlockSpec((None, S, Bc), lambda g: (g, 0, 0)),
        ),
        compiler_params=pltpu.CompilerParams(
            dimension_semantics=("parallel",)),  # shard chunks across TCs (v7x)
    )(x_k, wih_p, whh_p, b_p, wrow_p, blin)

    # (G, S, Bc) -> (Bp, S) -> (B, S)
    return out.transpose(0, 2, 1).reshape(Bp, S)[:B]


def reference_forward(x, w_ih, w_hh, b_ih, b_hh, w_lin, b_lin):
    """Pure-JAX reference for ONE sequence, matching torch.nn.LSTM + Linear + Sigmoid."""
    H = w_hh.shape[1]

    def step(carry, x_t):
        h, c = carry
        gates = x_t @ w_ih.T + b_ih + h @ w_hh.T + b_hh
        i = jax.nn.sigmoid(gates[0 * H:1 * H])
        f = jax.nn.sigmoid(gates[1 * H:2 * H])
        g = jnp.tanh(gates[2 * H:3 * H])
        o = jax.nn.sigmoid(gates[3 * H:4 * H])
        c = f * c + i * g
        h = o * jnp.tanh(c)
        return (h, c), h

    init = (jnp.zeros((H,), jnp.float32), jnp.zeros((H,), jnp.float32))
    _, hs = lax.scan(step, init, x)                   # (S, H)
    out = hs @ w_lin[0] + b_lin[0]
    return jax.nn.sigmoid(out)


if __name__ == "__main__":
    BATCH = 16
    SEQ_LEN = 8
    INPUT_DIM = 16
    HIDDEN_DIM = 32

    key = jax.random.PRNGKey(0)
    keys = jax.random.split(key, 8)
    k = 1.0 / jnp.sqrt(HIDDEN_DIM)

    # Deterministic synthetic parameters (PyTorch nn.LSTM / nn.Linear shapes).
    w_ih = jax.random.uniform(keys[0], (4 * HIDDEN_DIM, INPUT_DIM),
                              jnp.float32, -k, k)
    w_hh = jax.random.uniform(keys[1], (4 * HIDDEN_DIM, HIDDEN_DIM),
                              jnp.float32, -k, k)
    b_ih = jax.random.uniform(keys[2], (4 * HIDDEN_DIM,), jnp.float32, -k, k)
    b_hh = jax.random.uniform(keys[3], (4 * HIDDEN_DIM,), jnp.float32, -k, k)
    w_lin = jax.random.uniform(keys[4], (1, HIDDEN_DIM), jnp.float32, -k, k)
    b_lin = jax.random.uniform(keys[5], (1,), jnp.float32, -k, k)

    # Batch of independent unbatched sequences: (B, seq_len, input_dim).
    x = jax.random.normal(keys[6], (BATCH, SEQ_LEN, INPUT_DIM), jnp.float32)

    out = lstm_movement_forward(x, w_ih, w_hh, b_ih, b_hh, w_lin, b_lin)
    out = jax.block_until_ready(out)

    ref = jax.vmap(reference_forward,
                   in_axes=(0, None, None, None, None, None, None))(
        x, w_ih, w_hh, b_ih, b_hh, w_lin, b_lin)

    assert out.shape == (BATCH, SEQ_LEN), out.shape
    assert jnp.allclose(out, ref, atol=1e-5, rtol=1e-5), (out, ref)

    print("KERNEL_OK")
</pallas_src>

<mosaic_0001>
module attributes {stable_mosaic.version = 11 : i64} {
  func.func @lstm_movement_kernel(%arg0: i32, %arg1: memref<1x64x16xf32, #tpu.memory_space<vmem>>, %arg2: memref<16x512xf32, #tpu.memory_space<vmem>>, %arg3: memref<128x512xf32, #tpu.memory_space<vmem>>, %arg4: memref<1x512xf32, #tpu.memory_space<vmem>>, %arg5: memref<1x128xf32, #tpu.memory_space<vmem>>, %arg6: memref<1x1xf32, #tpu.memory_space<smem>>, %arg7: memref<1x8x8xf32, #tpu.memory_space<vmem>>) attributes {dimension_semantics = [#tpu.dimension_semantics<parallel>], iteration_bounds = array<i64: 2>, scalar_prefetch = 0 : i64, scratch_operands = 0 : i64, tpu.core_type = #tpu.core_type<tc>, window_params = [{transform_indices = @transform_0, window_bounds = array<i64: 1, 64, 16>}, {pipeline_mode = #tpu.pipeline_mode<synchronous>, transform_indices = @transform_1, window_bounds = array<i64: 16, 512>}, {pipeline_mode = #tpu.pipeline_mode<synchronous>, transform_indices = @transform_2, window_bounds = array<i64: 128, 512>}, {pipeline_mode = #tpu.pipeline_mode<synchronous>, transform_indices = @transform_3, window_bounds = array<i64: 1, 512>}, {pipeline_mode = #tpu.pipeline_mode<synchronous>, transform_indices = @transform_4, window_bounds = array<i64: 1, 128>}, {transform_indices = @transform_5, window_bounds = array<i64: 1, 1>}, {transform_indices = @transform_6, window_bounds = array<i64: 1, 8, 8>}]} {
    %c0 = arith.constant 0 : index
    %c0_0 = arith.constant 0 : index
    %c0_1 = arith.constant 0 : index
    %0 = vector.load %arg1[%c0, %c0_0, %c0_1] : memref<1x64x16xf32, #tpu.memory_space<vmem>>, vector<1x64x16xf32>
    %1 = vector.shape_cast %0 : vector<1x64x16xf32> to vector<64x16xf32>
    %c0_2 = arith.constant 0 : index
    %c0_3 = arith.constant 0 : index
    %2 = vector.load %arg2[%c0_2, %c0_3] : memref<16x512xf32, #tpu.memory_space<vmem>>, vector<16x512xf32>
    %cst = arith.constant dense<0.000000e+00> : vector<64x512xf32>
    %3 = tpu.matmul %1, %2, %cst {dimension_numbers = #tpu.dot_dimension_numbers<[1], [0], [0], [1], [0, 0, 1, 1], [], []>} : vector<64x16xf32>, vector<16x512xf32>, vector<64x512xf32> -> vector<64x512xf32>
    %c0_4 = arith.constant 0 : index
    %c0_5 = arith.constant 0 : index
    %4 = vector.load %arg4[%c0_4, %c0_5] : memref<1x512xf32, #tpu.memory_space<vmem>>, vector<1x512xf32>
    %5 = vector.broadcast %4 : vector<1x512xf32> to vector<64x512xf32>
    %6 = arith.addf %3, %5 : vector<64x512xf32>
    %c0_6 = arith.constant 0 : index
    %c0_7 = arith.constant 0 : index
    %7 = vector.load %arg3[%c0_6, %c0_7] : memref<128x512xf32, #tpu.memory_space<vmem>>, vector<128x512xf32>
    %cst_8 = arith.constant 0.000000e+00 : f32
    %8 = vector.broadcast %cst_8 : f32 to vector<8x128xf32>
    %cst_9 = arith.constant 0.000000e+00 : f32
    %9 = vector.broadcast %cst_9 : f32 to vector<8x128xf32>
    %10 = vector.extract_strided_slice %6 {offsets = [0, 0], sizes = [8, 512], strides = [1, 1]} : vector<64x512xf32> to vector<8x512xf32>
    %cst_10 = arith.constant dense<0.000000e+00> : vector<8x512xf32>
    %11 = tpu.matmul %8, %7, %cst_10 {dimension_numbers = #tpu.dot_dimension_numbers<[1], [0], [0], [1], [0, 0, 1, 1], [], []>} : vector<8x128xf32>, vector<128x512xf32>, vector<8x512xf32> -> vector<8x512xf32>
    %12 = arith.addf %10, %11 : vector<8x512xf32>
    %13 = vector.extract_strided_slice %12 {offsets = [0, 0], sizes = [8, 128], strides = [1, 1]} : vector<8x512xf32> to vector<8x128xf32>
    %14 = arith.negf %13 : vector<8x128xf32>
    %15 = math.exp %14 : vector<8x128xf32>
    %cst_11 = arith.constant 1.000000e+00 : f32
    %16 = vector.broadcast %cst_11 : f32 to vector<8x128xf32>
    %17 = arith.addf %16, %15 : vector<8x128xf32>
    %18 = arith.divf %16, %17 : vector<8x128xf32>
    %19 = vector.extract_strided_slice %12 {offsets = [0, 128], sizes = [8, 128], strides = [1, 1]} : vector<8x512xf32> to vector<8x128xf32>
    %20 = arith.negf %19 : vector<8x128xf32>
    %21 = math.exp %20 : vector<8x128xf32>
    %cst_12 = arith.constant 1.000000e+00 : f32
    %22 = vector.broadcast %cst_12 : f32 to vector<8x128xf32>
    %23 = arith.addf %22, %21 : vector<8x128xf32>
    %24 = arith.divf %22, %23 : vector<8x128xf32>
    %25 = vector.extract_strided_slice %12 {offsets = [0, 256], sizes = [8, 128], strides = [1, 1]} : vector<8x512xf32> to vector<8x128xf32>
    %26 = math.tanh %25 : vector<8x128xf32>
    %27 = vector.extract_strided_slice %12 {offsets = [0, 384], sizes = [8, 128], strides = [1, 1]} : vector<8x512xf32> to vector<8x128xf32>
    %28 = arith.negf %27 : vector<8x128xf32>
    %29 = math.exp %28 : vector<8x128xf32>
    %cst_13 = arith.constant 1.000000e+00 : f32
    %30 = vector.broadcast %cst_13 : f32 to vector<8x128xf32>
    %31 = arith.addf %30, %29 : vector<8x128xf32>
    %32 = arith.divf %30, %31 : vector<8x128xf32>
    %33 = arith.mulf %24, %9 : vector<8x128xf32>
    %34 = arith.mulf %18, %26 : vector<8x128xf32>
    %35 = arith.addf %33, %34 : vector<8x128xf32>
    %36 = math.tanh %35 : vector<8x128xf32>
    %37 = arith.mulf %32, %36 : vector<8x128xf32>
    %38 = vector.extract_strided_slice %6 {offsets = [8, 0], sizes = [8, 512], strides = [1, 1]} : vector<64x512xf32> to vector<8x512xf32>
    %cst_14 = arith.constant dense<0.000000e+00> : vector<8x512xf32>
    %39 = tpu.matmul %37, %7, %cst_14 {dimension_numbers = #tpu.dot_dimension_numbers<[1], [0], [0], [1], [0, 0, 1, 1], [], []>} : vector<8x128xf32>, vector<128x512xf32>, vector<8x512xf32> -> vector<8x512xf32>
    %40 = arith.addf %38, %39 : vector<8x512xf32>
    %41 = vector.extract_strided_slice %40 {offsets = [0, 0], sizes = [8, 128], strides = [1, 1]} : vector<8x512xf32> to vector<8x128xf32>
    %42 = arith.negf %41 : vector<8x128xf32>
    %43 = math.exp %42 : vector<8x128xf32>
    %cst_15 = arith.constant 1.000000e+00 : f32
    %44 = vector.broadcast %cst_15 : f32 to vector<8x128xf32>
    %45 = arith.addf %44, %43 : vector<8x128xf32>
    %46 = arith.divf %44, %45 : vector<8x128xf32>
    %47 = vector.extract_strided_slice %40 {offsets = [0, 128], sizes = [8, 128], strides = [1, 1]} : vector<8x512xf32> to vector<8x128xf32>
    %48 = arith.negf %47 : vector<8x128xf32>
    %49 = math.exp %48 : vector<8x128xf32>
    %cst_16 = arith.constant 1.000000e+00 : f32
    %50 = vector.broadcast %cst_16 : f32 to vector<8x128xf32>
    %51 = arith.addf %50, %49 : vector<8x128xf32>
    %52 = arith.divf %50, %51 : vector<8x128xf32>
    %53 = vector.extract_strided_slice %40 {offsets = [0, 256], sizes = [8, 128], strides = [1, 1]} : vector<8x512xf32> to vector<8x128xf32>
    %54 = math.tanh %53 : vector<8x128xf32>
    %55 = vector.extract_strided_slice %40 {offsets = [0, 384], sizes = [8, 128], strides = [1, 1]} : vector<8x512xf32> to vector<8x128xf32>
    %56 = arith.negf %55 : vector<8x128xf32>
    %57 = math.exp %56 : vector<8x128xf32>
    %cst_17 = arith.constant 1.000000e+00 : f32
    %58 = vector.broadcast %cst_17 : f32 to vector<8x128xf32>
    %59 = arith.addf %58, %57 : vector<8x128xf32>
    %60 = arith.divf %58, %59 : vector<8x128xf32>
    %61 = arith.mulf %52, %35 : vector<8x128xf32>
    %62 = arith.mulf %46, %54 : vector<8x128xf32>
    %63 = arith.addf %61, %62 : vector<8x128xf32>
    %64 = math.tanh %63 : vector<8x128xf32>
    %65 = arith.mulf %60, %64 : vector<8x128xf32>
    %66 = vector.extract_strided_slice %6 {offsets = [16, 0], sizes = [8, 512], strides = [1, 1]} : vector<64x512xf32> to vector<8x512xf32>
    %cst_18 = arith.constant dense<0.000000e+00> : vector<8x512xf32>
    %67 = tpu.matmul %65, %7, %cst_18 {dimension_numbers = #tpu.dot_dimension_numbers<[1], [0], [0], [1], [0, 0, 1, 1], [], []>} : vector<8x128xf32>, vector<128x512xf32>, vector<8x512xf32> -> vector<8x512xf32>
    %68 = arith.addf %66, %67 : vector<8x512xf32>
    %69 = vector.extract_strided_slice %68 {offsets = [0, 0], sizes = [8, 128], strides = [1, 1]} : vector<8x512xf32> to vector<8x128xf32>
    %70 = arith.negf %69 : vector<8x128xf32>
    %71 = math.exp %70 : vector<8x128xf32>
    %cst_19 = arith.constant 1.000000e+00 : f32
    %72 = vector.broadcast %cst_19 : f32 to vector<8x128xf32>
    %73 = arith.addf %72, %71 : vector<8x128xf32>
    %74 = arith.divf %72, %73 : vector<8x128xf32>
    %75 = vector.extract_strided_slice %68 {offsets = [0, 128], sizes = [8, 128], strides = [1, 1]} : vector<8x512xf32> to vector<8x128xf32>
    %76 = arith.negf %75 : vector<8x128xf32>
    %77 = math.exp %76 : vector<8x128xf32>
    %cst_20 = arith.constant 1.000000e+00 : f32
    %78 = vector.broadcast %cst_20 : f32 to vector<8x128xf32>
    %79 = arith.addf %78, %77 : vector<8x128xf32>
    %80 = arith.divf %78, %79 : vector<8x128xf32>
    %81 = vector.extract_strided_slice %68 {offsets = [0, 256], sizes = [8, 128], strides = [1, 1]} : vector<8x512xf32> to vector<8x128xf32>
    %82 = math.tanh %81 : vector<8x128xf32>
    %83 = vector.extract_strided_slice %68 {offsets = [0, 384], sizes = [8, 128], strides = [1, 1]} : vector<8x512xf32> to vector<8x128xf32>
    %84 = arith.negf %83 : vector<8x128xf32>
    %85 = math.exp %84 : vector<8x128xf32>
    %cst_21 = arith.constant 1.000000e+00 : f32
    %86 = vector.broadcast %cst_21 : f32 to vector<8x128xf32>
    %87 = arith.addf %86, %85 : vector<8x128xf32>
    %88 = arith.divf %86, %87 : vector<8x128xf32>
    %89 = arith.mulf %80, %63 : vector<8x128xf32>
    %90 = arith.mulf %74, %82 : vector<8x128xf32>
    %91 = arith.addf %89, %90 : vector<8x128xf32>
    %92 = math.tanh %91 : vector<8x128xf32>
    %93 = arith.mulf %88, %92 : vector<8x128xf32>
    %94 = vector.extract_strided_slice %6 {offsets = [24, 0], sizes = [8, 512], strides = [1, 1]} : vector<64x512xf32> to vector<8x512xf32>
    %cst_22 = arith.constant dense<0.000000e+00> : vector<8x512xf32>
    %95 = tpu.matmul %93, %7, %cst_22 {dimension_numbers = #tpu.dot_dimension_numbers<[1], [0], [0], [1], [0, 0, 1, 1], [], []>} : vector<8x128xf32>, vector<128x512xf32>, vector<8x512xf32> -> vector<8x512xf32>
    %96 = arith.addf %94, %95 : vector<8x512xf32>
    %97 = vector.extract_strided_slice %96 {offsets = [0, 0], sizes = [8, 128], strides = [1, 1]} : vector<8x512xf32> to vector<8x128xf32>
    %98 = arith.negf %97 : vector<8x128xf32>
    %99 = math.exp %98 : vector<8x128xf32>
    %cst_23 = arith.constant 1.000000e+00 : f32
    %100 = vector.broadcast %cst_23 : f32 to vector<8x128xf32>
    %101 = arith.addf %100, %99 : vector<8x128xf32>
    %102 = arith.divf %100, %101 : vector<8x128xf32>
    %103 = vector.extract_strided_slice %96 {offsets = [0, 128], sizes = [8, 128], strides = [1, 1]} : vector<8x512xf32> to vector<8x128xf32>
    %104 = arith.negf %103 : vector<8x128xf32>
    %105 = math.exp %104 : vector<8x128xf32>
    %cst_24 = arith.constant 1.000000e+00 : f32
    %106 = vector.broadcast %cst_24 : f32 to vector<8x128xf32>
    %107 = arith.addf %106, %105 : vector<8x128xf32>
    %108 = arith.divf %106, %107 : vector<8x128xf32>
    %109 = vector.extract_strided_slice %96 {offsets = [0, 256], sizes = [8, 128], strides = [1, 1]} : vector<8x512xf32> to vector<8x128xf32>
    %110 = math.tanh %109 : vector<8x128xf32>
    %111 = vector.extract_strided_slice %96 {offsets = [0, 384], sizes = [8, 128], strides = [1, 1]} : vector<8x512xf32> to vector<8x128xf32>
    %112 = arith.negf %111 : vector<8x128xf32>
    %113 = math.exp %112 : vector<8x128xf32>
    %cst_25 = arith.constant 1.000000e+00 : f32
    %114 = vector.broadcast %cst_25 : f32 to vector<8x128xf32>
    %115 = arith.addf %114, %113 : vector<8x128xf32>
    %116 = arith.divf %114, %115 : vector<8x128xf32>
    %117 = arith.mulf %108, %91 : vector<8x128xf32>
    %118 = arith.mulf %102, %110 : vector<8x128xf32>
    %119 = arith.addf %117, %118 : vector<8x128xf32>
    %120 = math.tanh %119 : vector<8x128xf32>
    %121 = arith.mulf %116, %120 : vector<8x128xf32>
    %122 = vector.extract_strided_slice %6 {offsets = [32, 0], sizes = [8, 512], strides = [1, 1]} : vector<64x512xf32> to vector<8x512xf32>
    %cst_26 = arith.constant dense<0.000000e+00> : vector<8x512xf32>
    %123 = tpu.matmul %121, %7, %cst_26 {dimension_numbers = #tpu.dot_dimension_numbers<[1], [0], [0], [1], [0, 0, 1, 1], [], []>} : vector<8x128xf32>, vector<128x512xf32>, vector<8x512xf32> -> vector<8x512xf32>
    %124 = arith.addf %122, %123 : vector<8x512xf32>
    %125 = vector.extract_strided_slice %124 {offsets = [0, 0], sizes = [8, 128], strides = [1, 1]} : vector<8x512xf32> to vector<8x128xf32>
    %126 = arith.negf %125 : vector<8x128xf32>
    %127 = math.exp %126 : vector<8x128xf32>
    %cst_27 = arith.constant 1.000000e+00 : f32
    %128 = vector.broadcast %cst_27 : f32 to vector<8x128xf32>
    %129 = arith.addf %128, %127 : vector<8x128xf32>
    %130 = arith.divf %128, %129 : vector<8x128xf32>
    %131 = vector.extract_strided_slice %124 {offsets = [0, 128], sizes = [8, 128], strides = [1, 1]} : vector<8x512xf32> to vector<8x128xf32>
    %132 = arith.negf %131 : vector<8x128xf32>
    %133 = math.exp %132 : vector<8x128xf32>
    %cst_28 = arith.constant 1.000000e+00 : f32
    %134 = vector.broadcast %cst_28 : f32 to vector<8x128xf32>
    %135 = arith.addf %134, %133 : vector<8x128xf32>
    %136 = arith.divf %134, %135 : vector<8x128xf32>
    %137 = vector.extract_strided_slice %124 {offsets = [0, 256], sizes = [8, 128], strides = [1, 1]} : vector<8x512xf32> to vector<8x128xf32>
    %138 = math.tanh %137 : vector<8x128xf32>
    %139 = vector.extract_strided_slice %124 {offsets = [0, 384], sizes = [8, 128], strides = [1, 1]} : vector<8x512xf32> to vector<8x128xf32>
    %140 = arith.negf %139 : vector<8x128xf32>
    %141 = math.exp %140 : vector<8x128xf32>
    %cst_29 = arith.constant 1.000000e+00 : f32
    %142 = vector.broadcast %cst_29 : f32 to vector<8x128xf32>
    %143 = arith.addf %142, %141 : vector<8x128xf32>
    %144 = arith.divf %142, %143 : vector<8x128xf32>
    %145 = arith.mulf %136, %119 : vector<8x128xf32>
    %146 = arith.mulf %130, %138 : vector<8x128xf32>
    %147 = arith.addf %145, %146 : vector<8x128xf32>
    %148 = math.tanh %147 : vector<8x128xf32>
    %149 = arith.mulf %144, %148 : vector<8x128xf32>
    %150 = vector.extract_strided_slice %6 {offsets = [40, 0], sizes = [8, 512], strides = [1, 1]} : vector<64x512xf32> to vector<8x512xf32>
    %cst_30 = arith.constant dense<0.000000e+00> : vector<8x512xf32>
    %151 = tpu.matmul %149, %7, %cst_30 {dimension_numbers = #tpu.dot_dimension_numbers<[1], [0], [0], [1], [0, 0, 1, 1], [], []>} : vector<8x128xf32>, vector<128x512xf32>, vector<8x512xf32> -> vector<8x512xf32>
    %152 = arith.addf %150, %151 : vector<8x512xf32>
    %153 = vector.extract_strided_slice %152 {offsets = [0, 0], sizes = [8, 128], strides = [1, 1]} : vector<8x512xf32> to vector<8x128xf32>
    %154 = arith.negf %153 : vector<8x128xf32>
    %155 = math.exp %154 : vector<8x128xf32>
    %cst_31 = arith.constant 1.000000e+00 : f32
    %156 = vector.broadcast %cst_31 : f32 to vector<8x128xf32>
    %157 = arith.addf %156, %155 : vector<8x128xf32>
    %158 = arith.divf %156, %157 : vector<8x128xf32>
    %159 = vector.extract_strided_slice %152 {offsets = [0, 128], sizes = [8, 128], strides = [1, 1]} : vector<8x512xf32> to vector<8x128xf32>
    %160 = arith.negf %159 : vector<8x128xf32>
    %161 = math.exp %160 : vector<8x128xf32>
    %cst_32 = arith.constant 1.000000e+00 : f32
    %162 = vector.broadcast %cst_32 : f32 to vector<8x128xf32>
    %163 = arith.addf %162, %161 : vector<8x128xf32>
    %164 = arith.divf %162, %163 : vector<8x128xf32>
    %165 = vector.extract_strided_slice %152 {offsets = [0, 256], sizes = [8, 128], strides = [1, 1]} : vector<8x512xf32> to vector<8x128xf32>
    %166 = math.tanh %165 : vector<8x128xf32>
    %167 = vector.extract_strided_slice %152 {offsets = [0, 384], sizes = [8, 128], strides = [1, 1]} : vector<8x512xf32> to vector<8x128xf32>
    %168 = arith.negf %167 : vector<8x128xf32>
    %169 = math.exp %168 : vector<8x128xf32>
    %cst_33 = arith.constant 1.000000e+00 : f32
    %170 = vector.broadcast %cst_33 : f32 to vector<8x128xf32>
    %171 = arith.addf %170, %169 : vector<8x128xf32>
    %172 = arith.divf %170, %171 : vector<8x128xf32>
    %173 = arith.mulf %164, %147 : vector<8x128xf32>
    %174 = arith.mulf %158, %166 : vector<8x128xf32>
    %175 = arith.addf %173, %174 : vector<8x128xf32>
    %176 = math.tanh %175 : vector<8x128xf32>
    %177 = arith.mulf %172, %176 : vector<8x128xf32>
    %178 = vector.extract_strided_slice %6 {offsets = [48, 0], sizes = [8, 512], strides = [1, 1]} : vector<64x512xf32> to vector<8x512xf32>
    %cst_34 = arith.constant dense<0.000000e+00> : vector<8x512xf32>
    %179 = tpu.matmul %177, %7, %cst_34 {dimension_numbers = #tpu.dot_dimension_numbers<[1], [0], [0], [1], [0, 0, 1, 1], [], []>} : vector<8x128xf32>, vector<128x512xf32>, vector<8x512xf32> -> vector<8x512xf32>
    %180 = arith.addf %178, %179 : vector<8x512xf32>
    %181 = vector.extract_strided_slice %180 {offsets = [0, 0], sizes = [8, 128], strides = [1, 1]} : vector<8x512xf32> to vector<8x128xf32>
    %182 = arith.negf %181 : vector<8x128xf32>
    %183 = math.exp %182 : vector<8x128xf32>
    %cst_35 = arith.constant 1.000000e+00 : f32
    %184 = vector.broadcast %cst_35 : f32 to vector<8x128xf32>
    %185 = arith.addf %184, %183 : vector<8x128xf32>
    %186 = arith.divf %184, %185 : vector<8x128xf32>
    %187 = vector.extract_strided_slice %180 {offsets = [0, 128], sizes = [8, 128], strides = [1, 1]} : vector<8x512xf32> to vector<8x128xf32>
    %188 = arith.negf %187 : vector<8x128xf32>
    %189 = math.exp %188 : vector<8x128xf32>
    %cst_36 = arith.constant 1.000000e+00 : f32
    %190 = vector.broadcast %cst_36 : f32 to vector<8x128xf32>
    %191 = arith.addf %190, %189 : vector<8x128xf32>
    %192 = arith.divf %190, %191 : vector<8x128xf32>
    %193 = vector.extract_strided_slice %180 {offsets = [0, 256], sizes = [8, 128], strides = [1, 1]} : vector<8x512xf32> to vector<8x128xf32>
    %194 = math.tanh %193 : vector<8x128xf32>
    %195 = vector.extract_strided_slice %180 {offsets = [0, 384], sizes = [8, 128], strides = [1, 1]} : vector<8x512xf32> to vector<8x128xf32>
    %196 = arith.negf %195 : vector<8x128xf32>
    %197 = math.exp %196 : vector<8x128xf32>
    %cst_37 = arith.constant 1.000000e+00 : f32
    %198 = vector.broadcast %cst_37 : f32 to vector<8x128xf32>
    %199 = arith.addf %198, %197 : vector<8x128xf32>
    %200 = arith.divf %198, %199 : vector<8x128xf32>
    %201 = arith.mulf %192, %175 : vector<8x128xf32>
    %202 = arith.mulf %186, %194 : vector<8x128xf32>
    %203 = arith.addf %201, %202 : vector<8x128xf32>
    %204 = math.tanh %203 : vector<8x128xf32>
    %205 = arith.mulf %200, %204 : vector<8x128xf32>
    %206 = vector.extract_strided_slice %6 {offsets = [56, 0], sizes = [8, 512], strides = [1, 1]} : vector<64x512xf32> to vector<8x512xf32>
    %cst_38 = arith.constant dense<0.000000e+00> : vector<8x512xf32>
    %207 = tpu.matmul %205, %7, %cst_38 {dimension_numbers = #tpu.dot_dimension_numbers<[1], [0], [0], [1], [0, 0, 1, 1], [], []>} : vector<8x128xf32>, vector<128x512xf32>, vector<8x512xf32> -> vector<8x512xf32>
    %208 = arith.addf %206, %207 : vector<8x512xf32>
    %209 = vector.extract_strided_slice %208 {offsets = [0, 0], sizes = [8, 128], strides = [1, 1]} : vector<8x512xf32> to vector<8x128xf32>
    %210 = arith.negf %209 : vector<8x128xf32>
    %211 = math.exp %210 : vector<8x128xf32>
    %cst_39 = arith.constant 1.000000e+00 : f32
    %212 = vector.broadcast %cst_39 : f32 to vector<8x128xf32>
    %213 = arith.addf %212, %211 : vector<8x128xf32>
    %214 = arith.divf %212, %213 : vector<8x128xf32>
    %215 = vector.extract_strided_slice %208 {offsets = [0, 128], sizes = [8, 128], strides = [1, 1]} : vector<8x512xf32> to vector<8x128xf32>
    %216 = arith.negf %215 : vector<8x128xf32>
    %217 = math.exp %216 : vector<8x128xf32>
    %cst_40 = arith.constant 1.000000e+00 : f32
    %218 = vector.broadcast %cst_40 : f32 to vector<8x128xf32>
    %219 = arith.addf %218, %217 : vector<8x128xf32>
    %220 = arith.divf %218, %219 : vector<8x128xf32>
    %221 = vector.extract_strided_slice %208 {offsets = [0, 256], sizes = [8, 128], strides = [1, 1]} : vector<8x512xf32> to vector<8x128xf32>
    %222 = math.tanh %221 : vector<8x128xf32>
    %223 = vector.extract_strided_slice %208 {offsets = [0, 384], sizes = [8, 128], strides = [1, 1]} : vector<8x512xf32> to vector<8x128xf32>
    %224 = arith.negf %223 : vector<8x128xf32>
    %225 = math.exp %224 : vector<8x128xf32>
    %cst_41 = arith.constant 1.000000e+00 : f32
    %226 = vector.broadcast %cst_41 : f32 to vector<8x128xf32>
    %227 = arith.addf %226, %225 : vector<8x128xf32>
    %228 = arith.divf %226, %227 : vector<8x128xf32>
    %229 = arith.mulf %220, %203 : vector<8x128xf32>
    %230 = arith.mulf %214, %222 : vector<8x128xf32>
    %231 = arith.addf %229, %230 : vector<8x128xf32>
    %232 = math.tanh %231 : vector<8x128xf32>
    %233 = arith.mulf %228, %232 : vector<8x128xf32>
    %234 = vector.shape_cast %37 : vector<8x128xf32> to vector<1x8x128xf32>
    %235 = vector.shape_cast %65 : vector<8x128xf32> to vector<1x8x128xf32>
    %236 = vector.shape_cast %93 : vector<8x128xf32> to vector<1x8x128xf32>
    %237 = vector.shape_cast %121 : vector<8x128xf32> to vector<1x8x128xf32>
    %238 = vector.shape_cast %149 : vector<8x128xf32> to vector<1x8x128xf32>
    %239 = vector.shape_cast %177 : vector<8x128xf32> to vector<1x8x128xf32>
    %240 = vector.shape_cast %205 : vector<8x128xf32> to vector<1x8x128xf32>
    %241 = vector.shape_cast %233 : vector<8x128xf32> to vector<1x8x128xf32>
    %242 = tpu.concatenate %234, %235, %236, %237, %238, %239, %240, %241 in 0 : vector<1x8x128xf32>, vector<1x8x128xf32>, vector<1x8x128xf32>, vector<1x8x128xf32>, vector<1x8x128xf32>, vector<1x8x128xf32>, vector<1x8x128xf32>, vector<1x8x128xf32> -> vector<8x8x128xf32>
    %c0_42 = arith.constant 0 : index
    %c0_43 = arith.constant 0 : index
    %243 = vector.load %arg5[%c0_42, %c0_43] : memref<1x128xf32, #tpu.memory_space<vmem>>, vector<1x128xf32>
    %244 = vector.shape_cast %243 : vector<1x128xf32> to vector<1x1x128xf32>
    %245 = vector.broadcast %244 : vector<1x1x128xf32> to vector<8x8x128xf32>
    %246 = arith.mulf %242, %245 : vector<8x8x128xf32>
    %cst_44 = arith.constant dense<0.000000e+00> : vector<8x8xf32>
    %247 = vector.multi_reduction <add>, %246, %cst_44 [2] : vector<8x8x128xf32> to vector<8x8xf32>
    %c0_45 = arith.constant 0 : index
    %c0_46 = arith.constant 0 : index
    %248 = memref.load %arg6[%c0_45, %c0_46] : memref<1x1xf32, #tpu.memory_space<smem>>
    %249 = vector.broadcast %248 : f32 to vector<8x8xf32>
    %250 = arith.addf %247, %249 : vector<8x8xf32>
    %251 = arith.negf %250 : vector<8x8xf32>
    %252 = math.exp %251 : vector<8x8xf32>
    %cst_47 = arith.constant 1.000000e+00 : f32
    %253 = vector.broadcast %cst_47 : f32 to vector<8x8xf32>
    %254 = arith.addf %253, %252 : vector<8x8xf32>
    %255 = arith.divf %253, %254 : vector<8x8xf32>
    %c0_48 = arith.constant 0 : index
    %c0_49 = arith.constant 0 : index
    %c0_50 = arith.constant 0 : index
    %256 = vector.load %arg7[%c0_48, %c0_49, %c0_50] : memref<1x8x8xf32, #tpu.memory_space<vmem>>, vector<1x8x8xf32>
    %257 = vector.shape_cast %256 : vector<1x8x8xf32> to vector<8x8xf32>
    %258 = vector.shape_cast %255 : vector<8x8xf32> to vector<1x8x8xf32>
    tpu.vector_store %arg7[%c0_48, %c0_49, %c0_50], %258 {strides = array<i32>} : memref<1x8x8xf32, #tpu.memory_space<vmem>>, vector<1x8x8xf32>,
    return
  }
  func.func @transform_0(%arg0: i32) -> (i32, i32, i32) {
    %c0_i32 = arith.constant 0 : i32
    %c0_i32_0 = arith.constant 0 : i32
    %c0_i32_1 = arith.constant 0 : i32
    return %arg0, %c0_i32, %c0_i32_0 : i32, i32, i32
  }
  func.func @transform_1(%arg0: i32) -> (i32, i32) {
    %c0_i32 = arith.constant 0 : i32
    %c0_i32_0 = arith.constant 0 : i32
    %c0_i32_1 = arith.constant 0 : i32
    return %c0_i32, %c0_i32_0 : i32, i32
  }
  func.func @transform_2(%arg0: i32) -> (i32, i32) {
    %c0_i32 = arith.constant 0 : i32
    %c0_i32_0 = arith.constant 0 : i32
    %c0_i32_1 = arith.constant 0 : i32
    return %c0_i32, %c0_i32_0 : i32, i32
  }
  func.func @transform_3(%arg0: i32) -> (i32, i32) {
    %c0_i32 = arith.constant 0 : i32
    %c0_i32_0 = arith.constant 0 : i32
    %c0_i32_1 = arith.constant 0 : i32
    return %c0_i32, %c0_i32_0 : i32, i32
  }
  func.func @transform_4(%arg0: i32) -> (i32, i32) {
    %c0_i32 = arith.constant 0 : i32
    %c0_i32_0 = arith.constant 0 : i32
    %c0_i32_1 = arith.constant 0 : i32
    return %c0_i32, %c0_i32_0 : i32, i32
  }
  func.func @transform_5(%arg0: i32) -> (i32, i32) {
    %c0_i32 = arith.constant 0 : i32
    %c0_i32_0 = arith.constant 0 : i32
    %c0_i32_1 = arith.constant 0 : i32
    return %c0_i32, %c0_i32_0 : i32, i32
  }
  func.func @transform_6(%arg0: i32) -> (i32, i32, i32) {
    %c0_i32 = arith.constant 0 : i32
    %c0_i32_0 = arith.constant 0 : i32
    %c0_i32_1 = arith.constant 0 : i32
    return %arg0, %c0_i32, %c0_i32_0 : i32, i32, i32
  }
}

</mosaic_0001>

<bundles_post_ra>
// kernel: tpu_custom_call.1
= control target key start
LH: loop header
LB: loop body
LE: loop exit
PB: predicated region body
PF: predicated region fallthrough
CT: control target
= control target key end

     0   :  { %s3797_s0 = inlined_call_operand.vmem [shape: f32[2,64,16], index: 0, kind: input, shape index: {}]   ;;  %s3798_s1 = inlined_call_operand.vmem [shape: f32[16,512], index: 1, kind: input, shape index: {}]   ;;  %s3799_s2 = inlined_call_operand.hbm [shape: f32[128,512], index: 2, kind: input, shape index: {}]   ;;  %s3800_s3 = inlined_call_operand.vmem [shape: f32[1,512], index: 3, kind: input, shape index: {}]   ;;  %s3801_s4 = inlined_call_operand.vmem [shape: f32[1,128], index: 4, kind: input, shape index: {}]   ;;  %s3802_s5 = inlined_call_operand.<no memory space> [shape: f32[1,1], index: 5, kind: input, shape index: {}]   ;;  %s3803_s6 = inlined_call_operand.hbm [shape: f32[2,8,8], index: 6, kind: output, shape index: {}]  }
   0x1   :  { %11 = sst [smem:[#allocation2]] %s3802_s5 }
   0x2   :  { %12 = vsyncpa [#allocation4], 0 }
   0x3   :  { %13 = vsyncpa [#allocation5], 0 }
   0x4   :  { %15 = vsyncpa [#allocation5 + $0x1], 0  ;;  %s2532_s23 = smov 0   ;;  %s2534_s24 = smov 0  }
   0x5   :  { %s2536_s25 = smov 0   ;;  %s2538_s26 = smov 0  }
   0x6 LB: > { %s2553_s5 = sadd.s32 4294967295, %s2488_s26   ;;  %s2035_s27 = sadd.s32 4294967294, %s2488_s26   ;;  %s2488_s26 = sphi %s2538_s26, %s4124_s26   ;;  %s2484_s25 = sphi %s2536_s25, %s4123_s25   ;;  %s2480_s24 = sphi %s2534_s24, %s4122_s24   ;;  %s2476_s23 = sphi %s2532_s23, %s4121_s23  }
   0x7   : > { %s2557_s28 = sadd.s32 1, %s2488_s26   ;;  %s159_s29 = sadd.s32 1, %s2484_s25 }
   0x8   : > { %s156_s30 = ssub.s32 %s2488_s26, %s2557_s28  ;;  %p169_p0 = scmp.ne.s32.totalorder %s2484_s25, %s2480_s24 }
   0x9   : > { %p157_p1 = scmp.eq.s32.totalorder %s156_s30, 0  ;;  %p170_p2 = scmp.eq.s32.totalorder %s2553_s5, 1 }
   0xa   : > { %p175_p3 = scmp.ne.s32.totalorder %s2480_s24, %s2476_s23  ;;  %p176_p4 = scmp.eq.s32.totalorder %s2035_s27, 1 }
   0xb   : > { %s2568_s7 = scalar_select %p157_p1, %s2484_s25, %s159_s29  }
   0xc   : > { %p2570_p5 = por %p170_p2, %p169_p0  ;;  %p2574_p6 = por %p176_p4, %p175_p3 }
   0xd   : > { %p2036_p7 = scmp.ge.s32.totalorder %s2488_s26, 1  ;;  %p183_p8 = scmp.lt.s32.totalorder %s2488_s26, 3 }
   0xe   : > { %p2127_p9 = scmp.eq.s32.totalorder %s2553_s5, 0  ;;  %s197_s12 = sshll.u32 %s3799_s2, 4  ;;  %s198_s12 = int_to_ptr.hbm [resolvable:$true] %s197_s12 }
   0xf   : > { %p184_p10 = pnand %p2036_p7, %p183_p8  ;;  %s2490_s13 = smov [#allocation3]  }
  0x10   : > { %s199_s14 = sshll.u32 %s2490_s13, 4  ;;  %s2491_s15 = smov 512   ;;  %s200_s14 = int_to_ptr.vmem [resolvable:$true] %s199_s14 }
  0x11   : > { %p2119_p11 = pneg %p184_p10  ;;  %s2492_s16 = smov 32  }
  0x12   : > { %232 = sbr.rel (%p184_p10) target bundleno = 1609 (0x649), region = 44 }
  0x13   : > { %p2120_p12 = pnand %p2127_p9, %p2119_p11 }
  0x15   : > { %2122 = dma.hbm_to_vmem [thread:$0]  (!%p2120_p12), %s198_s12, 8192, %s200_s14, [#allocation4], %s2491_s15, %s2491_s15, %s2492_s16  }
  0x17   : > { %2467 = dma.done.wait (%p2127_p9), [#allocation4], 8192  }
  0x18   : > { %2469 = vsyncadd (%p2127_p9), [#allocation4], 4294959104  ;;  %p263_p13 = scmp.lt.s32.totalorder %s2553_s5, 1  ;;  %v280_v0 = vld [vmem:[%s3798_s1 + $0x20] sm:$0xff]  ;;  %v281_v1 = vld [vmem:[%s3798_s1 + $0x28] sm:$0xff]  ;;  %vm294_vm0 = vcmask 130048  }
  0x19   : > { %v282_v2 = vld [vmem:[%s3798_s1 + $0x30] sm:$0xff]  ;;  %333 = vmatpush.msra.mxu0 %v280_v0  ;;  %374 = vmatpush.msra.mxu1 %v281_v1  ;;  %v283_v3 = vld [vmem:[%s3798_s1 + $0x38] sm:$0xff]  ;;  %v276_v4 = vld [vmem:[%s3798_s1] sm:$0xff]  ;;  %s1751_s12 = sld [smem:[#allocation2]]  ;;  %s260_s13 = sand.u32 1, %s2480_s24  }
  0x1a   : > { %s264_s17 = scalar_select %p263_p13, %s2553_s5, 1  ;;  %v277_v5 = vld [vmem:[%s3798_s1 + $0x8] sm:$0xff]  ;;  %415 = vmatpush.msra.mxu2 %v282_v2  ;;  %456 = vmatpush.msra.mxu3 %v283_v3  ;;  %v278_v6 = vld [vmem:[%s3798_s1 + $0x10] sm:$0xff]  ;;  %v279_v7 = vld [vmem:[%s3798_s1 + $0x18] sm:$0xff] }
  0x1b   : > { %334 = vmatpush.msra.mxu0 %v276_v4  ;;  %375 = vmatpush.msra.mxu1 %v277_v5  ;;  %v2622_v9 = vld [vmem:[#allocation3 + $0x1e0] sm:$0xff]  ;;  %v2624_v10 = vld [vmem:[#allocation3 + $0x1e8] sm:$0xff]  ;;  %v2628_v11 = vld [vmem:[#allocation3 + $0x1f8] sm:$0xff]  ;;  %s3751_s14 = sshll.u32 %s260_s13, 3  ;;  %s2109_s15 = sshll.u32 %s2553_s5, 3 }
  0x1c   : > { %s2112_s18 = sshll.u32 %s264_s17, 6  ;;  %416 = vmatpush.msra.mxu2 %v278_v6  ;;  %457 = vmatpush.msra.mxu3 %v279_v7  ;;  %v2632_v12 = vld [vmem:[#allocation3 + $0x1c0] sm:$0xff]  ;;  %v2634_v13 = vld [vmem:[#allocation3 + $0x1c8] sm:$0xff]  ;;  %v2638_v14 = vld [vmem:[#allocation3 + $0x1d8] sm:$0xff]  ;;  %s1959_s5 = scalar_lea.hbm %s3803_s6, %s2109_s15 }
  0x1d   : > { %s2595_s21 = scalar_lea.vmem %s3797_s0, %s2112_s18  ;;  %547 = vmatpush.msrb.mxu0 %v2622_v9  ;;  %567 = vmatpush.msrb.mxu1 %v2624_v10  ;;  %v2640_v15 = vld [vmem:[#allocation3 + $0x1f0] sm:$0xff]  ;;  %v2643_v16 = vld [vmem:[#allocation3 + $0x1a0] sm:$0xff]  ;;  %v2645_v17 = vld [vmem:[#allocation3 + $0x1a8] sm:$0xff]  ;;  %s262_s18 = scalar_lea.vmem [#allocation6], %s3751_s14 }
  0x1e   : > { %v268_v8 = vld [vmem:[%s2595_s21] sm:$0xff]  ;;  %607 = vmatpush.msrb.mxu3 %v2628_v11  ;;  %587 = vmatpush.msrb.mxu2 %v2640_v15  ;;  %v2648_v18 = vld [vmem:[#allocation3 + $0x1d0] sm:$0xff]  ;;  %v2652_v19 = vld [vmem:[#allocation3 + $0x1b8] sm:$0xff]  ;;  %s1961_s19 = sshll.u32 %s262_s18, 4  ;;  %s1963_s20 = sshll.u32 %s1959_s5, 4  ;;  %s1962_s19 = int_to_ptr.vmem [resolvable:$true] %s1961_s19  ;;  %s1964_s20 = int_to_ptr.hbm [resolvable:$true] %s1963_s20 }
  0x1f   : > { %2044 = vmatmul.msk.f32.vlgmr.msra.gmra.mxu0 %vm294_vm0, %v268_v8  ;;  %2052 = vmatmul.msk.f32.vlgmr.msra.gmra.mxu1 %vm294_vm0, %v268_v8  ;;  %v269_v20 = vld [vmem:[%s2595_s21 + $0x8] sm:$0xff]  ;;  %v2657_v21 = vld [vmem:[#allocation3 + $0x1b0] sm:$0xff]  ;;  %v2661_v22 = vld [vmem:[#allocation3 + $0x180] sm:$0xff]  ;;  %s1949_s22 = scalar_lea.sflag [#allocation5], %s260_s13  ;;  %s2442_s10 = scalar_lea.hbm %s3803_s6, 16 }
  0x20   : > { %2060 = vmatmul.msk.f32.vlgmr.msra.gmra.mxu2 %vm294_vm0, %v268_v8  ;;  %2068 = vmatmul.msk.f32.vlgmr.msra.gmra.mxu3 %vm294_vm0, %v268_v8  ;;  %v2663_v23 = vld [vmem:[#allocation3 + $0x188] sm:$0xff]  ;;  %v2669_v24 = vld [vmem:[#allocation3 + $0x198] sm:$0xff]  ;;  %v2671_v25 = vld [vmem:[#allocation3 + $0x190] sm:$0xff] }
  0x21   : > { %548 = vmatpush.msrb.mxu0 %v2632_v12  ;;  %568 = vmatpush.msrb.mxu1 %v2634_v13  ;;  %v2675_v26 = vld [vmem:[#allocation3 + $0x160] sm:$0xff]  ;;  %v2677_v27 = vld [vmem:[#allocation3 + $0x168] sm:$0xff]  ;;  %v2681_v28 = vld [vmem:[#allocation3 + $0x178] sm:$0xff] }
  0x22   : > { %608 = vmatpush.msrb.mxu3 %v2638_v14  ;;  %588 = vmatpush.msrb.mxu2 %v2648_v18  ;;  %v2683_v29 = vld [vmem:[#allocation3 + $0x170] sm:$0xff]  ;;  %v2686_v30 = vld [vmem:[#allocation3 + $0x140] sm:$0xff]  ;;  %v2688_v31 = vld [vmem:[#allocation3 + $0x148] sm:$0xff] }
  0x23   : > { %549 = vmatpush.msrb.mxu0 %v2643_v16  ;;  %569 = vmatpush.msrb.mxu1 %v2645_v17  ;;  %v2693_v32 = vld [vmem:[#allocation3 + $0x158] sm:$0xff]  ;;  %v2695_v33 = vld [vmem:[#allocation3 + $0x150] sm:$0xff]  ;;  %v2702_v35 = vld [vmem:[#allocation3 + $0x120] sm:$0xff] }
  0x24   : > { %609 = vmatpush.msrb.mxu3 %v2652_v19  ;;  %589 = vmatpush.msrb.mxu2 %v2657_v21  ;;  %v270_v34 = vld [vmem:[%s2595_s21 + $0x10] sm:$0xff]  ;;  %v2704_v36 = vld [vmem:[#allocation3 + $0x128] sm:$0xff]  ;;  %v2710_v37 = vld [vmem:[#allocation3 + $0x138] sm:$0xff] }
  0x25   : > { %550 = vmatpush.msrb.mxu0 %v2661_v22  ;;  %570 = vmatpush.msrb.mxu1 %v2663_v23  ;;  %v2712_v38 = vld [vmem:[#allocation3 + $0x130] sm:$0xff]  ;;  %v2716_v39 = vld [vmem:[#allocation3 + $0x100] sm:$0xff]  ;;  %v2718_v40 = vld [vmem:[#allocation3 + $0x108] sm:$0xff] }
  0x26   : > { %610 = vmatpush.msrb.mxu3 %v2669_v24  ;;  %590 = vmatpush.msrb.mxu2 %v2671_v25  ;;  %v2722_v41 = vld [vmem:[#allocation3 + $0x118] sm:$0xff]  ;;  %v2724_v42 = vld [vmem:[#allocation3 + $0x110] sm:$0xff]  ;;  %v2727_v43 = vld [vmem:[#allocation3 + $0xe0] sm:$0xff] }
  0x27   : > { %2045 = vmatmul.msk.f32.gmra.mxu0 %vm294_vm0, %v269_v20  ;;  %2053 = vmatmul.msk.f32.gmra.mxu1 %vm294_vm0, %v269_v20  ;;  %v2729_v44 = vld [vmem:[#allocation3 + $0xe8] sm:$0xff]  ;;  %v2734_v45 = vld [vmem:[#allocation3 + $0xf8] sm:$0xff]  ;;  %v2736_v46 = vld [vmem:[#allocation3 + $0xf0] sm:$0xff] }
  0x28   : > { %2061 = vmatmul.msk.f32.gmra.mxu2 %vm294_vm0, %v269_v20  ;;  %2069 = vmatmul.msk.f32.gmra.mxu3 %vm294_vm0, %v269_v20  ;;  %v271_v47 = vld [vmem:[%s2595_s21 + $0x18] sm:$0xff]  ;;  %v2743_v48 = vld [vmem:[#allocation3 + $0xc0] sm:$0xff]  ;;  %v2745_v49 = vld [vmem:[#allocation3 + $0xc8] sm:$0xff] }
  0x29   : > { %551 = vmatpush.msrb.mxu0 %v2675_v26  ;;  %571 = vmatpush.msrb.mxu1 %v2677_v27  ;;  %v2751_v50 = vld [vmem:[#allocation3 + $0xd8] sm:$0xff]  ;;  %v2753_v51 = vld [vmem:[#allocation3 + $0xd0] sm:$0xff]  ;;  %v2757_v52 = vld [vmem:[#allocation3 + $0xa0] sm:$0xff] }
  0x2a   : > { %611 = vmatpush.msrb.mxu3 %v2681_v28  ;;  %591 = vmatpush.msrb.mxu2 %v2683_v29  ;;  %3894 = vst [vmem:[#allocation9_spill] sm:$0xff] %v2751_v50  ;;  %v2759_v53 = vld [vmem:[#allocation3 + $0xa8] sm:$0xff]  ;;  %v2763_v54 = vld [vmem:[#allocation3 + $0xb8] sm:$0xff]  ;;  %v2765_v55 = vld [vmem:[#allocation3 + $0xb0] sm:$0xff] }
  0x2b   : > { %552 = vmatpush.msrb.mxu0 %v2686_v30  ;;  %572 = vmatpush.msrb.mxu1 %v2688_v31  ;;  %3895 = vst [vmem:[#allocation10_spill] sm:$0xff] %v2753_v51  ;;  %v2768_v56 = vld [vmem:[#allocation3 + $0x80] sm:$0xff]  ;;  %v2770_v57 = vld [vmem:[#allocation3 + $0x88] sm:$0xff]  ;;  %v2775_v58 = vld [vmem:[#allocation3 + $0x98] sm:$0xff] }
  0x2c   : > { %612 = vmatpush.msrb.mxu3 %v2693_v32  ;;  %592 = vmatpush.msrb.mxu2 %v2695_v33  ;;  %3896 = vst [vmem:[#allocation11_spill] sm:$0xff] %v2757_v52  ;;  %v2777_v59 = vld [vmem:[#allocation3 + $0x90] sm:$0xff]  ;;  %v272_v60 = vld [vmem:[%s2595_s21 + $0x20] sm:$0xff]  ;;  %v2786_v62 = vld [vmem:[#allocation3 + $0x68] sm:$0xff] }
  0x2d   : > { %553 = vmatpush.msrb.mxu0 %v2702_v35  ;;  %573 = vmatpush.msrb.mxu1 %v2704_v36  ;;  %3897 = vst [vmem:[#allocation12_spill] sm:$0xff] %v2759_v53  ;;  %v2784_v61 = vld [vmem:[#allocation3 + $0x60] sm:$0xff]  ;;  %v2792_v63 = vld [vmem:[#allocation3 + $0x78] sm:$0xff]  ;;  %v2794_v0 = vld [vmem:[#allocation3 + $0x70] sm:$0xff] }
  0x2e   : > { %613 = vmatpush.msrb.mxu3 %v2710_v37  ;;  %593 = vmatpush.msrb.mxu2 %v2712_v38  ;;  %3898 = vst [vmem:[#allocation13_spill] sm:$0xff] %v2763_v54  ;;  %v2798_v1 = vld [vmem:[#allocation3 + $0x40] sm:$0xff]  ;;  %v2800_v2 = vld [vmem:[#allocation3 + $0x48] sm:$0xff]  ;;  %v2804_v3 = vld [vmem:[#allocation3 + $0x58] sm:$0xff] }
  0x2f   : > { %2046 = vmatmul.msk.f32.gmra.mxu0 %vm294_vm0, %v270_v34  ;;  %2054 = vmatmul.msk.f32.gmra.mxu1 %vm294_vm0, %v270_v34  ;;  %3899 = vst [vmem:[#allocation14_spill] sm:$0xff] %v2765_v55  ;;  %v2806_v4 = vld [vmem:[#allocation3 + $0x50] sm:$0xff]  ;;  %v2809_v5 = vld [vmem:[#allocation3 + $0x20] sm:$0xff]  ;;  %v2811_v6 = vld [vmem:[#allocation3 + $0x28] sm:$0xff] }
  0x30   : > { %2062 = vmatmul.msk.f32.gmra.mxu2 %vm294_vm0, %v270_v34  ;;  %2070 = vmatmul.msk.f32.gmra.mxu3 %vm294_vm0, %v270_v34  ;;  %3900 = vst [vmem:[#allocation15_spill] sm:$0xff] %v2768_v56  ;;  %v2816_v7 = vld [vmem:[#allocation3 + $0x30] sm:$0xff]  ;;  %v2818_v8 = vld [vmem:[#allocation3 + $0x38] sm:$0xff]  ;;  %v273_v20 = vld [vmem:[%s2595_s21 + $0x28] sm:$0xff] }
  0x31   : > { %554 = vmatpush.msrb.mxu0 %v2716_v39  ;;  %574 = vmatpush.msrb.mxu1 %v2718_v40  ;;  %3901 = vst [vmem:[#allocation16_spill] sm:$0xff] %v2770_v57  ;;  %v2825_v34 = vld [vmem:[#allocation3] sm:$0xff] }
  0x32   : > { %614 = vmatpush.msrb.mxu3 %v2722_v41  ;;  %594 = vmatpush.msrb.mxu2 %v2724_v42  ;;  %3902 = vst [vmem:[#allocation17_spill] sm:$0xff] %v2775_v58 }
  0x33   : > { %555 = vmatpush.msrb.mxu0 %v2727_v43  ;;  %575 = vmatpush.msrb.mxu1 %v2729_v44  ;;  %3903 = vst [vmem:[#allocation18_spill] sm:$0xff] %v2777_v59 }
  0x34   : > { %615 = vmatpush.msrb.mxu3 %v2734_v45  ;;  %595 = vmatpush.msrb.mxu2 %v2736_v46  ;;  %3904 = vst [vmem:[#allocation19_spill] sm:$0xff] %v2784_v61 }
  0x35   : > { %556 = vmatpush.msrb.mxu0 %v2743_v48  ;;  %576 = vmatpush.msrb.mxu1 %v2745_v49  ;;  %3905 = vst [vmem:[#allocation20_spill] sm:$0xff] %v2786_v62 }
  0x36   : > { %616 = vmatpush.msrb.mxu3 %v2751_v50  ;;  %596 = vmatpush.msrb.mxu2 %v2753_v51  ;;  %3906 = vst [vmem:[#allocation21_spill] sm:$0xff] %v2792_v63 }
  0x37   : > { %2047 = vmatmul.msk.f32.gmra.mxu0 %vm294_vm0, %v271_v47  ;;  %2055 = vmatmul.msk.f32.gmra.mxu1 %vm294_vm0, %v271_v47  ;;  %3907 = vst [vmem:[#allocation22_spill] sm:$0xff] %v2794_v0 }
  0x38   : > { %2063 = vmatmul.msk.f32.gmra.mxu2 %vm294_vm0, %v271_v47  ;;  %2071 = vmatmul.msk.f32.gmra.mxu3 %vm294_vm0, %v271_v47  ;;  %3908 = vst [vmem:[#allocation23_spill] sm:$0xff] %v2798_v1  ;;  %v2827_v47 = vld [vmem:[#allocation3 + $0x8] sm:$0xff] }
  0x39   : > { %557 = vmatpush.msrb.mxu0 %v2757_v52  ;;  %577 = vmatpush.msrb.mxu1 %v2759_v53  ;;  %3909 = vst [vmem:[#allocation24_spill] sm:$0xff] %v2800_v2 }
  0x3a   : > { %617 = vmatpush.msrb.mxu3 %v2763_v54  ;;  %597 = vmatpush.msrb.mxu2 %v2765_v55  ;;  %3910 = vst [vmem:[#allocation25_spill] sm:$0xff] %v2804_v3 }
  0x3b   : > { %558 = vmatpush.msrb.mxu0 %v2768_v56  ;;  %578 = vmatpush.msrb.mxu1 %v2770_v57  ;;  %3911 = vst [vmem:[#allocation26_spill] sm:$0xff] %v2806_v4 }
  0x3c   : > { %618 = vmatpush.msrb.mxu3 %v2775_v58  ;;  %598 = vmatpush.msrb.mxu2 %v2777_v59  ;;  %3912 = vst [vmem:[#allocation27_spill] sm:$0xff] %v2809_v5 }
  0x3d   : > { %559 = vmatpush.msrb.mxu0 %v2784_v61  ;;  %579 = vmatpush.msrb.mxu1 %v2786_v62  ;;  %3913 = vst [vmem:[#allocation28_spill] sm:$0xff] %v2811_v6 }
  0x3e   : > { %619 = vmatpush.msrb.mxu3 %v2792_v63  ;;  %599 = vmatpush.msrb.mxu2 %v2794_v0  ;;  %3914 = vst [vmem:[#allocation29_spill] sm:$0xff] %v2816_v7 }
  0x3f   : > { %2048 = vmatmul.msk.f32.gmra.mxu0 %vm294_vm0, %v272_v60  ;;  %2056 = vmatmul.msk.f32.gmra.mxu1 %vm294_vm0, %v272_v60  ;;  %3915 = vst [vmem:[#allocation30_spill] sm:$0xff] %v2818_v8 }
  0x40   : > { %2064 = vmatmul.msk.f32.gmra.mxu2 %vm294_vm0, %v272_v60  ;;  %2072 = vmatmul.msk.f32.gmra.mxu3 %vm294_vm0, %v272_v60  ;;  %3916 = vst [vmem:[#allocation31_spill] sm:$0xff] %v2825_v34  ;;  %v2833_v60 = vld [vmem:[#allocation3 + $0x10] sm:$0xff] }
  0x41   : > { %560 = vmatpush.msrb.mxu0 %v2798_v1  ;;  %580 = vmatpush.msrb.mxu1 %v2800_v2  ;;  %3917 = vst [vmem:[#allocation32_spill] sm:$0xff] %v2827_v47 }
  0x42   : > { %620 = vmatpush.msrb.mxu3 %v2804_v3  ;;  %600 = vmatpush.msrb.mxu2 %v2806_v4  ;;  %3918 = vst [vmem:[#allocation33_spill] sm:$0xff] %v2833_v60  ;;  %v2835_v3 = vld [vmem:[#allocation3 + $0x18] sm:$0xff] }
  0x43   : > { %561 = vmatpush.msrb.mxu0 %v2809_v5  ;;  %581 = vmatpush.msrb.mxu1 %v2811_v6  ;;  %3919 = vst [vmem:[#allocation34_spill] sm:$0xff] %v2835_v3 }
  0x44   : > { %601 = vmatpush.msrb.mxu2 %v2816_v7  ;;  %621 = vmatpush.msrb.mxu3 %v2818_v8  ;;  %v274_v8 = vld [vmem:[%s2595_s21 + $0x30] sm:$0xff] }
  0x45   : > { %562 = vmatpush.msrb.mxu0 %v2825_v34  ;;  %582 = vmatpush.msrb.mxu1 %v2827_v47 }
  0x46   : > { %602 = vmatpush.msrb.mxu2 %v2833_v60  ;;  %622 = vmatpush.msrb.mxu3 %v2835_v3 }
  0x47   : > { %2049 = vmatmul.msk.f32.gmra.mxu0 %vm294_vm0, %v273_v20  ;;  %2057 = vmatmul.msk.f32.gmra.mxu1 %vm294_vm0, %v273_v20 }
  0x48   : > { %2065 = vmatmul.msk.f32.gmra.mxu2 %vm294_vm0, %v273_v20  ;;  %2073 = vmatmul.msk.f32.gmra.mxu3 %vm294_vm0, %v273_v20  ;;  %v275_v20 = vld [vmem:[%s2595_s21 + $0x38] sm:$0xff]  ;;  %s2436_s21 = sshra.s32 %s1964_s20, 4  ;;  %s2437_s21 = int_to_ptr.hbm [resolvable:$true] %s2436_s21 }
  0x49   : > { %694 = vmatpush.msra.mxu0 %v2622_v9  ;;  %714 = vmatpush.msra.mxu1 %v2624_v10  ;;  %s2438_s27 = scalar_lea.hbm %s2437_s21, 8  ;;  %p2443_p3 = scmp.lt.s32.totalorder %s2437_s21, %s3803_s6 }
  0x4a   : > { %734 = vmatpush.msra.mxu2 %v2640_v15  ;;  %754 = vmatpush.msra.mxu3 %v2628_v11  ;;  %p2439_p0 = scmp.ne.s32.totalorder %s2437_s21, %s2438_s27  ;;  %p2444_p4 = scmp.lt.s32.totalorder %s2442_s10, %s2438_s27 }
  0x4b   : > { %695 = vmatpush.msra.mxu0 %v2632_v12  ;;  %715 = vmatpush.msra.mxu1 %v2634_v13 }
  0x4c   : > { %735 = vmatpush.msra.mxu2 %v2648_v18  ;;  %755 = vmatpush.msra.mxu3 %v2638_v14  ;;  %p2440_p1 = pnand %p2439_p0, %p2570_p5  ;;  %p2445_p7 = por %p2444_p4, %p2443_p3 }
  0x4d   : > { %696 = vmatpush.msra.mxu0 %v2643_v16  ;;  %716 = vmatpush.msra.mxu1 %v2645_v17 }
  0x4e   : > { %736 = vmatpush.msra.mxu2 %v2657_v21  ;;  %756 = vmatpush.msra.mxu3 %v2652_v19  ;;  %p2441_p2 = pneg %p2440_p1 }
  0x4f   : > { %2050 = vmatmul.msk.f32.gmra.mxu0 %vm294_vm0, %v274_v8  ;;  %2058 = vmatmul.msk.f32.gmra.mxu1 %vm294_vm0, %v274_v8 }
  0x50   : > { %2066 = vmatmul.msk.f32.gmra.mxu2 %vm294_vm0, %v274_v8  ;;  %2074 = vmatmul.msk.f32.gmra.mxu3 %vm294_vm0, %v274_v8  ;;  %v2493_v8 = vmov 0.0   ;;  %p2446_p8 = pnand %p2445_p7, %p2441_p2 }
  0x51   : > { %697 = vmatpush.msra.mxu0 %v2661_v22  ;;  %717 = vmatpush.msra.mxu1 %v2663_v23 }
  0x52   : > { %737 = vmatpush.msra.mxu2 %v2671_v25  ;;  %757 = vmatpush.msra.mxu3 %v2669_v24 }
  0x53   : > { %698 = vmatpush.msra.mxu0 %v2675_v26  ;;  %718 = vmatpush.msra.mxu1 %v2677_v27 }
  0x54   : > { %738 = vmatpush.msra.mxu2 %v2683_v29  ;;  %758 = vmatpush.msra.mxu3 %v2681_v28 }
  0x55   : > { %699 = vmatpush.msra.mxu0 %v2686_v30  ;;  %719 = vmatpush.msra.mxu1 %v2688_v31 }
  0x56   : > { %739 = vmatpush.msra.mxu2 %v2695_v33  ;;  %759 = vmatpush.msra.mxu3 %v2693_v32 }
  0x57   : > { %2051 = vmatmul.msk.f32.gmra.mxu0 %vm294_vm0, %v275_v20  ;;  %2059 = vmatmul.msk.f32.gmra.mxu1 %vm294_vm0, %v275_v20 }
  0x58   : > { %2067 = vmatmul.msk.f32.gmra.mxu2 %vm294_vm0, %v275_v20  ;;  %2075 = vmatmul.msk.f32.gmra.mxu3 %vm294_vm0, %v275_v20  ;;  %v3920_v20 = vld [vmem:[#allocation25_spill] sm:$0xff] }
  0x59   : > { %700 = vmatpush.msra.mxu0 %v2702_v35  ;;  %720 = vmatpush.msra.mxu1 %v2704_v36 }
  0x5a   : > { %740 = vmatpush.msra.mxu2 %v2712_v38  ;;  %760 = vmatpush.msra.mxu3 %v2710_v37 }
  0x5b   : > { %701 = vmatpush.msra.mxu0 %v2716_v39  ;;  %721 = vmatpush.msra.mxu1 %v2718_v40 }
  0x5c   : > { %741 = vmatpush.msra.mxu2 %v2724_v42  ;;  %761 = vmatpush.msra.mxu3 %v2722_v41 }
  0x5d   : > { %702 = vmatpush.msra.mxu0 %v2727_v43  ;;  %722 = vmatpush.msra.mxu1 %v2729_v44 }
  0x5e   : > { %742 = vmatpush.msra.mxu2 %v2736_v46  ;;  %762 = vmatpush.msra.mxu3 %v2734_v45 }
  0x5f   : > { %563 = vmatmul.f32.vlgmr.msrb.gmra.mxu0 %v2493_v8  ;;  %583 = vmatmul.f32.vlgmr.msrb.gmra.mxu1 %v2493_v8 }
  0x60   : > { %603 = vmatmul.f32.vlgmr.msrb.gmra.mxu2 %v2493_v8  ;;  %623 = vmatmul.f32.vlgmr.msrb.gmra.mxu3 %v2493_v8  ;;  %v3921_v8 = vld [vmem:[#allocation30_spill] sm:$0xff] }
  0x61   : > { %703 = vmatpush.msra.mxu0 %v2743_v48  ;;  %723 = vmatpush.msra.mxu1 %v2745_v49 }
  0x62   : > { %743 = vmatpush.msra.mxu2 %v2753_v51  ;;  %763 = vmatpush.msra.mxu3 %v2751_v50 }
  0x63   : > { %704 = vmatpush.msra.mxu0 %v2757_v52  ;;  %724 = vmatpush.msra.mxu1 %v2759_v53 }
  0x64   : > { %744 = vmatpush.msra.mxu2 %v2765_v55  ;;  %764 = vmatpush.msra.mxu3 %v2763_v54 }
  0x65   : > { %705 = vmatpush.msra.mxu0 %v2768_v56  ;;  %725 = vmatpush.msra.mxu1 %v2770_v57 }
  0x66   : > { %745 = vmatpush.msra.mxu2 %v2777_v59  ;;  %765 = vmatpush.msra.mxu3 %v2775_v58 }
  0x67   : > { %706 = vmatpush.msra.mxu0 %v2784_v61  ;;  %726 = vmatpush.msra.mxu1 %v2786_v62 }
  0x68   : > { %746 = vmatpush.msra.mxu2 %v2794_v0  ;;  %766 = vmatpush.msra.mxu3 %v2792_v63 }
  0x69   : > { %707 = vmatpush.msra.mxu0 %v2798_v1  ;;  %727 = vmatpush.msra.mxu1 %v2800_v2 }
  0x6a   : > { %747 = vmatpush.msra.mxu2 %v2806_v4  ;;  %767 = vmatpush.msra.mxu3 %v3920_v20 }
  0x6b   : > { %708 = vmatpush.msra.mxu0 %v2809_v5  ;;  %728 = vmatpush.msra.mxu1 %v2811_v6 }
  0x6c   : > { %748 = vmatpush.msra.mxu2 %v2816_v7  ;;  %768 = vmatpush.msra.mxu3 %v3921_v8 }
  0x6d   : > { %709 = vmatpush.msra.mxu0 %v2825_v34  ;;  %729 = vmatpush.msra.mxu1 %v2827_v47 }
  0x6e   : > { %749 = vmatpush.msra.mxu2 %v2833_v60  ;;  %769 = vmatpush.msra.mxu3 %v2835_v3 }
  0x6f   : > { %841 = vmatpush.msrb.mxu0 %v2622_v9  ;;  %861 = vmatpush.msrb.mxu1 %v2624_v10 }
  0x70   : > { %881 = vmatpush.msrb.mxu2 %v2640_v15  ;;  %901 = vmatpush.msrb.mxu3 %v2628_v11 }
  0x71   : > { %842 = vmatpush.msrb.mxu0 %v2632_v12  ;;  %862 = vmatpush.msrb.mxu1 %v2634_v13 }
  0x72   : > { %882 = vmatpush.msrb.mxu2 %v2648_v18  ;;  %902 = vmatpush.msrb.mxu3 %v2638_v14 }
  0x73   : > { %843 = vmatpush.msrb.mxu0 %v2643_v16  ;;  %863 = vmatpush.msrb.mxu1 %v2645_v17 }
  0x74   : > { %883 = vmatpush.msrb.mxu2 %v2657_v21  ;;  %903 = vmatpush.msrb.mxu3 %v2652_v19 }
  0x75   : > { %844 = vmatpush.msrb.mxu0 %v2661_v22  ;;  %864 = vmatpush.msrb.mxu1 %v2663_v23 }
  0x76   : > { %884 = vmatpush.msrb.mxu2 %v2671_v25  ;;  %904 = vmatpush.msrb.mxu3 %v2669_v24 }
  0x77   : > { %845 = vmatpush.msrb.mxu0 %v2675_v26  ;;  %865 = vmatpush.msrb.mxu1 %v2677_v27 }
  0x78   : > { %885 = vmatpush.msrb.mxu2 %v2683_v29  ;;  %905 = vmatpush.msrb.mxu3 %v2681_v28 }
  0x79   : > { %846 = vmatpush.msrb.mxu0 %v2686_v30  ;;  %866 = vmatpush.msrb.mxu1 %v2688_v31 }
  0x7a   : > { %886 = vmatpush.msrb.mxu2 %v2695_v33  ;;  %906 = vmatpush.msrb.mxu3 %v2693_v32 }
  0x7b   : > { %847 = vmatpush.msrb.mxu0 %v2702_v35  ;;  %867 = vmatpush.msrb.mxu1 %v2704_v36 }
  0x7c   : > { %887 = vmatpush.msrb.mxu2 %v2712_v38  ;;  %907 = vmatpush.msrb.mxu3 %v2710_v37 }
  0x7d   : > { %848 = vmatpush.msrb.mxu0 %v2716_v39  ;;  %868 = vmatpush.msrb.mxu1 %v2718_v40 }
  0x7e   : > { %888 = vmatpush.msrb.mxu2 %v2724_v42  ;;  %908 = vmatpush.msrb.mxu3 %v2722_v41 }
  0x7f   : > { %849 = vmatpush.msrb.mxu0 %v2727_v43  ;;  %869 = vmatpush.msrb.mxu1 %v2729_v44 }
  0x80   : > { %889 = vmatpush.msrb.mxu2 %v2736_v46  ;;  %909 = vmatpush.msrb.mxu3 %v2734_v45 }
  0x81   : > { %850 = vmatpush.msrb.mxu0 %v2743_v48  ;;  %870 = vmatpush.msrb.mxu1 %v2745_v49 }
  0x82   : > { %890 = vmatpush.msrb.mxu2 %v2753_v51  ;;  %910 = vmatpush.msrb.mxu3 %v2751_v50 }
  0x83   : > { %851 = vmatpush.msrb.mxu0 %v2757_v52  ;;  %871 = vmatpush.msrb.mxu1 %v2759_v53 }
  0x84   : > { %891 = vmatpush.msrb.mxu2 %v2765_v55  ;;  %911 = vmatpush.msrb.mxu3 %v2763_v54 }
  0x85   : > { %852 = vmatpush.msrb.mxu0 %v2768_v56  ;;  %872 = vmatpush.msrb.mxu1 %v2770_v57 }
  0x86   : > { %892 = vmatpush.msrb.mxu2 %v2777_v59  ;;  %912 = vmatpush.msrb.mxu3 %v2775_v58 }
  0x87   : > { %853 = vmatpush.msrb.mxu0 %v2784_v61  ;;  %873 = vmatpush.msrb.mxu1 %v2786_v62 }
  0x88   : > { %893 = vmatpush.msrb.mxu2 %v2794_v0  ;;  %913 = vmatpush.msrb.mxu3 %v2792_v63 }
  0x89   : > { %854 = vmatpush.msrb.mxu0 %v2798_v1  ;;  %874 = vmatpush.msrb.mxu1 %v2800_v2 }
  0x8a   : > { %894 = vmatpush.msrb.mxu2 %v2806_v4  ;;  %914 = vmatpush.msrb.mxu3 %v3920_v20 }
  0x8b   : > { %855 = vmatpush.msrb.mxu0 %v2809_v5  ;;  %875 = vmatpush.msrb.mxu1 %v2811_v6  ;;  %v284_v5 = vld [vmem:[%s3800_s3] sm:$0xf] }
  0x8c   : > { %895 = vmatpush.msrb.mxu2 %v2816_v7  ;;  %915 = vmatpush.msrb.mxu3 %v3921_v8  ;;  %v286_v20 = vperm.slane %v284_v5, 0  ;;  %v287_v6 = vperm.slane %v284_v5, 1 }
  0x8d   : > { %856 = vmatpush.msrb.mxu0 %v2825_v34  ;;  %876 = vmatpush.msrb.mxu1 %v2827_v47 }
  0x8e   : > { %896 = vmatpush.msrb.mxu2 %v2833_v60  ;;  %916 = vmatpush.msrb.mxu3 %v2835_v3  ;;  %v2992_v60 = vperm.slane %v284_v5, 2  ;;  %v289_v3 = vperm.slane %v284_v5, 3 }
  0x9c   : > { %v336_v2 = vpop.f32.mrf.mxu0  ;;  %v377_v4 = vpop.f32.mrf.mxu1 }
  0xa3   : > { %v2984_v1 = vpop.f32.mrf.mxu2  ;;  %v2986_v7 = vpop.f32.mrf.mxu3 }
  0xa4   : > { %v339_v8 = vpop.f32.mrf.mxu0  ;;  %v380_v34 = vpop.f32.mrf.mxu1 }
  0xa5   : > { %v2988_v63 = vadd.f32 %v339_v8, %v286_v20  ;;  %v2990_v47 = vadd.f32 %v380_v34, %v287_v6 }
  0xa7   : > { %3922 = vst [vmem:[#allocation35_spill] sm:$0xff] %v2988_v63 }
  0xa8   : > { %3923 = vst [vmem:[#allocation36_spill] sm:$0xff] %v2990_v47 }
  0xab   : > { %v421_v0 = vpop.f32.mrf.mxu2  ;;  %v462_v62 = vpop.f32.mrf.mxu3 }
  0xac   : > { %v2995_v61 = vadd.f32 %v421_v0, %v2992_v60  ;;  %v2997_v58 = vadd.f32 %v462_v62, %v289_v3  ;;  %v342_v59 = vpop.f32.mrf.mxu0  ;;  %v383_v57 = vpop.f32.mrf.mxu1 }
  0xad   : > { %v2999_v56 = vadd.f32 %v342_v59, %v286_v20  ;;  %v3001_v54 = vadd.f32 %v383_v57, %v287_v6 }
  0xae   : > { %3924 = vst [vmem:[#allocation37_spill] sm:$0xff] %v2995_v61 }
  0xaf   : > { %3925 = vst [vmem:[#allocation38_spill] sm:$0xff] %v2997_v58 }
  0xb0   : > { %3926 = vst [vmem:[#allocation39_spill] sm:$0xff] %v2999_v56 }
  0xb1   : > { %3927 = vst [vmem:[#allocation40_spill] sm:$0xff] %v3001_v54 }
  0xb3   : > { %v424_v8 = vpop.f32.mrf.mxu2  ;;  %v465_v63 = vpop.f32.mrf.mxu3 }
  0xb4   : > { %v3004_v34 = vadd.f32 %v424_v8, %v2992_v60  ;;  %v3006_v47 = vadd.f32 %v465_v63, %v289_v3  ;;  %v345_v5 = vpop.f32.mrf.mxu0  ;;  %v386_v55 = vpop.f32.mrf.mxu1 }
  0xb5   : > { %v3008_v53 = vadd.f32 %v345_v5, %v286_v20  ;;  %v3010_v0 = vadd.f32 %v386_v55, %v287_v6 }
  0xb6   : > { %3928 = vst [vmem:[#allocation41_spill] sm:$0xff] %v3004_v34 }
  0xb7   : > { %3929 = vst [vmem:[#allocation42_spill] sm:$0xff] %v3006_v47 }
  0xb8   : > { %3930 = vst [vmem:[#allocation43_spill] sm:$0xff] %v3008_v53 }
  0xb9   : > { %3931 = vst [vmem:[#allocation44_spill] sm:$0xff] %v3010_v0 }
  0xbb   : > { %v427_v62 = vpop.f32.mrf.mxu2  ;;  %v468_v61 = vpop.f32.mrf.mxu3 }
  0xbc   : > { %v3013_v59 = vadd.f32 %v427_v62, %v2992_v60  ;;  %v3015_v57 = vadd.f32 %v468_v61, %v289_v3  ;;  %v348_v54 = vpop.f32.mrf.mxu0  ;;  %v389_v56 = vpop.f32.mrf.mxu1 }
  0xbd   : > { %v3017_v58 = vadd.f32 %v348_v54, %v286_v20  ;;  %v3019_v8 = vadd.f32 %v389_v56, %v287_v6 }
  0xbe   : > { %3932 = vst [vmem:[#allocation45_spill] sm:$0xff] %v3013_v59 }
  0xbf   : > { %3933 = vst [vmem:[#allocation46_spill] sm:$0xff] %v3015_v57 }
  0xc0   : > { %3934 = vst [vmem:[#allocation47_spill] sm:$0xff] %v3017_v58 }
  0xc1   : > { %3935 = vst [vmem:[#allocation48_spill] sm:$0xff] %v3019_v8 }
  0xc3   : > { %v430_v63 = vpop.f32.mrf.mxu2  ;;  %v471_v34 = vpop.f32.mrf.mxu3 }
  0xc4   : > { %v3022_v5 = vadd.f32 %v430_v63, %v2992_v60  ;;  %v3024_v55 = vadd.f32 %v471_v34, %v289_v3  ;;  %v351_v0 = vpop.f32.mrf.mxu0  ;;  %v392_v53 = vpop.f32.mrf.mxu1 }
  0xc5   : > { %v3026_v47 = vadd.f32 %v351_v0, %v286_v20  ;;  %v3028_v62 = vadd.f32 %v392_v53, %v287_v6 }
  0xc6   : > { %3936 = vst [vmem:[#allocation49_spill] sm:$0xff] %v3022_v5 }
  0xc7   : > { %3937 = vst [vmem:[#allocation50_spill] sm:$0xff] %v3024_v55 }
  0xc8   : > { %3938 = vst [vmem:[#allocation51_spill] sm:$0xff] %v3026_v47 }
  0xc9   : > { %3939 = vst [vmem:[#allocation52_spill] sm:$0xff] %v3028_v62 }
  0xcb   : > { %v433_v61 = vpop.f32.mrf.mxu2  ;;  %v474_v59 = vpop.f32.mrf.mxu3 }
  0xcc   : > { %v3031_v54 = vadd.f32 %v433_v61, %v2992_v60  ;;  %v3033_v56 = vadd.f32 %v474_v59, %v289_v3  ;;  %v354_v8 = vpop.f32.mrf.mxu0  ;;  %v395_v58 = vpop.f32.mrf.mxu1  ;;  %v337_v59 = vadd.f32 %v336_v2, %v286_v20 }
  0xcd   : > { %v3035_v57 = vadd.f32 %v354_v8, %v286_v20  ;;  %v3037_v63 = vadd.f32 %v395_v58, %v287_v6 }
  0xce   : > { %3940 = vst [vmem:[#allocation53_spill] sm:$0xff] %v3031_v54  ;;  %v378_v54 = vadd.f32 %v377_v4, %v287_v6 }
  0xcf   : > { %3941 = vst [vmem:[#allocation54_spill] sm:$0xff] %v3033_v56 }
  0xd0   : > { %3942 = vst [vmem:[#allocation55_spill] sm:$0xff] %v3035_v57 }
  0xd1   : > { %3943 = vst [vmem:[#allocation56_spill] sm:$0xff] %v3037_v63 }
  0xd3   : > { %v436_v34 = vpop.f32.mrf.mxu2  ;;  %v477_v5 = vpop.f32.mrf.mxu3 }
  0xd4   : > { %v3040_v0 = vadd.f32 %v436_v34, %v2992_v60  ;;  %v3042_v53 = vadd.f32 %v477_v5, %v289_v3  ;;  %v357_v62 = vpop.f32.mrf.mxu0  ;;  %v398_v47 = vpop.f32.mrf.mxu1 }
  0xd5   : > { %v3044_v55 = vadd.f32 %v357_v62, %v286_v20  ;;  %v3046_v61 = vadd.f32 %v398_v47, %v287_v6  ;;  %v460_v62 = vadd.f32 %v2986_v7, %v289_v3 }
  0xd6   : > { %3944 = vst [vmem:[#allocation57_spill] sm:$0xff] %v3040_v0 }
  0xd7   : > { %3945 = vst [vmem:[#allocation58_spill] sm:$0xff] %v3042_v53 }
  0xd8   : > { %3946 = vst [vmem:[#allocation59_spill] sm:$0xff] %v3044_v55 }
  0xd9   : > { %3947 = vst [vmem:[#allocation60_spill] sm:$0xff] %v3046_v61 }
  0xdb   : > { %v439_v56 = vpop.f32.mrf.mxu2  ;;  %v480_v8 = vpop.f32.mrf.mxu3 }
  0xdc   : > { %v3049_v58 = vadd.f32 %v439_v56, %v2992_v60  ;;  %v3051_v63 = vadd.f32 %v480_v8, %v289_v3  ;;  %v564_v57 = vpop.f32.mrf.mxu0  ;;  %v584_v34 = vpop.f32.mrf.mxu1 }
  0xdd   : > { %v627_v0 = vadd.f32 %v564_v57, %v337_v59  ;;  %v628_v5 = vadd.f32 %v584_v34, %v378_v54  ;;  %v419_v57 = vadd.f32 %v2984_v1, %v2992_v60 }
  0xde   : > { %3948 = vst [vmem:[#allocation61_spill] sm:$0xff] %v3049_v58 }
  0xdf   : > { %3949 = vst [vmem:[#allocation62_spill] sm:$0xff] %v3051_v63  ;;  %v2076_v53 = vmul.f32 -1.442695, %v627_v0  ;;  %v2077_v52 = vmul.f32 -1.442695, %v628_v5 }
  0xe1   : > { %2167 = vpow2.f32 %v2076_v53 }
  0xe2   : > { %2169 = vpow2.f32 %v2077_v52 }
  0xe3   : > { %v624_v47 = vpop.f32.mrf.mxu3  ;;  %v604_v8 = vpop.f32.mrf.mxu2 }
  0xe4   : > { %v630_v2 = vadd.f32 %v624_v47, %v460_v62  ;;  %v629_v53 = vadd.f32 %v604_v8, %v419_v57 }
  0xe6   : > { %v2078_v4 = vmul.f32 -1.442695, %v630_v2 }
  0xe7   : > { %v2168_v6 = vpop.eup %2167 }
  0xe8   : > { %v2170_v20 = vpop.eup %2169  ;;  %v634_v61 = vadd.f32 1.0, %v2168_v6  ;;  %2171 = vpow2.f32 %v2078_v4 }
  0xe9   : > { %v653_v56 = vadd.f32 1.0, %v2170_v20 }
  0xea   : > { %2173 = vrcp.f32 %v634_v61  ;;  %v646_v5 = vand.u32 2147483648, %v634_v61  ;;  %v644_v2 = vand.u32 2147483647, %v634_v61  ;;  %vm640_vm3 = vweird.f32 %v634_v61 }
  0xeb   : > { %2175 = vrcp.f32 %v653_v56  ;;  %v665_v62 = vand.u32 2147483648, %v653_v56  ;;  %v663_v6 = vand.u32 2147483647, %v653_v56  ;;  %vm659_vm4 = vweird.f32 %v653_v56 }
  0xec   : > { %v647_v60 = vor.u32 1.1754944e-38, %v646_v5  ;;  %vm645_vm6 = vcmp.eq.f32.partialorder %v644_v2, 8.507059e+37 }
  0xed   : > { %v666_v57 = vor.u32 1.1754944e-38, %v665_v62  ;;  %vm664_vm8 = vcmp.eq.f32.partialorder %v663_v6, 8.507059e+37 }
  0xee   : > { %v2172_v58 = vpop.eup %2171 }
  0xef   : > { %v673_v54 = vadd.f32 1.0, %v2172_v58 }
  0xf0   : > { %v2174_v0 = vpop.eup %2173 }
  0xf1   : > { %v2176_v3 = vpop.eup %2175  ;;  %v636_v52 = vmul.f32 %v2174_v0, %v634_v61  ;;  %2177 = vrcp.f32 %v673_v54  ;;  %vm641_vm1 = vweird.f32 %v2174_v0  ;;  %vm679_vm10 = vweird.f32 %v673_v54 }
  0xf2   : > { %v655_v7 = vmul.f32 %v2176_v3, %v653_v56  ;;  %2179 = vtanh.f32 %v629_v53  ;;  %vm660_vm2 = vweird.f32 %v2176_v3  ;;  %vm642_vm5 = vmor %vm640_vm3, %vm641_vm1  ;;  %v685_v56 = vand.u32 2147483648, %v673_v54 }
  0xf3   : > { %v637_v59 = vsub.f32 1.0, %v636_v52  ;;  %vm661_vm7 = vmor %vm659_vm4, %vm660_vm2 }
  0xf4   : > { %v656_v34 = vsub.f32 1.0, %v655_v7  ;;  %v686_v62 = vor.u32 1.1754944e-38, %v685_v56 }
  0xf5   : > { %v638_v47 = vmul.f32 %v2174_v0, %v637_v59 }
  0xf6   : > { %v657_v4 = vmul.f32 %v2176_v3, %v656_v34 }
  0xf7   : > { %v2178_v20 = vpop.eup %2177  ;;  %v639_v1 = vadd.f32 %v2174_v0, %v638_v47 }
  0xf8   : > { %v658_v58 = vadd.f32 %v2176_v3, %v657_v4  ;;  %v675_v8 = vmul.f32 %v2178_v20, %v673_v54  ;;  %v2180_v53 = vpop.eup %2179  ;;  %vm680_vm9 = vweird.f32 %v2178_v20 }
  0xf9   : > { %v643_v52 = vsel %vm642_vm5, %v2174_v0, %v639_v1  ;;  %v683_v0 = vand.u32 2147483647, %v673_v54  ;;  %vm681_vm11 = vmor %vm679_vm10, %vm680_vm9 }
  0xfa   : > { %v648_v7 = vsel %vm645_vm6, %v647_v60, %v643_v52  ;;  %v662_v59 = vsel %vm661_vm7, %v2176_v3, %v658_v58  ;;  %v676_v63 = vsub.f32 1.0, %v675_v8  ;;  %v3062_v3 = vld [vmem:[%s3801_s4] ss:$0 sm:$0xff]  ;;  %v3979_v8 = vld [vmem:[#allocation37_spill] sm:$0xff] }
  0xfb   : > { %v667_v34 = vsel %vm664_vm8, %v666_v57, %v662_v59  ;;  %v690_v55 = vmul.f32 %v2180_v53, %v648_v7  ;;  %vm684_vm12 = vcmp.eq.f32.partialorder %v683_v0, 8.507059e+37 }
  0xfc   : > { %v689_v50 = vmul.f32 0.0, %v667_v34  ;;  %v677_v51 = vmul.f32 %v2178_v20, %v676_v63 }
  0xfe   : > { %v3056_v47 = vadd.f32 %v690_v55, %v689_v50  ;;  %v678_v61 = vadd.f32 %v2178_v20, %v677_v51 }
 0x100   : > { %2181 = vtanh.f32 %v3056_v47  ;;  %v682_v5 = vsel %vm681_vm11, %v2178_v20, %v678_v61 }
 0x101   : > { %v687_v63 = vsel %vm684_vm12, %v686_v62, %v682_v5 }
 0x106   : > { %v2182_v2 = vpop.eup %2181 }
 0x107   : > { %v693_v50 = vmul.f32 %v2182_v2, %v687_v63 }
 0x109   : > { %710 = vmatmul.f32.vlgmr.msra.gmra.mxu0 %v693_v50  ;;  %730 = vmatmul.f32.vlgmr.msra.gmra.mxu1 %v693_v50  ;;  %v1727_v51 = vmul.f32 %v3062_v3, %v693_v50 }
 0x10a   : > { %750 = vmatmul.f32.vlgmr.msra.gmra.mxu2 %v693_v50  ;;  %770 = vmatmul.f32.vlgmr.msra.gmra.mxu3 %v693_v50 }
 0x10b   : > { %1735 = vadd.xlane.f32.xlu0 %v1727_v51  ;;  %988 = vmatpush.msra.mxu0 %v2622_v9  ;;  %v3950_v9 = vld [vmem:[#allocation10_spill] sm:$0xff] }
 0x10c   : > { %1008 = vmatpush.msra.mxu1 %v2624_v10  ;;  %1028 = vmatpush.msra.mxu2 %v2640_v15  ;;  %v3951_v10 = vld [vmem:[#allocation9_spill] sm:$0xff]  ;;  %v3956_v15 = vld [vmem:[#allocation15_spill] sm:$0xff] }
 0x10d   : > { %1048 = vmatpush.msra.mxu3 %v2628_v11  ;;  %989 = vmatpush.msra.mxu0 %v2632_v12  ;;  %v3952_v11 = vld [vmem:[#allocation11_spill] sm:$0xff]  ;;  %v3953_v12 = vld [vmem:[#allocation12_spill] sm:$0xff] }
 0x10e   : > { %1009 = vmatpush.msra.mxu1 %v2634_v13  ;;  %1029 = vmatpush.msra.mxu2 %v2648_v18  ;;  %v3954_v13 = vld [vmem:[#allocation14_spill] sm:$0xff]  ;;  %v3959_v18 = vld [vmem:[#allocation17_spill] sm:$0xff] }
 0x10f   : > { %1049 = vmatpush.msra.mxu3 %v2638_v14  ;;  %990 = vmatpush.msra.mxu0 %v2643_v16  ;;  %v3955_v14 = vld [vmem:[#allocation13_spill] sm:$0xff]  ;;  %v3957_v16 = vld [vmem:[#allocation16_spill] sm:$0xff] }
 0x110   : > { %1010 = vmatpush.msra.mxu1 %v2645_v17  ;;  %1030 = vmatpush.msra.mxu2 %v2657_v21  ;;  %v3958_v17 = vld [vmem:[#allocation18_spill] sm:$0xff]  ;;  %v3961_v21 = vld [vmem:[#allocation20_spill] sm:$0xff] }
 0x111   : > { %1050 = vmatpush.msra.mxu3 %v2652_v19  ;;  %991 = vmatpush.msra.mxu0 %v2661_v22  ;;  %v3960_v19 = vld [vmem:[#allocation19_spill] sm:$0xff]  ;;  %v3962_v22 = vld [vmem:[#allocation22_spill] sm:$0xff] }
 0x112   : > { %1011 = vmatpush.msra.mxu1 %v2663_v23  ;;  %1031 = vmatpush.msra.mxu2 %v2671_v25  ;;  %v3963_v23 = vld [vmem:[#allocation21_spill] sm:$0xff]  ;;  %v3965_v25 = vld [vmem:[#allocation24_spill] sm:$0xff] }
 0x113   : > { %1051 = vmatpush.msra.mxu3 %v2669_v24  ;;  %992 = vmatpush.msra.mxu0 %v2675_v26  ;;  %v3964_v24 = vld [vmem:[#allocation23_spill] sm:$0xff]  ;;  %v3966_v26 = vld [vmem:[#allocation26_spill] sm:$0xff] }
 0x114   : > { %1012 = vmatpush.msra.mxu1 %v2677_v27  ;;  %1032 = vmatpush.msra.mxu2 %v2683_v29  ;;  %v3967_v27 = vld [vmem:[#allocation25_spill] sm:$0xff]  ;;  %v3969_v29 = vld [vmem:[#allocation28_spill] sm:$0xff] }
 0x115   : > { %1052 = vmatpush.msra.mxu3 %v2681_v28  ;;  %993 = vmatpush.msra.mxu0 %v2686_v30  ;;  %v3968_v28 = vld [vmem:[#allocation27_spill] sm:$0xff]  ;;  %v3970_v30 = vld [vmem:[#allocation29_spill] sm:$0xff] }
 0x116   : > { %1013 = vmatpush.msra.mxu1 %v2688_v31  ;;  %1033 = vmatpush.msra.mxu2 %v2695_v33  ;;  %v3971_v31 = vld [vmem:[#allocation30_spill] sm:$0xff]  ;;  %v3973_v33 = vld [vmem:[#allocation32_spill] sm:$0xff] }
 0x117   : > { %1053 = vmatpush.msra.mxu3 %v2693_v32  ;;  %994 = vmatpush.msra.mxu0 %v2702_v35  ;;  %v3972_v32 = vld [vmem:[#allocation31_spill] sm:$0xff]  ;;  %v3974_v35 = vld [vmem:[#allocation33_spill] sm:$0xff] }
 0x118   : > { %1014 = vmatpush.msra.mxu1 %v2704_v36  ;;  %1034 = vmatpush.msra.mxu2 %v2712_v38  ;;  %v3975_v36 = vld [vmem:[#allocation34_spill] sm:$0xff] }
 0x119   : > { %1054 = vmatpush.msra.mxu3 %v2710_v37  ;;  %995 = vmatpush.msra.mxu0 %v2716_v39  ;;  %v3976_v39 = vld [vmem:[#allocation35_spill] sm:$0xff] }
 0x11a   : > { %1015 = vmatpush.msra.mxu1 %v2718_v40  ;;  %1035 = vmatpush.msra.mxu2 %v2724_v42 }
 0x11b   : > { %1055 = vmatpush.msra.mxu3 %v2722_v41  ;;  %996 = vmatpush.msra.mxu0 %v2727_v43  ;;  %v3977_v41 = vld [vmem:[#allocation36_spill] sm:$0xff] }
 0x11c   : > { %1016 = vmatpush.msra.mxu1 %v2729_v44  ;;  %1036 = vmatpush.msra.mxu2 %v2736_v46  ;;  %v3978_v46 = vld [vmem:[#allocation38_spill] sm:$0xff] }
 0x11d   : > { %1056 = vmatpush.msra.mxu3 %v2734_v45  ;;  %997 = vmatpush.msra.mxu0 %v2743_v48 }
 0x11e   : > { %1017 = vmatpush.msra.mxu1 %v2745_v49  ;;  %1037 = vmatpush.msra.mxu2 %v3950_v9 }
 0x11f   : > { %1057 = vmatpush.msra.mxu3 %v3951_v10  ;;  %998 = vmatpush.msra.mxu0 %v3952_v11 }
 0x120   : > { %1018 = vmatpush.msra.mxu1 %v3953_v12  ;;  %1038 = vmatpush.msra.mxu2 %v3954_v13 }
 0x121   : > { %1058 = vmatpush.msra.mxu3 %v3955_v14  ;;  %999 = vmatpush.msra.mxu0 %v3956_v15 }
 0x122   : > { %1019 = vmatpush.msra.mxu1 %v3957_v16  ;;  %1039 = vmatpush.msra.mxu2 %v3958_v17 }
 0x123   : > { %1059 = vmatpush.msra.mxu3 %v3959_v18  ;;  %1000 = vmatpush.msra.mxu0 %v3960_v19 }
 0x124   : > { %1020 = vmatpush.msra.mxu1 %v3961_v21  ;;  %1040 = vmatpush.msra.mxu2 %v3962_v22 }
 0x125   : > { %1060 = vmatpush.msra.mxu3 %v3963_v23  ;;  %1001 = vmatpush.msra.mxu0 %v3964_v24 }
 0x126   : > { %1021 = vmatpush.msra.mxu1 %v3965_v25  ;;  %1041 = vmatpush.msra.mxu2 %v3966_v26 }
 0x127   : > { %1061 = vmatpush.msra.mxu3 %v3967_v27  ;;  %1002 = vmatpush.msra.mxu0 %v3968_v28 }
 0x128   : > { %1022 = vmatpush.msra.mxu1 %v3969_v29  ;;  %1042 = vmatpush.msra.mxu2 %v3970_v30 }
 0x129   : > { %1062 = vmatpush.msra.mxu3 %v3971_v31  ;;  %1003 = vmatpush.msra.mxu0 %v3972_v32  ;;  %v3138_v31 = vld [vmem:[#allocation3 + $0x1e0] sm:$0xff] }
 0x12a   : > { %1023 = vmatpush.msra.mxu1 %v3973_v33  ;;  %1043 = vmatpush.msra.mxu2 %v3974_v35 }
 0x12b   : > { %1063 = vmatpush.msra.mxu3 %v3975_v36 }
 0x186   : > { %v711_v37 = vpop.f32.mrf.mxu0  ;;  %v731_v38 = vpop.f32.mrf.mxu1 }
 0x187   : > { %v774_v40 = vadd.f32 %v711_v37, %v3976_v39  ;;  %v775_v42 = vadd.f32 %v731_v38, %v3977_v41  ;;  %v3141_v37 = vld [vmem:[#allocation3 + $0x1e8] sm:$0xff]  ;;  %v3144_v38 = vld [vmem:[#allocation3 + $0x1f0] sm:$0xff]  ;;  %v3147_v39 = vld [vmem:[#allocation3 + $0x1f8] sm:$0xff] }
 0x188   : > { %v3153_v41 = vld [vmem:[#allocation3 + $0x1c8] sm:$0xff] }
 0x189   : > { %v2079_v43 = vmul.f32 -1.442695, %v774_v40  ;;  %v2080_v44 = vmul.f32 -1.442695, %v775_v42  ;;  %v3150_v40 = vld [vmem:[#allocation3 + $0x1c0] sm:$0xff]  ;;  %v3156_v42 = vld [vmem:[#allocation3 + $0x1d0] sm:$0xff] }
 0x18b   : > { %2183 = vpow2.f32 %v2079_v43  ;;  %v3159_v43 = vld [vmem:[#allocation3 + $0x1d8] sm:$0xff] }
 0x18c   : > { %2185 = vpow2.f32 %v2080_v44  ;;  %v3162_v44 = vld [vmem:[#allocation3 + $0x1a0] sm:$0xff] }
 0x18d   : > { %v771_v45 = vpop.f32.mrf.mxu3  ;;  %v751_v20 = vpop.f32.mrf.mxu2 }
 0x18e   : > { %v777_v48 = vadd.f32 %v771_v45, %v3978_v46  ;;  %v776_v57 = vadd.f32 %v751_v20, %v3979_v8  ;;  %v3165_v45 = vld [vmem:[#allocation3 + $0x1a8] sm:$0xff]  ;;  %v3168_v46 = vld [vmem:[#allocation3 + $0x1b0] sm:$0xff] }
 0x18f   : > { %v3189_v20 = vld [vmem:[#allocation3 + $0x168] sm:$0xff] }
 0x190   : > { %v2081_v49 = vmul.f32 -1.442695, %v777_v48  ;;  %v3171_v48 = vld [vmem:[#allocation3 + $0x1b8] sm:$0xff]  ;;  %v3201_v8 = vld [vmem:[#allocation3 + $0x148] sm:$0xff] }
 0x191   : > { %v2184_v55 = vpop.eup %2183 }
 0x192   : > { %v781_v54 = vadd.f32 1.0, %v2184_v55  ;;  %2187 = vpow2.f32 %v2081_v49  ;;  %v2186_v4 = vpop.eup %2185  ;;  %v3174_v49 = vld [vmem:[#allocation3 + $0x180] sm:$0xff]  ;;  %v3177_v55 = vld [vmem:[#allocation3 + $0x188] sm:$0xff] }
 0x193   : > { %v800_v6 = vadd.f32 1.0, %v2186_v4  ;;  %v3183_v4 = vld [vmem:[#allocation3 + $0x198] sm:$0xff] }
 0x194   : > { %2189 = vrcp.f32 %v781_v54  ;;  %v793_v34 = vand.u32 2147483648, %v781_v54  ;;  %v791_v0 = vand.u32 2147483647, %v781_v54  ;;  %vm787_vm14 = vweird.f32 %v781_v54 }
 0x195   : > { %2191 = vrcp.f32 %v800_v6  ;;  %v812_v5 = vand.u32 2147483648, %v800_v6  ;;  %v810_v50 = vand.u32 2147483647, %v800_v6  ;;  %vm806_vm1 = vweird.f32 %v800_v6 }
 0x196   : > { %v794_v51 = vor.u32 1.1754944e-38, %v793_v34  ;;  %vm792_vm2 = vcmp.eq.f32.partialorder %v791_v0, 8.507059e+37  ;;  %v3219_v34 = vld [vmem:[#allocation3 + $0x138] sm:$0xff]  ;;  %v3228_v0 = vld [vmem:[#allocation3 + $0x110] sm:$0xff] }
 0x197   : > { %v813_v13 = vor.u32 1.1754944e-38, %v812_v5  ;;  %vm811_vm4 = vcmp.eq.f32.partialorder %v810_v50, 8.507059e+37  ;;  %v3231_v5 = vld [vmem:[#allocation3 + $0x118] sm:$0xff] }
 0x198   : > { %v2188_v1 = vpop.eup %2187  ;;  %v3243_v50 = vld [vmem:[#allocation3 + $0xf8] sm:$0xff] }
 0x199   : > { %v820_v60 = vadd.f32 1.0, %v2188_v1  ;;  %v3192_v1 = vld [vmem:[#allocation3 + $0x170] sm:$0xff] }
 0x19a   : > { %v2190_v58 = vpop.eup %2189 }
 0x19b   : > { %v783_v52 = vmul.f32 %v2190_v58, %v781_v54  ;;  %2193 = vrcp.f32 %v820_v60  ;;  %v2192_v53 = vpop.eup %2191  ;;  %vm788_vm13 = vweird.f32 %v2190_v58  ;;  %v832_v24 = vand.u32 2147483648, %v820_v60  ;;  %v3180_v54 = vld [vmem:[#allocation3 + $0x190] sm:$0xff] }
 0x19c   : > { %v802_v59 = vmul.f32 %v2192_v53, %v800_v6  ;;  %2195 = vtanh.f32 %v776_v57  ;;  %vm807_vm15 = vweird.f32 %v2192_v53  ;;  %vm789_vm0 = vmor %vm787_vm14, %vm788_vm13  ;;  %vm826_vm6 = vweird.f32 %v820_v60  ;;  %v3186_v6 = vld [vmem:[#allocation3 + $0x160] sm:$0xff]  ;;  %v3204_v57 = vld [vmem:[#allocation3 + $0x150] sm:$0xff] }
 0x19d   : > { %v784_v7 = vsub.f32 1.0, %v783_v52  ;;  %vm808_vm3 = vmor %vm806_vm1, %vm807_vm15  ;;  %v830_v25 = vand.u32 2147483647, %v820_v60  ;;  %v833_v27 = vor.u32 1.1754944e-38, %v832_v24  ;;  %v3207_v52 = vld [vmem:[#allocation3 + $0x158] sm:$0xff]  ;;  %v3288_v24 = vld [vmem:[#allocation3 + $0x70] sm:$0xff] }
 0x19e   : > { %v803_v61 = vsub.f32 1.0, %v802_v59  ;;  %v3216_v59 = vld [vmem:[#allocation3 + $0x130] sm:$0xff]  ;;  %3993 = vst [vmem:[#allocation21_spill] sm:$0xff] %v3288_v24 }
 0x19f   : > { %v785_v56 = vmul.f32 %v2190_v58, %v784_v7  ;;  %vm831_vm8 = vcmp.eq.f32.partialorder %v830_v25, 8.507059e+37  ;;  %v3213_v7 = vld [vmem:[#allocation3 + $0x128] sm:$0xff]  ;;  %v3291_v25 = vld [vmem:[#allocation3 + $0x78] sm:$0xff] }
 0x1a0   : > { %v804_v2 = vmul.f32 %v2192_v53, %v803_v61  ;;  %v3222_v61 = vld [vmem:[#allocation3 + $0x100] sm:$0xff]  ;;  %3994 = vst [vmem:[#allocation23_spill] sm:$0xff] %v3291_v25 }
 0x1a1   : > { %v2194_v62 = vpop.eup %2193  ;;  %v786_v63 = vadd.f32 %v2190_v58, %v785_v56  ;;  %v3225_v56 = vld [vmem:[#allocation3 + $0x108] sm:$0xff] }
 0x1a2   : > { %v822_v9 = vmul.f32 %v2194_v62, %v820_v60  ;;  %v805_v11 = vadd.f32 %v2192_v53, %v804_v2  ;;  %v2196_v12 = vpop.eup %2195  ;;  %vm827_vm5 = vweird.f32 %v2194_v62  ;;  %v3195_v60 = vld [vmem:[#allocation3 + $0x178] sm:$0xff]  ;;  %v3237_v2 = vld [vmem:[#allocation3 + $0xe8] sm:$0xff] }
 0x1a3   : > { %v790_v10 = vsel %vm789_vm0, %v2190_v58, %v786_v63  ;;  %vm828_vm7 = vmor %vm826_vm6, %vm827_vm5  ;;  %v3198_v58 = vld [vmem:[#allocation3 + $0x140] sm:$0xff]  ;;  %v3240_v63 = vld [vmem:[#allocation3 + $0xf0] sm:$0xff] }
 0x1a4   : > { %v795_v14 = vsel %vm792_vm2, %v794_v51, %v790_v10  ;;  %v823_v15 = vsub.f32 1.0, %v822_v9  ;;  %v809_v16 = vsel %vm808_vm3, %v2192_v53, %v805_v11  ;;  %v3210_v53 = vld [vmem:[#allocation3 + $0x120] sm:$0xff]  ;;  %v3249_v9 = vld [vmem:[#allocation3 + $0xc8] sm:$0xff]  ;;  %v3252_v10 = vld [vmem:[#allocation3 + $0xd0] sm:$0xff] }
 0x1a5   : > { %v837_v17 = vmul.f32 %v2196_v12, %v795_v14  ;;  %v814_v18 = vsel %vm811_vm4, %v813_v13, %v809_v16  ;;  %v3246_v51 = vld [vmem:[#allocation3 + $0xc0] sm:$0xff]  ;;  %3980 = vst [vmem:[#allocation10_spill] sm:$0xff] %v3249_v9  ;;  %v3255_v11 = vld [vmem:[#allocation3 + $0xd8] sm:$0xff]  ;;  %v3261_v13 = vld [vmem:[#allocation3 + $0xa8] sm:$0xff] }
 0x1a6   : > { %v824_v19 = vmul.f32 %v2194_v62, %v823_v15  ;;  %v836_v21 = vmul.f32 %v814_v18, %v3056_v47  ;;  %3981 = vst [vmem:[#allocation9_spill] sm:$0xff] %v3252_v10  ;;  %v3258_v12 = vld [vmem:[#allocation3 + $0xa0] sm:$0xff]  ;;  %v3264_v14 = vld [vmem:[#allocation3 + $0xb0] sm:$0xff]  ;;  %v3267_v15 = vld [vmem:[#allocation3 + $0xb8] sm:$0xff] }
 0x1a7   : > { %3982 = vst [vmem:[#allocation11_spill] sm:$0xff] %v3255_v11  ;;  %v3270_v16 = vld [vmem:[#allocation3 + $0x80] sm:$0xff]  ;;  %v3276_v18 = vld [vmem:[#allocation3 + $0x90] sm:$0xff] }
 0x1a8   : > { %v3134_v22 = vadd.f32 %v837_v17, %v836_v21  ;;  %v825_v23 = vadd.f32 %v2194_v62, %v824_v19  ;;  %3983 = vst [vmem:[#allocation12_spill] sm:$0xff] %v3258_v12  ;;  %v3273_v17 = vld [vmem:[#allocation3 + $0x88] sm:$0xff]  ;;  %v3279_v19 = vld [vmem:[#allocation3 + $0x98] sm:$0xff]  ;;  %v3282_v21 = vld [vmem:[#allocation3 + $0x60] sm:$0xff] }
 0x1a9   : > { %3984 = vst [vmem:[#allocation14_spill] sm:$0xff] %v3261_v13 }
 0x1aa   : > { %2197 = vtanh.f32 %v3134_v22  ;;  %v829_v26 = vsel %vm828_vm7, %v2194_v62, %v825_v23  ;;  %v3234_v62 = vld [vmem:[#allocation3 + $0xe0] sm:$0xff]  ;;  %3985 = vst [vmem:[#allocation13_spill] sm:$0xff] %v3264_v14  ;;  %v3285_v23 = vld [vmem:[#allocation3 + $0x68] sm:$0xff] }
 0x1ab   : > { %v834_v29 = vsel %vm831_vm8, %v833_v27, %v829_v26  ;;  %3986 = vst [vmem:[#allocation15_spill] sm:$0xff] %v3267_v15  ;;  %v3294_v26 = vld [vmem:[#allocation3 + $0x40] sm:$0xff]  ;;  %v3297_v27 = vld [vmem:[#allocation3 + $0x48] sm:$0xff] }
 0x1ac   : > { %3987 = vst [vmem:[#allocation16_spill] sm:$0xff] %v3270_v16 }
 0x1ad   : > { %3988 = vst [vmem:[#allocation18_spill] sm:$0xff] %v3273_v17 }
 0x1ae   : > { %3989 = vst [vmem:[#allocation17_spill] sm:$0xff] %v3276_v18 }
 0x1af   : > { %3990 = vst [vmem:[#allocation19_spill] sm:$0xff] %v3279_v19 }
 0x1b0   : > { %v2198_v28 = vpop.eup %2197  ;;  %3991 = vst [vmem:[#allocation20_spill] sm:$0xff] %v3282_v21 }
 0x1b1   : > { %v840_v30 = vmul.f32 %v2198_v28, %v834_v29  ;;  %3992 = vst [vmem:[#allocation22_spill] sm:$0xff] %v3285_v23  ;;  %v3300_v28 = vld [vmem:[#allocation3 + $0x50] sm:$0xff]  ;;  %v3303_v29 = vld [vmem:[#allocation3 + $0x58] sm:$0xff] }
 0x1b2   : > { %3995 = vst [vmem:[#allocation24_spill] sm:$0xff] %v3294_v26 }
 0x1b3   : > { %857 = vmatmul.f32.vlgmr.msrb.gmra.mxu0 %v840_v30  ;;  %877 = vmatmul.f32.vlgmr.msrb.gmra.mxu1 %v840_v30  ;;  %v1728_v47 = vmul.f32 %v3062_v3, %v840_v30  ;;  %3996 = vst [vmem:[#allocation26_spill] sm:$0xff] %v3297_v27 }
 0x1b4   : > { %897 = vmatmul.f32.vlgmr.msrb.gmra.mxu2 %v840_v30  ;;  %917 = vmatmul.f32.vlgmr.msrb.gmra.mxu3 %v840_v30  ;;  %3997 = vst [vmem:[#allocation25_spill] sm:$0xff] %v3300_v28  ;;  %v3306_v30 = vld [vmem:[#allocation3 + $0x20] sm:$0xff] }
 0x1b5   : > { %1737 = vadd.xlane.f32.xlu0 %v1728_v47  ;;  %1135 = vmatpush.msrb.mxu0 %v3138_v31  ;;  %3998 = vst [vmem:[#allocation27_spill] sm:$0xff] %v3303_v29  ;;  %v3309_v47 = vld [vmem:[#allocation3 + $0x28] sm:$0xff] }
 0x1b6   : > { %1155 = vmatpush.msrb.mxu1 %v3141_v37  ;;  %1175 = vmatpush.msrb.mxu2 %v3144_v38  ;;  %3999 = vst [vmem:[#allocation28_spill] sm:$0xff] %v3306_v30 }
 0x1b7   : > { %1195 = vmatpush.msrb.mxu3 %v3147_v39  ;;  %1136 = vmatpush.msrb.mxu0 %v3150_v40  ;;  %4000 = vst [vmem:[#allocation29_spill] sm:$0xff] %v3309_v47 }
 0x1b8   : > { %1156 = vmatpush.msrb.mxu1 %v3153_v41  ;;  %1176 = vmatpush.msrb.mxu2 %v3156_v42 }
 0x1b9   : > { %1196 = vmatpush.msrb.mxu3 %v3159_v43  ;;  %1137 = vmatpush.msrb.mxu0 %v3162_v44 }
 0x1ba   : > { %1157 = vmatpush.msrb.mxu1 %v3165_v45  ;;  %1177 = vmatpush.msrb.mxu2 %v3168_v46 }
 0x1bb   : > { %1197 = vmatpush.msrb.mxu3 %v3171_v48  ;;  %1138 = vmatpush.msrb.mxu0 %v3174_v49 }
 0x1bc   : > { %1158 = vmatpush.msrb.mxu1 %v3177_v55  ;;  %1178 = vmatpush.msrb.mxu2 %v3180_v54 }
 0x1bd   : > { %1198 = vmatpush.msrb.mxu3 %v3183_v4  ;;  %1139 = vmatpush.msrb.mxu0 %v3186_v6 }
 0x1be   : > { %1159 = vmatpush.msrb.mxu1 %v3189_v20  ;;  %1179 = vmatpush.msrb.mxu2 %v3192_v1 }
 0x1bf   : > { %1199 = vmatpush.msrb.mxu3 %v3195_v60  ;;  %1140 = vmatpush.msrb.mxu0 %v3198_v58 }
 0x1c0   : > { %1160 = vmatpush.msrb.mxu1 %v3201_v8  ;;  %1180 = vmatpush.msrb.mxu2 %v3204_v57 }
 0x1c1   : > { %1200 = vmatpush.msrb.mxu3 %v3207_v52  ;;  %1141 = vmatpush.msrb.mxu0 %v3210_v53 }
 0x1c2   : > { %1161 = vmatpush.msrb.mxu1 %v3213_v7  ;;  %1181 = vmatpush.msrb.mxu2 %v3216_v59 }
 0x1c3   : > { %1201 = vmatpush.msrb.mxu3 %v3219_v34  ;;  %1142 = vmatpush.msrb.mxu0 %v3222_v61 }
 0x1c4   : > { %1162 = vmatpush.msrb.mxu1 %v3225_v56  ;;  %1182 = vmatpush.msrb.mxu2 %v3228_v0 }
 0x1c5   : > { %1202 = vmatpush.msrb.mxu3 %v3231_v5  ;;  %1143 = vmatpush.msrb.mxu0 %v3234_v62 }
 0x1c6   : > { %1163 = vmatpush.msrb.mxu1 %v3237_v2  ;;  %1183 = vmatpush.msrb.mxu2 %v3240_v63 }
 0x1c7   : > { %1203 = vmatpush.msrb.mxu3 %v3243_v50  ;;  %1144 = vmatpush.msrb.mxu0 %v3246_v51 }
 0x1c8   : > { %1164 = vmatpush.msrb.mxu1 %v3249_v9  ;;  %1184 = vmatpush.msrb.mxu2 %v3252_v10 }
 0x1c9   : > { %1204 = vmatpush.msrb.mxu3 %v3255_v11  ;;  %1145 = vmatpush.msrb.mxu0 %v3258_v12 }
 0x1ca   : > { %1165 = vmatpush.msrb.mxu1 %v3261_v13  ;;  %1185 = vmatpush.msrb.mxu2 %v3264_v14 }
 0x1cb   : > { %1205 = vmatpush.msrb.mxu3 %v3267_v15  ;;  %1146 = vmatpush.msrb.mxu0 %v3270_v16 }
 0x1cc   : > { %1166 = vmatpush.msrb.mxu1 %v3273_v17  ;;  %1186 = vmatpush.msrb.mxu2 %v3276_v18 }
 0x1cd   : > { %1206 = vmatpush.msrb.mxu3 %v3279_v19  ;;  %1147 = vmatpush.msrb.mxu0 %v3282_v21 }
 0x1ce   : > { %1167 = vmatpush.msrb.mxu1 %v3285_v23  ;;  %1187 = vmatpush.msrb.mxu2 %v3288_v24 }
 0x1cf   : > { %1207 = vmatpush.msrb.mxu3 %v3291_v25  ;;  %1148 = vmatpush.msrb.mxu0 %v3294_v26  ;;  %v3312_v26 = vld [vmem:[#allocation3 + $0x30] sm:$0xff]  ;;  %v4004_v25 = vld [vmem:[#allocation40_spill] sm:$0xff] }
 0x1d0   : > { %1168 = vmatpush.msrb.mxu1 %v3297_v27  ;;  %1188 = vmatpush.msrb.mxu2 %v3300_v28  ;;  %4001 = vst [vmem:[#allocation30_spill] sm:$0xff] %v3312_v26  ;;  %v3315_v27 = vld [vmem:[#allocation3 + $0x38] sm:$0xff]  ;;  %v4003_v28 = vld [vmem:[#allocation39_spill] sm:$0xff] }
 0x1d1   : > { %1208 = vmatpush.msrb.mxu3 %v3303_v29  ;;  %1149 = vmatpush.msrb.mxu0 %v3306_v30  ;;  %4002 = vst [vmem:[#allocation31_spill] sm:$0xff] %v3315_v27 }
 0x1d2   : > { %1169 = vmatpush.msrb.mxu1 %v3309_v47  ;;  %1189 = vmatpush.msrb.mxu2 %v3312_v26 }
 0x1d3   : > { %1209 = vmatpush.msrb.mxu3 %v3315_v27  ;;  %1150 = vmatpush.msrb.mxu0 %v3972_v32  ;;  %v4005_v27 = vld [vmem:[#allocation42_spill] sm:$0xff] }
 0x1d4   : > { %1170 = vmatpush.msrb.mxu1 %v3973_v33  ;;  %1190 = vmatpush.msrb.mxu2 %v3974_v35 }
 0x1d5   : > { %1210 = vmatpush.msrb.mxu3 %v3975_v36 }
 0x230   : > { %v858_v30 = vpop.f32.mrf.mxu0  ;;  %v878_v29 = vpop.f32.mrf.mxu1 }
 0x231   : > { %v921_v47 = vadd.f32 %v858_v30, %v4003_v28  ;;  %v922_v24 = vadd.f32 %v878_v29, %v4004_v25  ;;  %v4006_v25 = vld [vmem:[#allocation41_spill] sm:$0xff] }
 0x233   : > { %v2082_v23 = vmul.f32 -1.442695, %v921_v47  ;;  %v2083_v26 = vmul.f32 -1.442695, %v922_v24 }
 0x235   : > { %2199 = vpow2.f32 %v2082_v23 }
 0x236   : > { %2201 = vpow2.f32 %v2083_v26 }
 0x237   : > { %v918_v21 = vpop.f32.mrf.mxu3  ;;  %v898_v17 = vpop.f32.mrf.mxu2 }
 0x238   : > { %v924_v19 = vadd.f32 %v918_v21, %v4005_v27  ;;  %v923_v29 = vadd.f32 %v898_v17, %v4006_v25 }
 0x23a   : > { %v2084_v32 = vmul.f32 -1.442695, %v924_v19 }
 0x23b   : > { %v2200_v18 = vpop.eup %2199 }
 0x23c   : > { %v928_v33 = vadd.f32 1.0, %v2200_v18  ;;  %2203 = vpow2.f32 %v2084_v32  ;;  %v2202_v35 = vpop.eup %2201 }
 0x23d   : > { %v947_v36 = vadd.f32 1.0, %v2202_v35 }
 0x23e   : > { %2205 = vrcp.f32 %v928_v33  ;;  %v940_v21 = vand.u32 2147483648, %v928_v33  ;;  %v938_v27 = vand.u32 2147483647, %v928_v33  ;;  %vm934_vm10 = vweird.f32 %v928_v33 }
 0x23f   : > { %2207 = vrcp.f32 %v947_v36  ;;  %v959_v32 = vand.u32 2147483648, %v947_v36  ;;  %v957_v14 = vand.u32 2147483647, %v947_v36  ;;  %vm953_vm13 = vweird.f32 %v947_v36 }
 0x240   : > { %v941_v17 = vor.u32 1.1754944e-38, %v940_v21  ;;  %vm939_vm14 = vcmp.eq.f32.partialorder %v938_v27, 8.507059e+37  ;;  %v4010_v27 = vld [vmem:[#allocation12_spill] sm:$0xff] }
 0x241   : > { %vm958_vm0 = vcmp.eq.f32.partialorder %v957_v14, 8.507059e+37 }
 0x242   : > { %v2204_v16 = vpop.eup %2203 }
 0x243   : > { %v967_v28 = vadd.f32 1.0, %v2204_v16 }
 0x244   : > { %v2206_v30 = vpop.eup %2205 }
 0x245   : > { %v930_v24 = vmul.f32 %v2206_v30, %v928_v33  ;;  %2209 = vrcp.f32 %v967_v28  ;;  %v2208_v23 = vpop.eup %2207  ;;  %vm935_vm9 = vweird.f32 %v2206_v30  ;;  %vm973_vm2 = vweird.f32 %v967_v28 }
 0x246   : > { %v949_v47 = vmul.f32 %v2208_v23, %v947_v36  ;;  %2211 = vtanh.f32 %v923_v29  ;;  %vm954_vm11 = vweird.f32 %v2208_v23  ;;  %vm936_vm12 = vmor %vm934_vm10, %vm935_vm9  ;;  %v960_v29 = vor.u32 1.1754944e-38, %v959_v32  ;;  %v4011_v32 = vld [vmem:[#allocation14_spill] sm:$0xff] }
 0x247   : > { %v931_v26 = vsub.f32 1.0, %v930_v24  ;;  %vm955_vm15 = vmor %vm953_vm13, %vm954_vm11  ;;  %v979_v36 = vand.u32 2147483648, %v967_v28 }
 0x248   : > { %v950_v19 = vsub.f32 1.0, %v949_v47 }
 0x249   : > { %v932_v18 = vmul.f32 %v2206_v30, %v931_v26 }
 0x24a   : > { %v951_v15 = vmul.f32 %v2208_v23, %v950_v19 }
 0x24b   : > { %v2210_v35 = vpop.eup %2209  ;;  %v933_v16 = vadd.f32 %v2206_v30, %v932_v18 }
 0x24c   : > { %v969_v25 = vmul.f32 %v2210_v35, %v967_v28  ;;  %v952_v24 = vadd.f32 %v2208_v23, %v951_v15  ;;  %v2212_v12 = vpop.eup %2211  ;;  %vm974_vm1 = vweird.f32 %v2210_v35  ;;  %v977_v15 = vand.u32 2147483647, %v967_v28  ;;  %v4009_v28 = vld [vmem:[#allocation11_spill] sm:$0xff] }
 0x24d   : > { %v937_v13 = vsel %vm936_vm12, %v2206_v30, %v933_v16  ;;  %vm975_vm3 = vmor %vm973_vm2, %vm974_vm1  ;;  %v4013_v16 = vld [vmem:[#allocation15_spill] sm:$0xff] }
 0x24e   : > { %v942_v26 = vsel %vm939_vm14, %v941_v17, %v937_v13  ;;  %v970_v47 = vsub.f32 1.0, %v969_v25  ;;  %v956_v11 = vsel %vm955_vm15, %v2208_v23, %v952_v24  ;;  %v980_v13 = vor.u32 1.1754944e-38, %v979_v36  ;;  %v4014_v17 = vld [vmem:[#allocation16_spill] sm:$0xff]  ;;  %v4015_v25 = vld [vmem:[#allocation18_spill] sm:$0xff]  ;;  %v4016_v24 = vld [vmem:[#allocation17_spill] sm:$0xff] }
 0x24f   : > { %v984_v33 = vmul.f32 %v2212_v12, %v942_v26  ;;  %v961_v10 = vsel %vm958_vm0, %v960_v29, %v956_v11  ;;  %vm978_vm4 = vcmp.eq.f32.partialorder %v977_v15, 8.507059e+37  ;;  %v4008_v11 = vld [vmem:[#allocation9_spill] sm:$0xff]  ;;  %v4017_v29 = vld [vmem:[#allocation19_spill] sm:$0xff]  ;;  %v4018_v26 = vld [vmem:[#allocation20_spill] sm:$0xff] }
 0x250   : > { %v971_v19 = vmul.f32 %v2210_v35, %v970_v47  ;;  %v983_v18 = vmul.f32 %v961_v10, %v3134_v22  ;;  %v4007_v10 = vld [vmem:[#allocation10_spill] sm:$0xff]  ;;  %v4024_v36 = vld [vmem:[#allocation25_spill] sm:$0xff]  ;;  %v4025_v15 = vld [vmem:[#allocation27_spill] sm:$0xff] }
 0x251   : > { %v4019_v47 = vld [vmem:[#allocation22_spill] sm:$0xff] }
 0x252   : > { %v3327_v9 = vadd.f32 %v984_v33, %v983_v18  ;;  %v972_v21 = vadd.f32 %v2210_v35, %v971_v19  ;;  %v4020_v33 = vld [vmem:[#allocation21_spill] sm:$0xff]  ;;  %v4021_v19 = vld [vmem:[#allocation23_spill] sm:$0xff]  ;;  %v4022_v18 = vld [vmem:[#allocation24_spill] sm:$0xff] }
 0x254   : > { %2213 = vtanh.f32 %v3327_v9  ;;  %v976_v30 = vsel %vm975_vm3, %v2210_v35, %v972_v21  ;;  %v4012_v35 = vld [vmem:[#allocation13_spill] sm:$0xff]  ;;  %v4023_v21 = vld [vmem:[#allocation26_spill] sm:$0xff] }
 0x255   : > { %v981_v14 = vsel %vm978_vm4, %v980_v13, %v976_v30  ;;  %v4026_v30 = vld [vmem:[#allocation28_spill] sm:$0xff]  ;;  %v4027_v13 = vld [vmem:[#allocation29_spill] sm:$0xff] }
 0x25a   : > { %v2214_v23 = vpop.eup %2213 }
 0x25b   : > { %v987_v12 = vmul.f32 %v2214_v23, %v981_v14  ;;  %v4028_v23 = vld [vmem:[#allocation30_spill] sm:$0xff]  ;;  %v4029_v14 = vld [vmem:[#allocation31_spill] sm:$0xff] }
 0x25d   : > { %1004 = vmatmul.f32.vlgmr.msra.gmra.mxu0 %v987_v12  ;;  %1024 = vmatmul.f32.vlgmr.msra.gmra.mxu1 %v987_v12  ;;  %v1729_v22 = vmul.f32 %v3062_v3, %v987_v12 }
 0x25e   : > { %1044 = vmatmul.f32.vlgmr.msra.gmra.mxu2 %v987_v12  ;;  %1064 = vmatmul.f32.vlgmr.msra.gmra.mxu3 %v987_v12  ;;  %v3391_v12 = vld [vmem:[#allocation3] sm:$0xff] }
 0x25f   : > { %1739 = vadd.xlane.f32.xlu1 %v1729_v22  ;;  %1282 = vmatpush.msra.mxu0 %v3138_v31  ;;  %4030 = vst [vmem:[#allocation32_spill] sm:$0xff] %v3391_v12  ;;  %v3394_v22 = vld [vmem:[#allocation3 + $0x8] sm:$0xff] }
 0x260   : > { %1302 = vmatpush.msra.mxu1 %v3141_v37  ;;  %1322 = vmatpush.msra.mxu2 %v3144_v38  ;;  %4031 = vst [vmem:[#allocation33_spill] sm:$0xff] %v3394_v22 }
 0x261   : > { %1342 = vmatpush.msra.mxu3 %v3147_v39  ;;  %1283 = vmatpush.msra.mxu0 %v3150_v40 }
 0x262   : > { %1303 = vmatpush.msra.mxu1 %v3153_v41  ;;  %1323 = vmatpush.msra.mxu2 %v3156_v42 }
 0x263   : > { %1343 = vmatpush.msra.mxu3 %v3159_v43  ;;  %1284 = vmatpush.msra.mxu0 %v3162_v44 }
 0x264   : > { %1304 = vmatpush.msra.mxu1 %v3165_v45  ;;  %1324 = vmatpush.msra.mxu2 %v3168_v46 }
 0x265   : > { %1344 = vmatpush.msra.mxu3 %v3171_v48  ;;  %1285 = vmatpush.msra.mxu0 %v3174_v49 }
 0x266   : > { %1305 = vmatpush.msra.mxu1 %v3177_v55  ;;  %1325 = vmatpush.msra.mxu2 %v3180_v54 }
 0x267   : > { %1345 = vmatpush.msra.mxu3 %v3183_v4  ;;  %1286 = vmatpush.msra.mxu0 %v3186_v6 }
 0x268   : > { %1306 = vmatpush.msra.mxu1 %v3189_v20  ;;  %1326 = vmatpush.msra.mxu2 %v3192_v1 }
 0x269   : > { %1346 = vmatpush.msra.mxu3 %v3195_v60  ;;  %1287 = vmatpush.msra.mxu0 %v3198_v58 }
 0x26a   : > { %1307 = vmatpush.msra.mxu1 %v3201_v8  ;;  %1327 = vmatpush.msra.mxu2 %v3204_v57 }
 0x26b   : > { %1347 = vmatpush.msra.mxu3 %v3207_v52  ;;  %1288 = vmatpush.msra.mxu0 %v3210_v53 }
 0x26c   : > { %1308 = vmatpush.msra.mxu1 %v3213_v7  ;;  %1328 = vmatpush.msra.mxu2 %v3216_v59 }
 0x26d   : > { %1348 = vmatpush.msra.mxu3 %v3219_v34  ;;  %1289 = vmatpush.msra.mxu0 %v3222_v61 }
 0x26e   : > { %1309 = vmatpush.msra.mxu1 %v3225_v56  ;;  %1329 = vmatpush.msra.mxu2 %v3228_v0 }
 0x26f   : > { %1349 = vmatpush.msra.mxu3 %v3231_v5  ;;  %1290 = vmatpush.msra.mxu0 %v3234_v62 }
 0x270   : > { %1310 = vmatpush.msra.mxu1 %v3237_v2  ;;  %1330 = vmatpush.msra.mxu2 %v3240_v63 }
 0x271   : > { %1350 = vmatpush.msra.mxu3 %v3243_v50  ;;  %1291 = vmatpush.msra.mxu0 %v3246_v51 }
 0x272   : > { %1311 = vmatpush.msra.mxu1 %v4007_v10  ;;  %1331 = vmatpush.msra.mxu2 %v4008_v11 }
 0x273   : > { %1351 = vmatpush.msra.mxu3 %v4009_v28  ;;  %1292 = vmatpush.msra.mxu0 %v4010_v27 }
 0x274   : > { %1312 = vmatpush.msra.mxu1 %v4011_v32  ;;  %1332 = vmatpush.msra.mxu2 %v4012_v35 }
 0x275   : > { %1352 = vmatpush.msra.mxu3 %v4013_v16  ;;  %1293 = vmatpush.msra.mxu0 %v4014_v17 }
 0x276   : > { %1313 = vmatpush.msra.mxu1 %v4015_v25  ;;  %1333 = vmatpush.msra.mxu2 %v4016_v24 }
 0x277   : > { %1353 = vmatpush.msra.mxu3 %v4017_v29  ;;  %1294 = vmatpush.msra.mxu0 %v4018_v26 }
 0x278   : > { %1314 = vmatpush.msra.mxu1 %v4019_v47  ;;  %1334 = vmatpush.msra.mxu2 %v4020_v33 }
 0x279   : > { %1354 = vmatpush.msra.mxu3 %v4021_v19  ;;  %1295 = vmatpush.msra.mxu0 %v4022_v18 }
 0x27a   : > { %1315 = vmatpush.msra.mxu1 %v4023_v21  ;;  %1335 = vmatpush.msra.mxu2 %v4024_v36  ;;  %v3397_v21 = vld [vmem:[#allocation3 + $0x10] sm:$0xff]  ;;  %v4035_v36 = vld [vmem:[#allocation44_spill] sm:$0xff] }
 0x27b   : > { %1355 = vmatpush.msra.mxu3 %v4025_v15  ;;  %1296 = vmatpush.msra.mxu0 %v4026_v30  ;;  %4032 = vst [vmem:[#allocation34_spill] sm:$0xff] %v3397_v21  ;;  %v3400_v15 = vld [vmem:[#allocation3 + $0x18] sm:$0xff]  ;;  %v4034_v30 = vld [vmem:[#allocation43_spill] sm:$0xff] }
 0x27c   : > { %1316 = vmatpush.msra.mxu1 %v4027_v13  ;;  %1336 = vmatpush.msra.mxu2 %v4028_v23  ;;  %4033 = vst [vmem:[#allocation35_spill] sm:$0xff] %v3400_v15 }
 0x27d   : > { %1356 = vmatpush.msra.mxu3 %v4029_v14  ;;  %1297 = vmatpush.msra.mxu0 %v3391_v12 }
 0x27e   : > { %1317 = vmatpush.msra.mxu1 %v3394_v22  ;;  %1337 = vmatpush.msra.mxu2 %v3397_v21  ;;  %v4036_v22 = vld [vmem:[#allocation46_spill] sm:$0xff] }
 0x27f   : > { %1357 = vmatpush.msra.mxu3 %v3400_v15 }
 0x2da   : > { %v1005_v13 = vpop.f32.mrf.mxu0  ;;  %v1025_v23 = vpop.f32.mrf.mxu1 }
 0x2db   : > { %v1068_v14 = vadd.f32 %v1005_v13, %v4034_v30  ;;  %v1069_v18 = vadd.f32 %v1025_v23, %v4035_v36  ;;  %v4037_v36 = vld [vmem:[#allocation45_spill] sm:$0xff] }
 0x2dd   : > { %v2085_v19 = vmul.f32 -1.442695, %v1068_v14  ;;  %v2086_v12 = vmul.f32 -1.442695, %v1069_v18 }
 0x2df   : > { %2215 = vpow2.f32 %v2085_v19 }
 0x2e0   : > { %2217 = vpow2.f32 %v2086_v12 }
 0x2e1   : > { %v1065_v33 = vpop.f32.mrf.mxu3  ;;  %v1045_v25 = vpop.f32.mrf.mxu2 }
 0x2e2   : > { %v1071_v47 = vadd.f32 %v1065_v33, %v4036_v22  ;;  %v1070_v23 = vadd.f32 %v1045_v25, %v4037_v36 }
 0x2e4   : > { %v2087_v26 = vmul.f32 -1.442695, %v1071_v47 }
 0x2e5   : > { %v2216_v29 = vpop.eup %2215 }
 0x2e6   : > { %v1075_v21 = vadd.f32 1.0, %v2216_v29  ;;  %2219 = vpow2.f32 %v2087_v26  ;;  %v2218_v24 = vpop.eup %2217 }
 0x2e7   : > { %v1094_v15 = vadd.f32 1.0, %v2218_v24 }
 0x2e8   : > { %2221 = vrcp.f32 %v1075_v21  ;;  %v1087_v33 = vand.u32 2147483648, %v1075_v21  ;;  %v1085_v26 = vand.u32 2147483647, %v1075_v21  ;;  %vm1081_vm6 = vweird.f32 %v1075_v21 }
 0x2e9   : > { %2223 = vrcp.f32 %v1094_v15  ;;  %v1106_v22 = vand.u32 2147483648, %v1094_v15  ;;  %v1104_v35 = vand.u32 2147483647, %v1094_v15  ;;  %vm1100_vm9 = vweird.f32 %v1094_v15 }
 0x2ea   : > { %v1088_v25 = vor.u32 1.1754944e-38, %v1087_v33  ;;  %vm1086_vm10 = vcmp.eq.f32.partialorder %v1085_v26, 8.507059e+37  ;;  %v4042_v26 = vld [vmem:[#allocation14_spill] sm:$0xff] }
 0x2eb   : > { %vm1105_vm12 = vcmp.eq.f32.partialorder %v1104_v35, 8.507059e+37 }
 0x2ec   : > { %v2220_v17 = vpop.eup %2219 }
 0x2ed   : > { %v1114_v30 = vadd.f32 1.0, %v2220_v17 }
 0x2ee   : > { %v2222_v13 = vpop.eup %2221 }
 0x2ef   : > { %v1077_v18 = vmul.f32 %v2222_v13, %v1075_v21  ;;  %2225 = vrcp.f32 %v1114_v30  ;;  %v2224_v19 = vpop.eup %2223  ;;  %vm1082_vm5 = vweird.f32 %v2222_v13  ;;  %vm1120_vm14 = vweird.f32 %v1114_v30 }
 0x2f0   : > { %v1096_v12 = vmul.f32 %v2224_v19, %v1094_v15  ;;  %2227 = vtanh.f32 %v1070_v23  ;;  %vm1101_vm7 = vweird.f32 %v2224_v19  ;;  %vm1083_vm8 = vmor %vm1081_vm6, %vm1082_vm5  ;;  %v1107_v23 = vor.u32 1.1754944e-38, %v1106_v22  ;;  %v4043_v22 = vld [vmem:[#allocation13_spill] sm:$0xff] }
 0x2f1   : > { %v1078_v14 = vsub.f32 1.0, %v1077_v18  ;;  %vm1102_vm11 = vmor %vm1100_vm9, %vm1101_vm7  ;;  %v1126_v15 = vand.u32 2147483648, %v1114_v30 }
 0x2f2   : > { %v1097_v47 = vsub.f32 1.0, %v1096_v12 }
 0x2f3   : > { %v1079_v29 = vmul.f32 %v2222_v13, %v1078_v14 }
 0x2f4   : > { %v1098_v16 = vmul.f32 %v2224_v19, %v1097_v47 }
 0x2f5   : > { %v2226_v24 = vpop.eup %2225  ;;  %v1080_v17 = vadd.f32 %v2222_v13, %v1079_v29 }
 0x2f6   : > { %v1116_v36 = vmul.f32 %v2226_v24, %v1114_v30  ;;  %v1099_v18 = vadd.f32 %v2224_v19, %v1098_v16  ;;  %v2228_v27 = vpop.eup %2227  ;;  %vm1121_vm13 = vweird.f32 %v2226_v24  ;;  %v1124_v16 = vand.u32 2147483647, %v1114_v30  ;;  %v4041_v30 = vld [vmem:[#allocation12_spill] sm:$0xff] }
 0x2f7   : > { %v1084_v32 = vsel %vm1083_vm8, %v2222_v13, %v1080_v17  ;;  %vm1122_vm15 = vmor %vm1120_vm14, %vm1121_vm13  ;;  %v4045_v17 = vld [vmem:[#allocation16_spill] sm:$0xff] }
 0x2f8   : > { %v1089_v14 = vsel %vm1086_vm10, %v1088_v25, %v1084_v32  ;;  %v1117_v12 = vsub.f32 1.0, %v1116_v36  ;;  %v1103_v28 = vsel %vm1102_vm11, %v2224_v19, %v1099_v18  ;;  %v1127_v32 = vor.u32 1.1754944e-38, %v1126_v15  ;;  %v4046_v25 = vld [vmem:[#allocation18_spill] sm:$0xff]  ;;  %v4047_v36 = vld [vmem:[#allocation17_spill] sm:$0xff]  ;;  %v4048_v18 = vld [vmem:[#allocation19_spill] sm:$0xff] }
 0x2f9   : > { %v1131_v21 = vmul.f32 %v2228_v27, %v1089_v14  ;;  %v1108_v11 = vsel %vm1105_vm12, %v1107_v23, %v1103_v28  ;;  %vm1125_vm0 = vcmp.eq.f32.partialorder %v1124_v16, 8.507059e+37  ;;  %v4040_v28 = vld [vmem:[#allocation11_spill] sm:$0xff]  ;;  %v4049_v23 = vld [vmem:[#allocation20_spill] sm:$0xff]  ;;  %v4050_v14 = vld [vmem:[#allocation22_spill] sm:$0xff] }
 0x2fa   : > { %v1118_v47 = vmul.f32 %v2226_v24, %v1117_v12  ;;  %v1130_v29 = vmul.f32 %v1108_v11, %v3327_v9  ;;  %v4039_v11 = vld [vmem:[#allocation9_spill] sm:$0xff]  ;;  %v4056_v15 = vld [vmem:[#allocation27_spill] sm:$0xff]  ;;  %v4057_v16 = vld [vmem:[#allocation28_spill] sm:$0xff] }
 0x2fb   : > { %v4051_v12 = vld [vmem:[#allocation21_spill] sm:$0xff] }
 0x2fc   : > { %v3408_v10 = vadd.f32 %v1131_v21, %v1130_v29  ;;  %v1119_v33 = vadd.f32 %v2226_v24, %v1118_v47  ;;  %v4052_v21 = vld [vmem:[#allocation23_spill] sm:$0xff]  ;;  %v4053_v47 = vld [vmem:[#allocation24_spill] sm:$0xff]  ;;  %v4054_v29 = vld [vmem:[#allocation26_spill] sm:$0xff] }
 0x2fe   : > { %2229 = vtanh.f32 %v3408_v10  ;;  %v1123_v13 = vsel %vm1122_vm15, %v2226_v24, %v1119_v33  ;;  %v4044_v24 = vld [vmem:[#allocation15_spill] sm:$0xff]  ;;  %v4055_v33 = vld [vmem:[#allocation25_spill] sm:$0xff] }
 0x2ff   : > { %v1128_v35 = vsel %vm1125_vm0, %v1127_v32, %v1123_v13  ;;  %v4058_v13 = vld [vmem:[#allocation29_spill] sm:$0xff]  ;;  %v4059_v32 = vld [vmem:[#allocation30_spill] sm:$0xff] }
 0x304   : > { %v2230_v19 = vpop.eup %2229 }
 0x305   : > { %v1134_v27 = vmul.f32 %v2230_v19, %v1128_v35  ;;  %v4060_v19 = vld [vmem:[#allocation31_spill] sm:$0xff]  ;;  %v4061_v35 = vld [vmem:[#allocation32_spill] sm:$0xff] }
 0x307   : > { %1151 = vmatmul.f32.vlgmr.msrb.gmra.mxu0 %v1134_v27  ;;  %1171 = vmatmul.f32.vlgmr.msrb.gmra.mxu1 %v1134_v27  ;;  %v1730_v9 = vmul.f32 %v3062_v3, %v1134_v27  ;;  %v4038_v3 = vld [vmem:[#allocation10_spill] sm:$0xff] }
 0x308   : > { %1191 = vmatmul.f32.vlgmr.msrb.gmra.mxu2 %v1134_v27  ;;  %1211 = vmatmul.f32.vlgmr.msrb.gmra.mxu3 %v1134_v27  ;;  %v4062_v27 = vld [vmem:[#allocation33_spill] sm:$0xff] }
 0x309   : > { %1741 = vadd.xlane.f32.xlu1 %v1730_v9  ;;  %1429 = vmatpush.msrb.mxu0 %v3138_v31  ;;  %v4063_v9 = vld [vmem:[#allocation34_spill] sm:$0xff] }
 0x30a   : > { %1449 = vmatpush.msrb.mxu1 %v3141_v37  ;;  %1469 = vmatpush.msrb.mxu2 %v3144_v38 }
 0x30b   : > { %1489 = vmatpush.msrb.mxu3 %v3147_v39  ;;  %1430 = vmatpush.msrb.mxu0 %v3150_v40 }
 0x30c   : > { %1450 = vmatpush.msrb.mxu1 %v3153_v41  ;;  %1470 = vmatpush.msrb.mxu2 %v3156_v42 }
 0x30d   : > { %1490 = vmatpush.msrb.mxu3 %v3159_v43  ;;  %1431 = vmatpush.msrb.mxu0 %v3162_v44 }
 0x30e   : > { %1451 = vmatpush.msrb.mxu1 %v3165_v45  ;;  %1471 = vmatpush.msrb.mxu2 %v3168_v46 }
 0x30f   : > { %1491 = vmatpush.msrb.mxu3 %v3171_v48  ;;  %1432 = vmatpush.msrb.mxu0 %v3174_v49 }
 0x310   : > { %1452 = vmatpush.msrb.mxu1 %v3177_v55  ;;  %1472 = vmatpush.msrb.mxu2 %v3180_v54 }
 0x311   : > { %1492 = vmatpush.msrb.mxu3 %v3183_v4  ;;  %1433 = vmatpush.msrb.mxu0 %v3186_v6 }
 0x312   : > { %1453 = vmatpush.msrb.mxu1 %v3189_v20  ;;  %1473 = vmatpush.msrb.mxu2 %v3192_v1 }
 0x313   : > { %1493 = vmatpush.msrb.mxu3 %v3195_v60  ;;  %1434 = vmatpush.msrb.mxu0 %v3198_v58 }
 0x314   : > { %1454 = vmatpush.msrb.mxu1 %v3201_v8  ;;  %1474 = vmatpush.msrb.mxu2 %v3204_v57 }
 0x315   : > { %1494 = vmatpush.msrb.mxu3 %v3207_v52  ;;  %1435 = vmatpush.msrb.mxu0 %v3210_v53 }
 0x316   : > { %1455 = vmatpush.msrb.mxu1 %v3213_v7  ;;  %1475 = vmatpush.msrb.mxu2 %v3216_v59 }
 0x317   : > { %1495 = vmatpush.msrb.mxu3 %v3219_v34  ;;  %1436 = vmatpush.msrb.mxu0 %v3222_v61 }
 0x318   : > { %1456 = vmatpush.msrb.mxu1 %v3225_v56  ;;  %1476 = vmatpush.msrb.mxu2 %v3228_v0 }
 0x319   : > { %1496 = vmatpush.msrb.mxu3 %v3231_v5  ;;  %1437 = vmatpush.msrb.mxu0 %v3234_v62 }
 0x31a   : > { %1457 = vmatpush.msrb.mxu1 %v3237_v2  ;;  %1477 = vmatpush.msrb.mxu2 %v3240_v63 }
 0x31b   : > { %1497 = vmatpush.msrb.mxu3 %v3243_v50  ;;  %1438 = vmatpush.msrb.mxu0 %v3246_v51 }
 0x31c   : > { %1458 = vmatpush.msrb.mxu1 %v4038_v3  ;;  %1478 = vmatpush.msrb.mxu2 %v4039_v11 }
 0x31d   : > { %1498 = vmatpush.msrb.mxu3 %v4040_v28  ;;  %1439 = vmatpush.msrb.mxu0 %v4041_v30 }
 0x31e   : > { %1459 = vmatpush.msrb.mxu1 %v4042_v26  ;;  %1479 = vmatpush.msrb.mxu2 %v4043_v22 }
 0x31f   : > { %1499 = vmatpush.msrb.mxu3 %v4044_v24  ;;  %1440 = vmatpush.msrb.mxu0 %v4045_v17 }
 0x320   : > { %1460 = vmatpush.msrb.mxu1 %v4046_v25  ;;  %1480 = vmatpush.msrb.mxu2 %v4047_v36 }
 0x321   : > { %1500 = vmatpush.msrb.mxu3 %v4048_v18  ;;  %1441 = vmatpush.msrb.mxu0 %v4049_v23 }
 0x322   : > { %1461 = vmatpush.msrb.mxu1 %v4050_v14  ;;  %1481 = vmatpush.msrb.mxu2 %v4051_v12  ;;  %v4066_v12 = vld [vmem:[#allocation48_spill] sm:$0xff] }
 0x323   : > { %1501 = vmatpush.msrb.mxu3 %v4052_v21  ;;  %1442 = vmatpush.msrb.mxu0 %v4053_v47  ;;  %v4064_v47 = vld [vmem:[#allocation35_spill] sm:$0xff] }
 0x324   : > { %1462 = vmatpush.msrb.mxu1 %v4054_v29  ;;  %1482 = vmatpush.msrb.mxu2 %v4055_v33  ;;  %v4065_v21 = vld [vmem:[#allocation47_spill] sm:$0xff] }
 0x325   : > { %1502 = vmatpush.msrb.mxu3 %v4056_v15  ;;  %1443 = vmatpush.msrb.mxu0 %v4057_v16 }
 0x326   : > { %1463 = vmatpush.msrb.mxu1 %v4058_v13  ;;  %1483 = vmatpush.msrb.mxu2 %v4059_v32 }
 0x327   : > { %1503 = vmatpush.msrb.mxu3 %v4060_v19  ;;  %1444 = vmatpush.msrb.mxu0 %v4061_v35  ;;  %v4067_v19 = vld [vmem:[#allocation50_spill] sm:$0xff] }
 0x328   : > { %1464 = vmatpush.msrb.mxu1 %v4062_v27  ;;  %1484 = vmatpush.msrb.mxu2 %v4063_v9 }
 0x329   : > { %1504 = vmatpush.msrb.mxu3 %v4064_v47 }
 0x384   : > { %v1152_v29 = vpop.f32.mrf.mxu0  ;;  %v1172_v33 = vpop.f32.mrf.mxu1 }
 0x385   : > { %v1215_v15 = vadd.f32 %v1152_v29, %v4065_v21  ;;  %v1216_v16 = vadd.f32 %v1172_v33, %v4066_v12  ;;  %v4068_v12 = vld [vmem:[#allocation49_spill] sm:$0xff] }
 0x387   : > { %v2088_v14 = vmul.f32 -1.442695, %v1215_v15  ;;  %v2089_v13 = vmul.f32 -1.442695, %v1216_v16 }
 0x389   : > { %2231 = vpow2.f32 %v2088_v14 }
 0x38a   : > { %2233 = vpow2.f32 %v2089_v13 }
 0x38b   : > { %v1212_v32 = vpop.f32.mrf.mxu3  ;;  %v1192_v36 = vpop.f32.mrf.mxu2 }
 0x38c   : > { %v1218_v23 = vadd.f32 %v1212_v32, %v4067_v19  ;;  %v1217_v33 = vadd.f32 %v1192_v36, %v4068_v12 }
 0x38e   : > { %v2090_v35 = vmul.f32 -1.442695, %v1218_v23 }
 0x38f   : > { %v2232_v18 = vpop.eup %2231 }
 0x390   : > { %v1222_v27 = vadd.f32 1.0, %v2232_v18  ;;  %2235 = vpow2.f32 %v2090_v35  ;;  %v2234_v9 = vpop.eup %2233 }
 0x391   : > { %v1241_v47 = vadd.f32 1.0, %v2234_v9 }
 0x392   : > { %2237 = vrcp.f32 %v1222_v27  ;;  %v1234_v32 = vand.u32 2147483648, %v1222_v27  ;;  %v1232_v19 = vand.u32 2147483647, %v1222_v27  ;;  %vm1228_vm2 = vweird.f32 %v1222_v27 }
 0x393   : > { %2239 = vrcp.f32 %v1241_v47  ;;  %v1253_v35 = vand.u32 2147483648, %v1241_v47  ;;  %v1251_v24 = vand.u32 2147483647, %v1241_v47  ;;  %vm1247_vm5 = vweird.f32 %v1241_v47 }
 0x394   : > { %v1235_v36 = vor.u32 1.1754944e-38, %v1234_v32  ;;  %vm1233_vm6 = vcmp.eq.f32.partialorder %v1232_v19, 8.507059e+37 }
 0x395   : > { %vm1252_vm8 = vcmp.eq.f32.partialorder %v1251_v24, 8.507059e+37 }
 0x396   : > { %v2236_v25 = vpop.eup %2235 }
 0x397   : > { %v1261_v21 = vadd.f32 1.0, %v2236_v25 }
 0x398   : > { %v2238_v29 = vpop.eup %2237 }
 0x399   : > { %v1224_v15 = vmul.f32 %v2238_v29, %v1222_v27  ;;  %2241 = vrcp.f32 %v1261_v21  ;;  %v2240_v14 = vpop.eup %2239  ;;  %vm1229_vm1 = vweird.f32 %v2238_v29  ;;  %vm1267_vm10 = vweird.f32 %v1261_v21 }
 0x39a   : > { %v1243_v13 = vmul.f32 %v2240_v14, %v1241_v47  ;;  %2243 = vtanh.f32 %v1217_v33  ;;  %vm1248_vm3 = vweird.f32 %v2240_v14  ;;  %vm1230_vm4 = vmor %vm1228_vm2, %vm1229_vm1  ;;  %v1254_v33 = vor.u32 1.1754944e-38, %v1253_v35 }
 0x39b   : > { %v1225_v16 = vsub.f32 1.0, %v1224_v15  ;;  %vm1249_vm7 = vmor %vm1247_vm5, %vm1248_vm3  ;;  %v1273_v47 = vand.u32 2147483648, %v1261_v21 }
 0x39c   : > { %v1244_v23 = vsub.f32 1.0, %v1243_v13 }
 0x39d   : > { %v1226_v18 = vmul.f32 %v2238_v29, %v1225_v16 }
 0x39e   : > { %v1245_v17 = vmul.f32 %v2240_v14, %v1244_v23 }
 0x39f   : > { %v2242_v9 = vpop.eup %2241  ;;  %v1227_v25 = vadd.f32 %v2238_v29, %v1226_v18 }
 0x3a0   : > { %v1263_v12 = vmul.f32 %v2242_v9, %v1261_v21  ;;  %v1246_v15 = vadd.f32 %v2240_v14, %v1245_v17  ;;  %v2244_v26 = vpop.eup %2243  ;;  %vm1268_vm9 = vweird.f32 %v2242_v9  ;;  %v1271_v17 = vand.u32 2147483647, %v1261_v21 }
 0x3a1   : > { %v1231_v22 = vsel %vm1230_vm4, %v2238_v29, %v1227_v25  ;;  %vm1269_vm11 = vmor %vm1267_vm10, %vm1268_vm9 }
 0x3a2   : > { %v1236_v16 = vsel %vm1233_vm6, %v1235_v36, %v1231_v22  ;;  %v1264_v13 = vsub.f32 1.0, %v1263_v12  ;;  %v1250_v30 = vsel %vm1249_vm7, %v2240_v14, %v1246_v15  ;;  %v1274_v22 = vor.u32 1.1754944e-38, %v1273_v47  ;;  %v4098_v15 = vld [vmem:[#allocation53_spill] sm:$0xff] }
 0x3a3   : > { %v1278_v27 = vmul.f32 %v2244_v26, %v1236_v16  ;;  %v1255_v28 = vsel %vm1252_vm8, %v1254_v33, %v1250_v30  ;;  %vm1272_vm12 = vcmp.eq.f32.partialorder %v1271_v17, 8.507059e+37 }
 0x3a4   : > { %v1265_v23 = vmul.f32 %v2242_v9, %v1264_v13  ;;  %v1277_v18 = vmul.f32 %v1255_v28, %v3408_v10  ;;  %v3487_v10 = vld [vmem:[%s3801_s4] ss:$0 sm:$0xff] }
 0x3a6   : > { %v3481_v11 = vadd.f32 %v1278_v27, %v1277_v18  ;;  %v1266_v32 = vadd.f32 %v2242_v9, %v1265_v23 }
 0x3a8   : > { %2245 = vtanh.f32 %v3481_v11  ;;  %v1270_v29 = vsel %vm1269_vm11, %v2242_v9, %v1266_v32 }
 0x3a9   : > { %v1275_v24 = vsel %vm1272_vm12, %v1274_v22, %v1270_v29 }
 0x3ae   : > { %v2246_v14 = vpop.eup %2245 }
 0x3af   : > { %v1281_v26 = vmul.f32 %v2246_v14, %v1275_v24 }
 0x3b1   : > { %1298 = vmatmul.f32.vlgmr.msra.gmra.mxu0 %v1281_v26  ;;  %1318 = vmatmul.f32.vlgmr.msra.gmra.mxu1 %v1281_v26  ;;  %v1731_v28 = vmul.f32 %v3487_v10, %v1281_v26 }
 0x3b2   : > { %1338 = vmatmul.f32.vlgmr.msra.gmra.mxu2 %v1281_v26  ;;  %1358 = vmatmul.f32.vlgmr.msra.gmra.mxu3 %v1281_v26 }
 0x3b3   : > { %1743 = vadd.xlane.f32.xlu2 %v1731_v28  ;;  %1576 = vmatpush.msra.mxu0 %v3138_v31  ;;  %v4069_v31 = vld [vmem:[#allocation9_spill] sm:$0xff] }
 0x3b4   : > { %1596 = vmatpush.msra.mxu1 %v3141_v37  ;;  %1616 = vmatpush.msra.mxu2 %v3144_v38  ;;  %v4070_v37 = vld [vmem:[#allocation11_spill] sm:$0xff]  ;;  %v4071_v38 = vld [vmem:[#allocation12_spill] sm:$0xff] }
 0x3b5   : > { %1636 = vmatpush.msra.mxu3 %v3147_v39  ;;  %1577 = vmatpush.msra.mxu0 %v3150_v40  ;;  %v4072_v39 = vld [vmem:[#allocation14_spill] sm:$0xff]  ;;  %v4073_v40 = vld [vmem:[#allocation13_spill] sm:$0xff] }
 0x3b6   : > { %1597 = vmatpush.msra.mxu1 %v3153_v41  ;;  %1617 = vmatpush.msra.mxu2 %v3156_v42  ;;  %v4074_v41 = vld [vmem:[#allocation15_spill] sm:$0xff]  ;;  %v4075_v42 = vld [vmem:[#allocation16_spill] sm:$0xff] }
 0x3b7   : > { %1637 = vmatpush.msra.mxu3 %v3159_v43  ;;  %1578 = vmatpush.msra.mxu0 %v3162_v44  ;;  %v4076_v43 = vld [vmem:[#allocation18_spill] sm:$0xff]  ;;  %v4077_v44 = vld [vmem:[#allocation17_spill] sm:$0xff] }
 0x3b8   : > { %1598 = vmatpush.msra.mxu1 %v3165_v45  ;;  %1618 = vmatpush.msra.mxu2 %v3168_v46  ;;  %v4078_v45 = vld [vmem:[#allocation19_spill] sm:$0xff]  ;;  %v4079_v46 = vld [vmem:[#allocation20_spill] sm:$0xff] }
 0x3b9   : > { %1638 = vmatpush.msra.mxu3 %v3171_v48  ;;  %1579 = vmatpush.msra.mxu0 %v3174_v49  ;;  %v4080_v48 = vld [vmem:[#allocation22_spill] sm:$0xff]  ;;  %v4081_v49 = vld [vmem:[#allocation21_spill] sm:$0xff] }
 0x3ba   : > { %1599 = vmatpush.msra.mxu1 %v3177_v55  ;;  %1619 = vmatpush.msra.mxu2 %v3180_v54  ;;  %v4082_v55 = vld [vmem:[#allocation23_spill] sm:$0xff]  ;;  %v4083_v54 = vld [vmem:[#allocation24_spill] sm:$0xff] }
 0x3bb   : > { %1639 = vmatpush.msra.mxu3 %v3183_v4  ;;  %1580 = vmatpush.msra.mxu0 %v3186_v6  ;;  %v4084_v4 = vld [vmem:[#allocation26_spill] sm:$0xff]  ;;  %v4085_v6 = vld [vmem:[#allocation25_spill] sm:$0xff] }
 0x3bc   : > { %1600 = vmatpush.msra.mxu1 %v3189_v20  ;;  %1620 = vmatpush.msra.mxu2 %v3192_v1  ;;  %v4086_v20 = vld [vmem:[#allocation27_spill] sm:$0xff]  ;;  %v4087_v1 = vld [vmem:[#allocation28_spill] sm:$0xff] }
 0x3bd   : > { %1640 = vmatpush.msra.mxu3 %v3195_v60  ;;  %1581 = vmatpush.msra.mxu0 %v3198_v58  ;;  %v4088_v60 = vld [vmem:[#allocation29_spill] sm:$0xff]  ;;  %v4089_v58 = vld [vmem:[#allocation30_spill] sm:$0xff] }
 0x3be   : > { %1601 = vmatpush.msra.mxu1 %v3201_v8  ;;  %1621 = vmatpush.msra.mxu2 %v3204_v57  ;;  %v4090_v8 = vld [vmem:[#allocation31_spill] sm:$0xff]  ;;  %v4091_v57 = vld [vmem:[#allocation32_spill] sm:$0xff] }
 0x3bf   : > { %1641 = vmatpush.msra.mxu3 %v3207_v52  ;;  %1582 = vmatpush.msra.mxu0 %v3210_v53  ;;  %v4092_v52 = vld [vmem:[#allocation33_spill] sm:$0xff]  ;;  %v4093_v53 = vld [vmem:[#allocation34_spill] sm:$0xff] }
 0x3c0   : > { %1602 = vmatpush.msra.mxu1 %v3213_v7  ;;  %1622 = vmatpush.msra.mxu2 %v3216_v59  ;;  %v4094_v7 = vld [vmem:[#allocation35_spill] sm:$0xff] }
 0x3c1   : > { %1642 = vmatpush.msra.mxu3 %v3219_v34  ;;  %1583 = vmatpush.msra.mxu0 %v3222_v61  ;;  %v4095_v61 = vld [vmem:[#allocation51_spill] sm:$0xff] }
 0x3c2   : > { %1603 = vmatpush.msra.mxu1 %v3225_v56  ;;  %1623 = vmatpush.msra.mxu2 %v3228_v0  ;;  %v4096_v0 = vld [vmem:[#allocation52_spill] sm:$0xff] }
 0x3c3   : > { %1643 = vmatpush.msra.mxu3 %v3231_v5  ;;  %1584 = vmatpush.msra.mxu0 %v3234_v62 }
 0x3c4   : > { %1604 = vmatpush.msra.mxu1 %v3237_v2  ;;  %1624 = vmatpush.msra.mxu2 %v3240_v63 }
 0x3c5   : > { %1644 = vmatpush.msra.mxu3 %v3243_v50  ;;  %1585 = vmatpush.msra.mxu0 %v3246_v51  ;;  %v4097_v50 = vld [vmem:[#allocation54_spill] sm:$0xff] }
 0x3c6   : > { %1605 = vmatpush.msra.mxu1 %v4038_v3  ;;  %1625 = vmatpush.msra.mxu2 %v4069_v31 }
 0x3c7   : > { %1645 = vmatpush.msra.mxu3 %v4070_v37  ;;  %1586 = vmatpush.msra.mxu0 %v4071_v38 }
 0x3c8   : > { %1606 = vmatpush.msra.mxu1 %v4072_v39  ;;  %1626 = vmatpush.msra.mxu2 %v4073_v40 }
 0x3c9   : > { %1646 = vmatpush.msra.mxu3 %v4074_v41  ;;  %1587 = vmatpush.msra.mxu0 %v4075_v42 }
 0x3ca   : > { %1607 = vmatpush.msra.mxu1 %v4076_v43  ;;  %1627 = vmatpush.msra.mxu2 %v4077_v44 }
 0x3cb   : > { %1647 = vmatpush.msra.mxu3 %v4078_v45  ;;  %1588 = vmatpush.msra.mxu0 %v4079_v46 }
 0x3cc   : > { %1608 = vmatpush.msra.mxu1 %v4080_v48  ;;  %1628 = vmatpush.msra.mxu2 %v4081_v49 }
 0x3cd   : > { %1648 = vmatpush.msra.mxu3 %v4082_v55  ;;  %1589 = vmatpush.msra.mxu0 %v4083_v54 }
 0x3ce   : > { %1609 = vmatpush.msra.mxu1 %v4084_v4  ;;  %1629 = vmatpush.msra.mxu2 %v4085_v6 }
 0x3cf   : > { %1649 = vmatpush.msra.mxu3 %v4086_v20  ;;  %1590 = vmatpush.msra.mxu0 %v4087_v1 }
 0x3d0   : > { %1610 = vmatpush.msra.mxu1 %v4088_v60  ;;  %1630 = vmatpush.msra.mxu2 %v4089_v58 }
 0x3d1   : > { %1650 = vmatpush.msra.mxu3 %v4090_v8  ;;  %1591 = vmatpush.msra.mxu0 %v4091_v57 }
 0x3d2   : > { %1611 = vmatpush.msra.mxu1 %v4092_v52  ;;  %1631 = vmatpush.msra.mxu2 %v4093_v53  ;;  %v4099_v52 = vld [vmem:[#allocation55_spill] sm:$0xff] }
 0x3d3   : > { %1651 = vmatpush.msra.mxu3 %v4094_v7  ;;  %v4100_v7 = vld [vmem:[#allocation56_spill] sm:$0xff] }
 0x42e   : > { %v1299_v59 = vpop.f32.mrf.mxu0  ;;  %v1319_v34 = vpop.f32.mrf.mxu1 }
 0x42f   : > { %v1362_v56 = vadd.f32 %v1299_v59, %v4095_v61  ;;  %v1363_v5 = vadd.f32 %v1319_v34, %v4096_v0  ;;  %v4101_v0 = vld [vmem:[#allocation58_spill] sm:$0xff] }
 0x431   : > { %v2091_v62 = vmul.f32 -1.442695, %v1362_v56  ;;  %v2092_v2 = vmul.f32 -1.442695, %v1363_v5 }
 0x433   : > { %2247 = vpow2.f32 %v2091_v62 }
 0x434   : > { %2249 = vpow2.f32 %v2092_v2 }
 0x435   : > { %v1359_v63 = vpop.f32.mrf.mxu3  ;;  %v1339_v9 = vpop.f32.mrf.mxu2 }
 0x436   : > { %v1365_v51 = vadd.f32 %v1359_v63, %v4097_v50  ;;  %v1364_v33 = vadd.f32 %v1339_v9, %v4098_v15 }
 0x438   : > { %v2093_v3 = vmul.f32 -1.442695, %v1365_v51 }
 0x439   : > { %v2248_v30 = vpop.eup %2247 }
 0x43a   : > { %v1369_v21 = vadd.f32 1.0, %v2248_v30  ;;  %2251 = vpow2.f32 %v2093_v3  ;;  %v2250_v19 = vpop.eup %2249 }
 0x43b   : > { %v1388_v35 = vadd.f32 1.0, %v2250_v19 }
 0x43c   : > { %2253 = vrcp.f32 %v1369_v21  ;;  %v1381_v18 = vand.u32 2147483648, %v1369_v21  ;;  %v1379_v17 = vand.u32 2147483647, %v1369_v21  ;;  %vm1375_vm14 = vweird.f32 %v1369_v21 }
 0x43d   : > { %2255 = vrcp.f32 %v1388_v35  ;;  %v1400_v29 = vand.u32 2147483648, %v1388_v35  ;;  %v1398_v26 = vand.u32 2147483647, %v1388_v35  ;;  %vm1394_vm1 = vweird.f32 %v1388_v35 }
 0x43e   : > { %v1382_v28 = vor.u32 1.1754944e-38, %v1381_v18  ;;  %vm1380_vm2 = vcmp.eq.f32.partialorder %v1379_v17, 8.507059e+37 }
 0x43f   : > { %v1401_v40 = vor.u32 1.1754944e-38, %v1400_v29  ;;  %vm1399_vm4 = vcmp.eq.f32.partialorder %v1398_v26, 8.507059e+37 }
 0x440   : > { %v2252_v25 = vpop.eup %2251 }
 0x441   : > { %v1408_v36 = vadd.f32 1.0, %v2252_v25 }
 0x442   : > { %v2254_v12 = vpop.eup %2253 }
 0x443   : > { %v1371_v16 = vmul.f32 %v2254_v12, %v1369_v21  ;;  %2257 = vrcp.f32 %v1408_v36  ;;  %v2256_v13 = vpop.eup %2255  ;;  %vm1376_vm13 = vweird.f32 %v2254_v12  ;;  %v1420_v54 = vand.u32 2147483648, %v1408_v36 }
 0x444   : > { %v1390_v23 = vmul.f32 %v2256_v13, %v1388_v35  ;;  %2259 = vtanh.f32 %v1364_v33  ;;  %vm1395_vm15 = vweird.f32 %v2256_v13  ;;  %vm1377_vm0 = vmor %vm1375_vm14, %vm1376_vm13  ;;  %vm1414_vm6 = vweird.f32 %v1408_v36  ;;  %v4102_v35 = vld [vmem:[#allocation57_spill] sm:$0xff] }
 0x445   : > { %v1372_v27 = vsub.f32 1.0, %v1371_v16  ;;  %vm1396_vm3 = vmor %vm1394_vm1, %vm1395_vm15  ;;  %v1418_v4 = vand.u32 2147483647, %v1408_v36  ;;  %v1421_v20 = vor.u32 1.1754944e-38, %v1420_v54 }
 0x446   : > { %v1391_v32 = vsub.f32 1.0, %v1390_v23 }
 0x447   : > { %v1373_v47 = vmul.f32 %v2254_v12, %v1372_v27  ;;  %vm1419_vm8 = vcmp.eq.f32.partialorder %v1418_v4, 8.507059e+37 }
 0x448   : > { %v1392_v14 = vmul.f32 %v2256_v13, %v1391_v32 }
 0x449   : > { %v2258_v22 = vpop.eup %2257  ;;  %v1374_v24 = vadd.f32 %v2254_v12, %v1373_v47 }
 0x44a   : > { %v1410_v31 = vmul.f32 %v2258_v22, %v1408_v36  ;;  %v1393_v38 = vadd.f32 %v2256_v13, %v1392_v14  ;;  %v2260_v39 = vpop.eup %2259  ;;  %vm1415_vm5 = vweird.f32 %v2258_v22 }
 0x44b   : > { %v1378_v37 = vsel %vm1377_vm0, %v2254_v12, %v1374_v24  ;;  %vm1416_vm7 = vmor %vm1414_vm6, %vm1415_vm5 }
 0x44c   : > { %v1383_v41 = vsel %vm1380_vm2, %v1382_v28, %v1378_v37  ;;  %v1411_v42 = vsub.f32 1.0, %v1410_v31  ;;  %v1397_v43 = vsel %vm1396_vm3, %v2256_v13, %v1393_v38 }
 0x44d   : > { %v1425_v44 = vmul.f32 %v2260_v39, %v1383_v41  ;;  %v1402_v45 = vsel %vm1399_vm4, %v1401_v40, %v1397_v43 }
 0x44e   : > { %v1412_v46 = vmul.f32 %v2258_v22, %v1411_v42  ;;  %v1424_v48 = vmul.f32 %v1402_v45, %v3481_v11 }
 0x450   : > { %v3559_v49 = vadd.f32 %v1425_v44, %v1424_v48  ;;  %v1413_v55 = vadd.f32 %v2258_v22, %v1412_v46 }
 0x452   : > { %2261 = vtanh.f32 %v3559_v49  ;;  %v1417_v6 = vsel %vm1416_vm7, %v2258_v22, %v1413_v55 }
 0x453   : > { %v1422_v60 = vsel %vm1419_vm8, %v1421_v20, %v1417_v6 }
 0x458   : > { %v2262_v1 = vpop.eup %2261 }
 0x459   : > { %v1428_v58 = vmul.f32 %v2262_v1, %v1422_v60  ;;  %v4103_v60 = vld [vmem:[#allocation59_spill] sm:$0xff] }
 0x45b   : > { %1445 = vmatmul.f32.vlgmr.msrb.gmra.mxu0 %v1428_v58  ;;  %1465 = vmatmul.f32.vlgmr.msrb.gmra.mxu1 %v1428_v58  ;;  %v1732_v11 = vmul.f32 %v3487_v10, %v1428_v58 }
 0x45c   : > { %1485 = vmatmul.f32.vlgmr.msrb.gmra.mxu2 %v1428_v58  ;;  %1505 = vmatmul.f32.vlgmr.msrb.gmra.mxu3 %v1428_v58 }
 0x45d   : > { %1745 = vadd.xlane.f32.xlu2 %v1732_v11  ;;  %v4104_v11 = vld [vmem:[#allocation60_spill] sm:$0xff] }
 0x4d8   : > { %v1446_v8 = vpop.f32.mrf.mxu0  ;;  %v1466_v57 = vpop.f32.mrf.mxu1 }
 0x4d9   : > { %v1509_v53 = vadd.f32 %v1446_v8, %v4099_v52  ;;  %v1510_v59 = vadd.f32 %v1466_v57, %v4100_v7  ;;  %v4105_v7 = vld [vmem:[#allocation62_spill] sm:$0xff] }
 0x4db   : > { %v2094_v34 = vmul.f32 -1.442695, %v1509_v53  ;;  %v2095_v61 = vmul.f32 -1.442695, %v1510_v59 }
 0x4dd   : > { %2263 = vpow2.f32 %v2094_v34 }
 0x4de   : > { %2265 = vpow2.f32 %v2095_v61 }
 0x4df   : > { %v1506_v56 = vpop.f32.mrf.mxu3  ;;  %v1486_v3 = vpop.f32.mrf.mxu2 }
 0x4e0   : > { %v1512_v5 = vadd.f32 %v1506_v56, %v4101_v0  ;;  %v1511_v9 = vadd.f32 %v1486_v3, %v4102_v35 }
 0x4e2   : > { %v2096_v62 = vmul.f32 -1.442695, %v1512_v5 }
 0x4e3   : > { %v2264_v2 = vpop.eup %2263 }
 0x4e4   : > { %v1516_v63 = vadd.f32 1.0, %v2264_v2  ;;  %2267 = vpow2.f32 %v2096_v62  ;;  %v2266_v50 = vpop.eup %2265 }
 0x4e5   : > { %v1535_v51 = vadd.f32 1.0, %v2266_v50 }
 0x4e6   : > { %2269 = vrcp.f32 %v1516_v63  ;;  %v1528_v33 = vand.u32 2147483648, %v1516_v63  ;;  %v1526_v27 = vand.u32 2147483647, %v1516_v63  ;;  %vm1522_vm10 = vweird.f32 %v1516_v63 }
 0x4e7   : > { %2271 = vrcp.f32 %v1535_v51  ;;  %v1547_v23 = vand.u32 2147483648, %v1535_v51  ;;  %v1545_v17 = vand.u32 2147483647, %v1535_v51  ;;  %vm1541_vm13 = vweird.f32 %v1535_v51 }
 0x4e8   : > { %v1529_v29 = vor.u32 1.1754944e-38, %v1528_v33  ;;  %vm1527_vm14 = vcmp.eq.f32.partialorder %v1526_v27, 8.507059e+37 }
 0x4e9   : > { %v1548_v28 = vor.u32 1.1754944e-38, %v1547_v23  ;;  %vm1546_vm0 = vcmp.eq.f32.partialorder %v1545_v17, 8.507059e+37 }
 0x4ea   : > { %v2268_v30 = vpop.eup %2267 }
 0x4eb   : > { %v1555_v21 = vadd.f32 1.0, %v2268_v30 }
 0x4ec   : > { %v2270_v19 = vpop.eup %2269 }
 0x4ed   : > { %v1518_v25 = vmul.f32 %v2270_v19, %v1516_v63  ;;  %2273 = vrcp.f32 %v1555_v21  ;;  %v2272_v36 = vpop.eup %2271  ;;  %vm1523_vm9 = vweird.f32 %v2270_v19  ;;  %v1567_v45 = vand.u32 2147483648, %v1555_v21 }
 0x4ee   : > { %v1537_v15 = vmul.f32 %v2272_v36, %v1535_v51  ;;  %2275 = vtanh.f32 %v1511_v9  ;;  %vm1542_vm11 = vweird.f32 %v2272_v36  ;;  %vm1524_vm12 = vmor %vm1522_vm10, %vm1523_vm9  ;;  %vm1561_vm2 = vweird.f32 %v1555_v21  ;;  %v4106_v51 = vld [vmem:[#allocation61_spill] sm:$0xff] }
 0x4ef   : > { %v1519_v12 = vsub.f32 1.0, %v1518_v25  ;;  %vm1543_vm15 = vmor %vm1541_vm13, %vm1542_vm11  ;;  %v1565_v46 = vand.u32 2147483647, %v1555_v21  ;;  %v1568_v55 = vor.u32 1.1754944e-38, %v1567_v45 }
 0x4f0   : > { %v1538_v16 = vsub.f32 1.0, %v1537_v15 }
 0x4f1   : > { %v1520_v13 = vmul.f32 %v2270_v19, %v1519_v12  ;;  %vm1566_vm4 = vcmp.eq.f32.partialorder %v1565_v46, 8.507059e+37 }
 0x4f2   : > { %v1539_v32 = vmul.f32 %v2272_v36, %v1538_v16 }
 0x4f3   : > { %v2274_v18 = vpop.eup %2273  ;;  %v1521_v47 = vadd.f32 %v2270_v19, %v1520_v13 }
 0x4f4   : > { %v1557_v22 = vmul.f32 %v2274_v18, %v1555_v21  ;;  %v1540_v24 = vadd.f32 %v2272_v36, %v1539_v32  ;;  %v2276_v26 = vpop.eup %2275  ;;  %vm1562_vm1 = vweird.f32 %v2274_v18 }
 0x4f5   : > { %v1525_v14 = vsel %vm1524_vm12, %v2270_v19, %v1521_v47  ;;  %vm1563_vm3 = vmor %vm1561_vm2, %vm1562_vm1 }
 0x4f6   : > { %v1530_v31 = vsel %vm1527_vm14, %v1529_v29, %v1525_v14  ;;  %v1558_v37 = vsub.f32 1.0, %v1557_v22  ;;  %v1544_v38 = vsel %vm1543_vm15, %v2272_v36, %v1540_v24 }
 0x4f7   : > { %v1572_v39 = vmul.f32 %v2276_v26, %v1530_v31  ;;  %v1549_v40 = vsel %vm1546_vm0, %v1548_v28, %v1544_v38 }
 0x4f8   : > { %v1559_v41 = vmul.f32 %v2274_v18, %v1558_v37  ;;  %v1571_v42 = vmul.f32 %v1549_v40, %v3559_v49 }
 0x4fa   : > { %v3568_v43 = vadd.f32 %v1572_v39, %v1571_v42  ;;  %v1560_v44 = vadd.f32 %v2274_v18, %v1559_v41 }
 0x4fc   : > { %2277 = vtanh.f32 %v3568_v43  ;;  %v1564_v48 = vsel %vm1563_vm3, %v2274_v18, %v1560_v44 }
 0x4fd   : > { %v1569_v4 = vsel %vm1566_vm4, %v1568_v55, %v1564_v48 }
 0x502   : > { %v2278_v54 = vpop.eup %2277 }
 0x503   : > { %v1575_v6 = vmul.f32 %v2278_v54, %v1569_v4  ;;  %v1736_v54 = vpop.xlane.xlu0 %1735 }
 0x505   : > { %1592 = vmatmul.f32.vlgmr.msra.gmra.mxu0 %v1575_v6  ;;  %1612 = vmatmul.f32.vlgmr.msra.gmra.mxu1 %v1575_v6  ;;  %v1733_v49 = vmul.f32 %v3487_v10, %v1575_v6 }
 0x506   : > { %1632 = vmatmul.f32.vlgmr.msra.gmra.mxu2 %v1575_v6  ;;  %1652 = vmatmul.f32.vlgmr.msra.gmra.mxu3 %v1575_v6 }
 0x507   : > { %1747 = vadd.xlane.f32.xlu0 %v1733_v49  ;;  %v1740_v49 = vpop.xlane.xlu1 %1739 }
 0x50b   : > { %v1738_v4 = vpop.xlane.xlu0 %1737 }
 0x582   : > { %v1593_v20 = vpop.f32.mrf.mxu0  ;;  %v1613_v1 = vpop.f32.mrf.mxu1 }
 0x583   : > { %v1656_v58 = vadd.f32 %v1593_v20, %v4103_v60  ;;  %v1657_v8 = vadd.f32 %v1613_v1, %v4104_v11 }
 0x585   : > { %v2097_v57 = vmul.f32 -1.442695, %v1656_v58  ;;  %v2098_v52 = vmul.f32 -1.442695, %v1657_v8  ;;  %v1744_v58 = vpop.xlane.xlu2 %1743  ;;  %v1742_v8 = vpop.xlane.xlu1 %1741 }
 0x587   : > { %2279 = vpow2.f32 %v2097_v57 }
 0x588   : > { %2281 = vpow2.f32 %v2098_v52 }
 0x589   : > { %v1653_v53 = vpop.f32.mrf.mxu3  ;;  %v1633_v62 = vpop.f32.mrf.mxu2 }
 0x58a   : > { %v1659_v59 = vadd.f32 %v1653_v53, %v4105_v7  ;;  %v1658_v3 = vadd.f32 %v1633_v62, %v4106_v51  ;;  %v1748_v7 = vpop.xlane.xlu0 %1747 }
 0x58c   : > { %v2099_v34 = vmul.f32 -1.442695, %v1659_v59 }
 0x58d   : > { %v2280_v61 = vpop.eup %2279  ;;  %v1746_v52 = vpop.xlane.xlu2 %1745 }
 0x58e   : > { %v1663_v56 = vadd.f32 1.0, %v2280_v61  ;;  %2283 = vpow2.f32 %v2099_v34  ;;  %v2282_v0 = vpop.eup %2281 }
 0x58f   : > { %v1682_v5 = vadd.f32 1.0, %v2282_v0 }
 0x590   : > { %2285 = vrcp.f32 %v1663_v56  ;;  %v1675_v9 = vand.u32 2147483648, %v1663_v56  ;;  %v1673_v12 = vand.u32 2147483647, %v1663_v56  ;;  %vm1669_vm6 = vweird.f32 %v1663_v56 }
 0x591   : > { %2287 = vrcp.f32 %v1682_v5  ;;  %v1694_v15 = vand.u32 2147483648, %v1682_v5  ;;  %v1692_v27 = vand.u32 2147483647, %v1682_v5  ;;  %vm1688_vm9 = vweird.f32 %v1682_v5 }
 0x592   : > { %v1676_v23 = vor.u32 1.1754944e-38, %v1675_v9  ;;  %vm1674_vm10 = vcmp.eq.f32.partialorder %v1673_v12, 8.507059e+37 }
 0x593   : > { %v1695_v29 = vor.u32 1.1754944e-38, %v1694_v15  ;;  %vm1693_vm12 = vcmp.eq.f32.partialorder %v1692_v27, 8.507059e+37 }
 0x594   : > { %v2284_v2 = vpop.eup %2283 }
 0x595   : > { %v1702_v63 = vadd.f32 1.0, %v2284_v2 }
 0x596   : > { %v2286_v50 = vpop.eup %2285 }
 0x597   : > { %v1665_v30 = vmul.f32 %v2286_v50, %v1663_v56  ;;  %2289 = vrcp.f32 %v1702_v63  ;;  %v2288_v21 = vpop.eup %2287  ;;  %vm1670_vm5 = vweird.f32 %v2286_v50  ;;  %v1714_v40 = vand.u32 2147483648, %v1702_v63 }
 0x598   : > { %v1684_v35 = vmul.f32 %v2288_v21, %v1682_v5  ;;  %2291 = vtanh.f32 %v1658_v3  ;;  %vm1689_vm7 = vweird.f32 %v2288_v21  ;;  %vm1671_vm8 = vmor %vm1669_vm6, %vm1670_vm5  ;;  %vm1708_vm14 = vweird.f32 %v1702_v63 }
 0x599   : > { %v1666_v19 = vsub.f32 1.0, %v1665_v30  ;;  %vm1690_vm11 = vmor %vm1688_vm9, %vm1689_vm7  ;;  %v1712_v41 = vand.u32 2147483647, %v1702_v63  ;;  %v1715_v44 = vor.u32 1.1754944e-38, %v1714_v40 }
 0x59a   : > { %v1685_v25 = vsub.f32 1.0, %v1684_v35 }
 0x59b   : > { %v1667_v36 = vmul.f32 %v2286_v50, %v1666_v19  ;;  %vm1713_vm0 = vcmp.eq.f32.partialorder %v1712_v41, 8.507059e+37 }
 0x59c   : > { %v1686_v16 = vmul.f32 %v2288_v21, %v1685_v25 }
 0x59d   : > { %v2290_v33 = vpop.eup %2289  ;;  %v1668_v13 = vadd.f32 %v2286_v50, %v1667_v36 }
 0x59e   : > { %v1704_v18 = vmul.f32 %v2290_v33, %v1702_v63  ;;  %v1687_v47 = vadd.f32 %v2288_v21, %v1686_v16  ;;  %v2292_v17 = vpop.eup %2291  ;;  %vm1709_vm13 = vweird.f32 %v2290_v33 }
 0x59f   : > { %v1672_v32 = vsel %vm1671_vm8, %v2286_v50, %v1668_v13  ;;  %vm1710_vm15 = vmor %vm1708_vm14, %vm1709_vm13 }
 0x5a0   : > { %v1677_v22 = vsel %vm1674_vm10, %v1676_v23, %v1672_v32  ;;  %v1705_v14 = vsub.f32 1.0, %v1704_v18  ;;  %v1691_v24 = vsel %vm1690_vm11, %v2288_v21, %v1687_v47 }
 0x5a1   : > { %v1719_v26 = vmul.f32 %v2292_v17, %v1677_v22  ;;  %v1696_v28 = vsel %vm1693_vm12, %v1695_v29, %v1691_v24 }
 0x5a2   : > { %v1706_v31 = vmul.f32 %v2290_v33, %v1705_v14  ;;  %v1718_v37 = vmul.f32 %v1696_v28, %v3568_v43  ;;  %v3578_v43 = vstv %s1751_s12 }
 0x5a3   : > { %v1753_v6 = vadd.f32 %v3578_v43, %v1736_v54  ;;  %v1754_v20 = vadd.f32 %v3578_v43, %v1738_v4  ;;  %v1755_v11 = vadd.f32 %v3578_v43, %v1740_v49  ;;  %v1756_v57 = vadd.f32 %v3578_v43, %v1742_v8 }
 0x5a4   : > { %v1720_v38 = vadd.f32 %v1719_v26, %v1718_v37  ;;  %v1707_v39 = vadd.f32 %v2290_v33, %v1706_v31  ;;  %v1757_v61 = vadd.f32 %v3578_v43, %v1744_v58  ;;  %v1758_v56 = vadd.f32 %v3578_v43, %v1746_v52 }
 0x5a5   : > { %v2100_v1 = vmul.f32 -1.442695, %v1753_v6  ;;  %v2101_v60 = vmul.f32 -1.442695, %v1754_v20  ;;  %v2103_v34 = vmul.f32 -1.442695, %v1756_v57  ;;  %v1759_v5 = vadd.f32 %v3578_v43, %v1748_v7 }
 0x5a6   : > { %2293 = vtanh.f32 %v1720_v38  ;;  %v1711_v42 = vsel %vm1710_vm15, %v2290_v33, %v1707_v39  ;;  %v2104_v2 = vmul.f32 -1.442695, %v1757_v61  ;;  %v2105_v50 = vmul.f32 -1.442695, %v1758_v56 }
 0x5a7   : > { %v1716_v46 = vsel %vm1713_vm0, %v1715_v44, %v1711_v42  ;;  %2295 = vpow2.f32 %v2100_v1  ;;  %v2106_v51 = vmul.f32 -1.442695, %v1759_v5  ;;  %v1921_v37 = vlaneseq }
 0x5a8   : > { %2297 = vpow2.f32 %v2101_v60  ;;  %vm1931_vm0 = vcmask 1041409  }
 0x5ac   : > { %v2294_v45 = vpop.eup %2293 }
 0x5ad   : > { %v1722_v48 = vmul.f32 %v2294_v45, %v1716_v46  ;;  %v2296_v53 = vpop.eup %2295 }
 0x5ae   : > { %v2298_v59 = vpop.eup %2297  ;;  %v3586_v0 = vadd.f32 1.0, %v2296_v53 }
 0x5af   : > { %v1734_v55 = vmul.f32 %v3487_v10, %v1722_v48  ;;  %v2102_v10 = vmul.f32 -1.442695, %v1755_v11  ;;  %v3589_v62 = vadd.f32 1.0, %v2298_v59 }
 0x5b0   : > { %v1802_v38 = vand.u32 2147483647, %v3586_v0  ;;  %v1804_v39 = vand.u32 2147483648, %v3586_v0  ;;  %vm1798_vm3 = vweird.f32 %v3586_v0 }
 0x5b1   : > { %1749 = vadd.xlane.f32.xlu1 %v1734_v55  ;;  %2299 = vpow2.f32 %v2102_v10  ;;  %v1819_v55 = vand.u32 2147483648, %v3589_v62  ;;  %vm1813_vm5 = vweird.f32 %v3589_v62  ;;  %v1817_v6 = vand.u32 2147483647, %v3589_v62 }
 0x5b2   : > { %2301 = vpow2.f32 %v2103_v34  ;;  %vm1803_vm6 = vcmp.eq.f32.partialorder %v1802_v38, 8.507059e+37  ;;  %v1805_v58 = vor.u32 1.1754944e-38, %v1804_v39 }
 0x5b3   : > { %2303 = vrcp.f32 %v3586_v0  ;;  %v1820_v57 = vor.u32 1.1754944e-38, %v1819_v55  ;;  %vm1818_vm10 = vcmp.eq.f32.partialorder %v1817_v6, 8.507059e+37 }
 0x5b4   : > { %2305 = vrcp.f32 %v3589_v62 }
 0x5b5   : > { %2307 = vpow2.f32 %v2104_v2 }
 0x5b6   : > { %2309 = vpow2.f32 %v2105_v50 }
 0x5b7   : > { %v2300_v63 = vpop.eup %2299  ;;  %2311 = vpow2.f32 %v2106_v51 }
 0x5b8   : > { %v3593_v3 = vadd.f32 1.0, %v2300_v63  ;;  %v2302_v30 = vpop.eup %2301 }
 0x5b9   : > { %v3595_v21 = vpop.eup %2303  ;;  %v3600_v35 = vadd.f32 1.0, %v2302_v30 }
 0x5ba   : > { %2313 = vrcp.f32 %v3593_v3  ;;  %v3598_v19 = vpop.eup %2305  ;;  %v1794_v12 = vmul.f32 %v3595_v21, %v3586_v0  ;;  %vm1799_vm1 = vweird.f32 %v3595_v21  ;;  %vm1828_vm9 = vweird.f32 %v3593_v3 }
 0x5bb   : > { %v2308_v9 = vpop.eup %2307  ;;  %2315 = vrcp.f32 %v3600_v35  ;;  %v1809_v16 = vmul.f32 %v3598_v19, %v3589_v62  ;;  %vm1814_vm2 = vweird.f32 %v3598_v19  ;;  %vm3648_vm4 = vmor %vm1798_vm3, %vm1799_vm1  ;;  %v1834_v52 = vand.u32 2147483648, %v3593_v3 }
 0x5bc   : > { %v2310_v25 = vpop.eup %2309  ;;  %v3605_v15 = vadd.f32 1.0, %v2308_v9  ;;  %v1795_v23 = vsub.f32 1.0, %v1794_v12  ;;  %vm3659_vm7 = vmor %vm1813_vm5, %vm1814_vm2  ;;  %v1832_v34 = vand.u32 2147483647, %v3593_v3  ;;  %vm1843_vm14 = vweird.f32 %v3600_v35 }
 0x5bd   : > { %v2312_v36 = vpop.eup %2311  ;;  %v3611_v13 = vadd.f32 1.0, %v2310_v25  ;;  %v1810_v32 = vsub.f32 1.0, %v1809_v16  ;;  %v1835_v51 = vor.u32 1.1754944e-38, %v1834_v52  ;;  %v1849_v25 = vand.u32 2147483648, %v3600_v35 }
 0x5be   : > { %v3613_v27 = vadd.f32 1.0, %v2312_v36  ;;  %2317 = vrcp.f32 %v3605_v15  ;;  %v1796_v17 = vmul.f32 %v3595_v21, %v1795_v23  ;;  %vm1833_vm13 = vcmp.eq.f32.partialorder %v1832_v34, 8.507059e+37 }
 0x5bf   : > { %2319 = vrcp.f32 %v3611_v13  ;;  %v1811_v22 = vmul.f32 %v3598_v19, %v1810_v32  ;;  %v1847_v12 = vand.u32 2147483647, %v3600_v35  ;;  %vm1858_vm2 = vweird.f32 %v3605_v15 }
 0x5c0   : > { %v3607_v33 = vpop.eup %2313  ;;  %2321 = vrcp.f32 %v3613_v27  ;;  %v1797_v41 = vadd.f32 %v3595_v21, %v1796_v17  ;;  %v1864_v16 = vand.u32 2147483648, %v3605_v15  ;;  %v1879_v32 = vand.u32 2147483648, %v3611_v13 }
 0x5c1   : > { %v1824_v18 = vmul.f32 %v3607_v33, %v3593_v3  ;;  %v3619_v47 = vpop.eup %2315  ;;  %v1812_v45 = vadd.f32 %v3598_v19, %v1811_v22  ;;  %vm1829_vm8 = vweird.f32 %v3607_v33  ;;  %v1894_v22 = vand.u32 2147483648, %v3613_v27 }
 0x5c2   : > { %v1839_v14 = vmul.f32 %v3619_v47, %v3600_v35  ;;  %v1801_v20 = vsel %vm3648_vm4, %v3595_v21, %v1797_v41  ;;  %vm3673_vm11 = vmor %vm1828_vm9, %vm1829_vm8  ;;  %vm1844_vm12 = vweird.f32 %v3619_v47  ;;  %vm1933_vm4 = vcmask 1042434  }
 0x5c3   : > { %v1825_v29 = vsub.f32 1.0, %v1824_v18  ;;  %v1816_v11 = vsel %vm3659_vm7, %v3598_v19, %v1812_v45  ;;  %v3671_v7 = vsel %vm1803_vm6, %v1805_v58, %v1801_v20  ;;  %vm3698_vm15 = vmor %vm1843_vm14, %vm1844_vm12  ;;  %v1862_v18 = vand.u32 2147483647, %v3605_v15 }
 0x5c4   : > { %v3626_v26 = vpop.eup %2317  ;;  %v1840_v46 = vsub.f32 1.0, %v1839_v14  ;;  %v3678_v0 = vsel %vm1818_vm10, %v1820_v57, %v1816_v11  ;;  %vm1873_vm7 = vweird.f32 %v3611_v13  ;;  %vm1848_vm8 = vcmp.eq.f32.partialorder %v1847_v12, 8.507059e+37 }
 0x5c5   : > { %v3629_v31 = vpop.eup %2319  ;;  %v1826_v42 = vmul.f32 %v3607_v33, %v1825_v29  ;;  %v1854_v48 = vmul.f32 %v3626_v26, %v3605_v15  ;;  %vm1859_vm1 = vweird.f32 %v3626_v26  ;;  %v1877_v29 = vand.u32 2147483647, %v3611_v13 }
 0x5c6   : > { %v3633_v40 = vpop.eup %2321  ;;  %v1869_v54 = vmul.f32 %v3629_v31, %v3611_v13  ;;  %v1841_v8 = vmul.f32 %v3619_v47, %v1840_v46  ;;  %vm1874_vm3 = vweird.f32 %v3629_v31  ;;  %vm3717_vm6 = vmor %vm1858_vm2, %vm1859_vm1  ;;  %vm1888_vm10 = vweird.f32 %v3613_v27 }
 0x5c7   : > { %v1884_v49 = vmul.f32 %v3633_v40, %v3613_v27  ;;  %v1827_v60 = vadd.f32 %v3607_v33, %v1826_v42  ;;  %v1855_v10 = vsub.f32 1.0, %v1854_v48  ;;  %vm1889_vm5 = vweird.f32 %v3633_v40  ;;  %vm3727_vm9 = vmor %vm1873_vm7, %vm1874_vm3 }
 0x5c8   : > { %v1870_v53 = vsub.f32 1.0, %v1869_v54  ;;  %v1842_v62 = vadd.f32 %v3619_v47, %v1841_v8  ;;  %vm1863_vm12 = vcmp.eq.f32.partialorder %v1862_v18, 8.507059e+37  ;;  %vm1935_vm1 = vcmask 1043459  }
 0x5c9   : > { %v1885_v61 = vsub.f32 1.0, %v1884_v49  ;;  %v1831_v5 = vsel %vm3673_vm11, %v3607_v33, %v1827_v60  ;;  %v1856_v2 = vmul.f32 %v3626_v26, %v1855_v10  ;;  %vm3739_vm11 = vmor %vm1888_vm10, %vm1889_vm5  ;;  %vm1937_vm3 = vcmask 1044484  }
 0x5ca   : > { %v1871_v3 = vmul.f32 %v3629_v31, %v1870_v53  ;;  %v3696_v19 = vsel %vm1833_vm13, %v1835_v51, %v1831_v5  ;;  %v1846_v36 = vsel %vm3698_vm15, %v3619_v47, %v1842_v62  ;;  %v1850_v47 = vor.u32 1.1754944e-38, %v1849_v25 }
 0x5cb   : > { %v1886_v30 = vmul.f32 %v3633_v40, %v1885_v61  ;;  %v1857_v33 = vadd.f32 %v3626_v26, %v1856_v2  ;;  %vm1878_vm13 = vcmp.eq.f32.partialorder %v1877_v29, 8.507059e+37  ;;  %vm1941_vm7 = vcmask 1046534  }
 0x5cc   : > { %v1872_v23 = vadd.f32 %v3629_v31, %v1871_v3  ;;  %v1851_v13 = vsel %vm1848_vm8, %v1850_v47, %v1846_v36  ;;  %vm1943_vm8 = vcmask 1047559  }
 0x5cd   : > { %v1887_v35 = vadd.f32 %v3633_v40, %v1886_v30  ;;  %v1861_v15 = vsel %vm3717_vm6, %v3626_v26, %v1857_v33  ;;  %vm1939_vm6 = vcmask 1045509  }
 0x5ce   : > { %v1876_v38 = vsel %vm3727_vm9, %v3629_v31, %v1872_v23  ;;  %v1895_v31 = vor.u32 1.1754944e-38, %v1894_v22  ;;  %vm1946_vm9 = vcmask 64512  }
 0x5cf   : > { %v1891_v42 = vsel %vm3739_vm11, %v3633_v40, %v1887_v35 }
 0x624   : > { %v1750_v24 = vpop.xlane.xlu1 %1749 }
 0x625   : > { %v1760_v28 = vadd.f32 %v3578_v43, %v1750_v24  ;;  %v3646_v43 = vand.u32 127, %v1921_v37  ;;  %v1865_v37 = vor.u32 1.1754944e-38, %v1864_v16 }
 0x627   : > { %v2107_v44 = vmul.f32 -1.442695, %v1760_v28  ;;  %v1923_v50 = vperm.slane %v3671_v7, %v3646_v43  ;;  %v1924_v21 = vperm.slane %v3678_v0, %v3646_v43  ;;  %v1892_v28 = vand.u32 2147483647, %v3613_v27 }
 0x628   : > { %v1925_v41 = vperm.slane %v3696_v19, %v3646_v43  ;;  %v1880_v27 = vor.u32 1.1754944e-38, %v1879_v32  ;;  %v1926_v46 = vperm.slane %v1851_v13, %v3646_v43 }
 0x629   : > { %2323 = vpow2.f32 %v2107_v44  ;;  %v1866_v44 = vsel %vm1863_vm12, %v1865_v37, %v1861_v15  ;;  %vm1893_vm14 = vcmp.eq.f32.partialorder %v1892_v28, 8.507059e+37  ;;  %v1932_v49 = vsel %vm1931_vm0, %v1924_v21, %v1923_v50 }
 0x62a   : > { %v1881_v48 = vsel %vm1878_vm13, %v1880_v27, %v1876_v38  ;;  %v1896_v6 = vsel %vm1893_vm14, %v1895_v31, %v1891_v42  ;;  %v1927_v40 = vperm.slane %v1866_v44, %v3646_v43  ;;  %v1934_v11 = vsel %vm1933_vm4, %v1925_v41, %v1932_v49 }
 0x62b   : > { %v1928_v1 = vperm.slane %v1881_v48, %v3646_v43  ;;  %v1929_v58 = vperm.slane %v1896_v6, %v3646_v43  ;;  %v1936_v10 = vsel %vm1935_vm1, %v1926_v46, %v1934_v11 }
 0x62c   : > { %v1938_v52 = vsel %vm1937_vm3, %v1927_v40, %v1936_v10 }
 0x62d   : > { %v1940_v7 = vsel %vm1939_vm6, %v1928_v1, %v1938_v52 }
 0x62e   : > { %v1942_v59 = vsel %vm1941_vm7, %v1929_v58, %v1940_v7 }
 0x62f   : > { %v2324_v56 = vpop.eup %2323 }
 0x630   : > { %v3686_v63 = vadd.f32 1.0, %v2324_v56 }
 0x632   : > { %2325 = vrcp.f32 %v3686_v63  ;;  %v1909_v55 = vand.u32 2147483648, %v3686_v63  ;;  %v1907_v4 = vand.u32 2147483647, %v3686_v63  ;;  %vm1903_vm2 = vweird.f32 %v3686_v63 }
 0x634   : > { %v1910_v60 = vor.u32 1.1754944e-38, %v1909_v55  ;;  %vm1908_vm0 = vcmp.eq.f32.partialorder %v1907_v4, 8.507059e+37 }
 0x638   : > { %v2326_v14 = vpop.eup %2325 }
 0x639   : > { %v1899_v39 = vmul.f32 %v2326_v14, %v3686_v63  ;;  %vm1904_vm15 = vweird.f32 %v2326_v14 }
 0x63a   : > { %vm1905_vm5 = vmor %vm1903_vm2, %vm1904_vm15 }
 0x63b   : > { %v1900_v45 = vsub.f32 1.0, %v1899_v39 }
 0x63d   : > { %v1901_v54 = vmul.f32 %v2326_v14, %v1900_v45 }
 0x63f   : > { %v1902_v20 = vadd.f32 %v2326_v14, %v1901_v54 }
 0x641   : > { %v1906_v8 = vsel %vm1905_vm5, %v2326_v14, %v1902_v20 }
 0x642   : > { %v1911_v57 = vsel %vm1908_vm0, %v1910_v60, %v1906_v8 }
 0x643   : > { %v1930_v53 = vperm.slane %v1911_v57, %v3646_v43 }
 0x645   : > { %v1944_v34 = vsel %vm1943_vm8, %v1930_v53, %v1942_v59 }
 0x646   : > { %1947 = vst.msk [vmem:[%s262_s18] sm:$0xff] %vm1946_vm9, %v1944_v34 }
 0x647   : > { %2449 = shalt.err (!%p2446_p8)
}
 0x648   : > { %2117 = dma.vmem_to_hbm [thread:$0]  (%p2570_p5), %s1962_s19, 128, %s1964_s20, %s1949_s22  }
 0x649 PF: > { %p2129_p9 = scmp.ge.s32.totalorder %s2488_s26, 2  ;;  %s1975_s13 = sand.u32 1, %s2476_s23  }
 0x64a   : > { %s1976_s14 = scalar_lea.sflag [#allocation5], %s1975_s13 }
 0x64b   : > { %p2124_p10 = pnand %p2129_p9, %p2574_p6 }
 0x64d   : > { %p2125_p11 = pneg %p2124_p10 }
 0x64f   : > { %2471 = dma.done.wait (%p2125_p11), %s1976_s14, 128  }
 0x650   : > { %2473 = vsyncadd (%p2125_p11), %s1976_s14, 4294967168  ;;  %p18_p12 = scmp.ge.s32.totalorder %s2557_s28, 4   ;;  %s4121_s23 = smov %s2480_s24 }
 0x651   : > { %s4122_s24 = smov %s2484_s25  ;;  %s4123_s25 = smov %s2568_s7 }
 0x652   : > { %s4124_s26 = smov %s2557_s28  ;;  %20 = sbr.rel (!%p18_p12) target bundleno = 6 (0x6), region = 84 }
 0x657   :  { %1982 = vsyncpa [#allocation4], 1 }
 0x658   :  { %1984 = vsyncpa [#allocation4 + $0x1], 1 }
 0x659   :  { %1985 = vsyncpa [#allocation5], 1 }
 0x65a   :  { %1987 = vsyncpa [#allocation5 + $0x1], 1 }

</bundles_post_ra>
